<compile_context>
chip_gen: v7x
topology: tpu7x:2x2x1
jax: 0.10.0
libtpu: 0.0.40
codegen_flags: <defaults>
</compile_context>

<pallas_src>
import jax
import jax.numpy as jnp
from jax.experimental import pallas as pl
from jax.experimental.pallas import tpu as pltpu


# ----------------------------------------------------------------------------- small helpers

def _round_up(n, m):
    return ((n + m - 1) // m) * m


def _pick_tile_rows(m, target=512):
    """Largest row tile <= target (multiple of 16 so f32/bf16 sublane tiling both divide)."""
    return min(target, _round_up(m, 16))


def _im2col(x, K, stride=1, padding=0):
    """Folded im2col: (N,H,W,Cin) -> (N*Ho*Wo, K*K*Cin). Stride applied in the slicing."""
    N, H, W, Cin = x.shape
    if padding:
        x = jnp.pad(x, ((0, 0), (padding, padding), (padding, padding), (0, 0)))
    Hp, Wp = x.shape[1], x.shape[2]
    Ho = (Hp - K) // stride + 1
    Wo = (Wp - K) // stride + 1
    cols = []
    for kh in range(K):
        for kw in range(K):
            sl = x[:, kh:kh + (Ho - 1) * stride + 1:stride,
                     kw:kw + (Wo - 1) * stride + 1:stride, :]
            cols.append(sl.reshape(N * Ho * Wo, Cin))
    return jnp.concatenate(cols, axis=1), Ho, Wo


def _bilinear_matrix(in_size, out_size):
    """PyTorch F.interpolate(mode='bilinear', align_corners=False) 1-D weights: (out, in)."""
    scale = in_size / out_size
    dst = jnp.arange(out_size, dtype=jnp.float32)
    src = jnp.maximum((dst + 0.5) * scale - 0.5, 0.0)
    i0 = jnp.clip(jnp.floor(src).astype(jnp.int32), 0, in_size - 1)
    i1 = jnp.minimum(i0 + 1, in_size - 1)
    frac = src - i0.astype(jnp.float32)
    Wm = jnp.zeros((out_size, in_size), jnp.float32)
    Wm = Wm.at[jnp.arange(out_size), i0].add(1.0 - frac)
    Wm = Wm.at[jnp.arange(out_size), i1].add(frac)
    return Wm


def _full_spec(a):
    """BlockSpec covering the whole (small) array, resident across grid steps."""
    zeros = (0,) * a.ndim
    return pl.BlockSpec(a.shape, lambda i, z=zeros: z)


# ----------------------------------------------------------------------------- kernel A: trunk

def _trunk_call(patches, x_flat, w_fold, b_s, w1, b1, wf4, bf4):
    """Fused: (conv_expand@conv_squeeze folded) + bias + residual -> ESA conv1 -> (conv_f@conv4).

    Outputs: s (M,C) f32, c1_ (M,f) bf16, cf4 (M,C) f32.  Gridded over row blocks (parallel).
    """
    M, KC = patches.shape
    C = w_fold.shape[1]
    f = w1.shape[1]

    TM = _pick_tile_rows(M)
    M_pad = _round_up(M, TM)
    if M_pad != M:
        patches = jnp.pad(patches, ((0, M_pad - M), (0, 0)))
        x_flat = jnp.pad(x_flat, ((0, M_pad - M), (0, 0)))

    def kernel(p_ref, x_ref, wfold_ref, bs_ref, w1_ref, b1_ref, wf4_ref, bf4_ref,
               s_ref, c1_ref, cf4_ref):
        # folded conv_expand@conv_squeeze: one MXU dot (bf16 operands, f32 acc) + bias + residual
        s = jnp.dot(p_ref[...], wfold_ref[...],
                    preferred_element_type=jnp.float32) + bs_ref[...] + x_ref[...]
        s_ref[...] = s
        # ESA conv1 (1x1 C -> f)
        c1 = jnp.dot(s.astype(jnp.bfloat16), w1_ref[...],
                     preferred_element_type=jnp.float32) + b1_ref[...]
        c1_ref[...] = c1.astype(jnp.bfloat16)
        # folded conv_f@conv4 (1x1 f -> C), conv4/conv_f biases already folded in bf4
        cf4_ref[...] = jnp.dot(c1.astype(jnp.bfloat16), wf4_ref[...],
                               preferred_element_type=jnp.float32) + bf4_ref[...]

    row = lambda cols: pl.BlockSpec((TM, cols), lambda i: (i, 0))

    s, c1_, cf4 = pl.pallas_call(
        kernel,
        out_shape=(jax.ShapeDtypeStruct((M_pad, C), jnp.float32),
                   jax.ShapeDtypeStruct((M_pad, f), jnp.bfloat16),
                   jax.ShapeDtypeStruct((M_pad, C), jnp.float32)),
        grid=(M_pad // TM,),
        in_specs=[row(KC), row(C), _full_spec(w_fold), _full_spec(b_s),
                  _full_spec(w1), _full_spec(b1), _full_spec(wf4), _full_spec(bf4)],
        out_specs=(row(C), row(f), row(C)),
        compiler_params=pltpu.CompilerParams(
            dimension_semantics=("parallel",),
            vmem_limit_bytes=32 * 1024 * 1024),   # tiled: per-step footprint is small on all gens
    )(patches, x_flat, w_fold, b_s, w1, b1, wf4, bf4)
    return s[:M], c1_[:M], cf4[:M]


# ----------------------------------------------------------------------------- kernel B: conv2

def _conv2_call(patches2, w2, b2):
    """ESA conv2 (3x3 stride-2, no pad) as a folded dot (M2, 9f)@(9f, f); gridded/parallel."""
    M2, KC = patches2.shape
    f = w2.shape[1]

    TM = _pick_tile_rows(M2)
    M2_pad = _round_up(M2, TM)
    if M2_pad != M2:
        patches2 = jnp.pad(patches2, ((0, M2_pad - M2), (0, 0)))

    def kernel(p_ref, w_ref, b_ref, o_ref):
        o_ref[...] = jnp.dot(p_ref[...], w_ref[...],
                             preferred_element_type=jnp.float32) + b_ref[...]

    out = pl.pallas_call(
        kernel,
        out_shape=jax.ShapeDtypeStruct((M2_pad, f), jnp.float32),
        grid=(M2_pad // TM,),
        in_specs=[pl.BlockSpec((TM, KC), lambda i: (i, 0)),
                  _full_spec(w2), _full_spec(b2)],
        out_specs=pl.BlockSpec((TM, f), lambda i: (i, 0)),
        compiler_params=pltpu.CompilerParams(
            dimension_semantics=("parallel",),
            vmem_limit_bytes=32 * 1024 * 1024),
    )(patches2, w2, b2)
    return out[:M2]


# ----------------------------------------------------------------------------- kernel C: tail

def _tail_call(pool_taps, s_slab, cf4_slab,
               wm_k, bm_r, w3_k, b3_r, w3b_k, b3b_r, w4_k,
               wy, WxC, selC, tileT, wd1, bd1, wd2, bd2,
               *, hp, wp, f, C, H, W):
    """Per-batch fused ESA tail + CCA + Hardtanh(0,1), gridded over N (parallel).

    Low-res chain runs in (hp, wp*f) layout with kron(I_wp, w) tap weights and a tiny
    zero-padded VMEM scratch (no O(Mp^2) shift matrices).  Full-res part runs in a
    lane-dense (H, W*C) slab layout.  Bilinear upsample is separable (two dots).
    """
    N = s_slab.shape[0]
    wpf = wp * f
    WC = W * C
    inv_hw = 1.0 / float(H * W)

    def kernel(pool_ref, s_ref, cf4_ref,
               wm_ref, bm_ref, w3_ref, b3_ref, w3b_ref, b3b_ref, w4k_ref,
               wy_ref, wxc_ref, selc_ref, tilet_ref,
               wd1_ref, bd1_ref, wd2_ref, bd2_ref,
               o_ref, pad_ref):
        # ---- 7x7 / stride-3 max-pool: balanced max tree over the 49 window taps
        vals = [pool_ref[t * hp:(t + 1) * hp, :] for t in range(49)]
        while len(vals) > 1:
            nxt = [jnp.maximum(vals[i], vals[i + 1]) for i in range(0, len(vals) - 1, 2)]
            if len(vals) % 2:
                nxt.append(vals[-1])
            vals = nxt
        vmax = vals[0]                                              # (hp, wp*f) f32

        def conv3x3(h2d, wk_ref, b_ref):
            # 3x3 pad-1 conv on the low-res map: zero-padded VMEM scratch + 9 static tap
            # slices, each matmul'd against kron(I_wp, w_tap) (bf16 operands, f32 acc).
            pad_ref[...] = jnp.zeros_like(pad_ref)
            pad_ref[1:hp + 1, f:(wp + 1) * f] = h2d
            acc = jnp.zeros((hp, wpf), jnp.float32) + b_ref[...]
            for t in range(9):
                dh, dw = t // 3, t % 3
                tap = pad_ref[dh:dh + hp, dw * f:(dw + wp) * f]
                acc = acc + jnp.dot(tap.astype(jnp.bfloat16), wk_ref[t],
                                    preferred_element_type=jnp.float32)
            return acc

        v_range = jnp.maximum(conv3x3(vmax, wm_ref, bm_ref), 0.0)   # relu(conv_max)
        c3 = jnp.maximum(conv3x3(v_range, w3_ref, b3_ref), 0.0)     # relu(conv3)
        c3 = conv3x3(c3, w3b_ref, b3b_ref)                          # conv3_

        # conv4 applied at LOW resolution (commutes with the channel-independent upsample)
        c3_4 = jnp.dot(c3.astype(jnp.bfloat16), w4k_ref[...],
                       preferred_element_type=jnp.float32)          # (hp, wp*C)

        # separable bilinear upsample: rows (H x hp dot) then columns (kron'd wx dot)
        a1 = jnp.dot(wy_ref[...], c3_4,
                     preferred_element_type=jnp.float32)            # (H, wp*C) f32
        up4 = jnp.dot(a1.astype(jnp.bfloat16), wxc_ref[...],
                      preferred_element_type=jnp.float32)           # (H, W*C)

        # ---- ESA spatial gate (exact sigmoid): cf4 already contains conv_f@conv4 + biases
        gate = 1.0 / (1.0 + jnp.exp(-(up4 + cf4_ref[...])))
        esa = s_ref[...] * gate                                      # (H, W*C) slab

        # ---- CCA: per-image contrast std + mean -> 1x1 MLP -> sigmoid -> channel scale
        colsum = jnp.sum(esa, axis=0, keepdims=True)                 # (1, W*C)
        mean_c = jnp.dot(colsum, selc_ref[...],
                         preferred_element_type=jnp.float32) * inv_hw        # (1, C)
        mean_slab = jnp.dot(mean_c, tilet_ref[...],
                            preferred_element_type=jnp.float32)              # (1, W*C)
        d = esa - mean_slab
        var_c = jnp.dot(jnp.sum(d * d, axis=0, keepdims=True), selc_ref[...],
                        preferred_element_type=jnp.float32) * inv_hw         # (1, C)
        y = jnp.sqrt(jnp.maximum(var_c, 0.0)) + mean_c
        h1 = jnp.maximum(jnp.dot(y, wd1_ref[...],
                                 preferred_element_type=jnp.float32) + bd1_ref[...], 0.0)
        z = 1.0 / (1.0 + jnp.exp(-(jnp.dot(h1, wd2_ref[...],
                                           preferred_element_type=jnp.float32) + bd2_ref[...])))
        z_slab = jnp.dot(z, tilet_ref[...],
                         preferred_element_type=jnp.float32)                 # (1, W*C)

        # ---- Hardtanh(0, 1)
        o_ref[...] = jnp.clip(esa * z_slab, 0.0, 1.0)

    batch = lambda rows, cols: pl.BlockSpec((None, rows, cols), lambda n: (n, 0, 0))

    return pl.pallas_call(
        kernel,
        out_shape=jax.ShapeDtypeStruct((N, H, WC), jnp.float32),
        grid=(N,),
        in_specs=[batch(49 * hp, wpf), batch(H, WC), batch(H, WC),
                  _full_spec(wm_k), _full_spec(bm_r), _full_spec(w3_k), _full_spec(b3_r),
                  _full_spec(w3b_k), _full_spec(b3b_r), _full_spec(w4_k),
                  _full_spec(wy), _full_spec(WxC), _full_spec(selC), _full_spec(tileT),
                  _full_spec(wd1), _full_spec(bd1), _full_spec(wd2), _full_spec(bd2)],
        out_specs=pl.BlockSpec((None, H, WC), lambda n: (n, 0, 0)),
        scratch_shapes=[pltpu.VMEM((hp + 2, (wp + 2) * f), jnp.float32)],
        compiler_params=pltpu.CompilerParams(
            dimension_semantics=("parallel",),
            vmem_limit_bytes=32 * 1024 * 1024),
    )(pool_taps, s_slab, cf4_slab, wm_k, bm_r, w3_k, b3_r, w3b_k, b3b_r, w4_k,
      wy, WxC, selC, tileT, wd1, bd1, wd2, bd2)


# ----------------------------------------------------------------------------- parameters

def init_params(key, in_channels, out_channels, tmp_channels, kernel_size):
    f = out_channels // 4          # ESA hidden channels
    cr = out_channels // 4         # CCA reduction=4
    keys = jax.random.split(key, 21)

    def rnd(k, shape, scale=0.1):
        return jax.random.normal(k, shape, jnp.float32) * scale

    mid = kernel_size // 2
    w_expand = rnd(keys[0], (kernel_size, kernel_size, in_channels, tmp_channels))
    # CompressedResidualAttentionBlock.initialize(): +1 at kernel center on the channel diagonal
    w_expand = w_expand.at[mid, mid].add(jnp.eye(in_channels, tmp_channels, dtype=jnp.float32))

    return {
        "w_expand": w_expand,                                                   # conv_expand (no bias)
        "w_squeeze": rnd(keys[1], (1, 1, tmp_channels, out_channels)),
        "b_squeeze": rnd(keys[2], (out_channels,)),
        # ESA
        "w_conv1": rnd(keys[3], (1, 1, out_channels, f)), "b_conv1": rnd(keys[4], (f,)),
        "w_conv_max": rnd(keys[5], (3, 3, f, f)), "b_conv_max": rnd(keys[6], (f,)),
        "w_conv2": rnd(keys[7], (3, 3, f, f)), "b_conv2": rnd(keys[8], (f,)),
        "w_conv3": rnd(keys[9], (3, 3, f, f)), "b_conv3": rnd(keys[10], (f,)),
        "w_conv3_": rnd(keys[11], (3, 3, f, f)), "b_conv3_": rnd(keys[12], (f,)),
        "w_conv_f": rnd(keys[13], (1, 1, f, f)), "b_conv_f": rnd(keys[14], (f,)),
        "w_conv4": rnd(keys[15], (1, 1, f, out_channels)), "b_conv4": rnd(keys[16], (out_channels,)),
        # CCA conv_du
        "w_du1": rnd(keys[17], (out_channels, cr)), "b_du1": rnd(keys[18], (cr,)),
        "w_du2": rnd(keys[19], (cr, out_channels)), "b_du2": rnd(keys[20], (out_channels,)),
    }


# ----------------------------------------------------------------------------- forward

def compressed_residual_attention_block(x, p):
    """x: (N, H, W, Cin) NHWC float32. Non-collapsed forward of CompressedResidualAttentionBlock."""
    N, H, W, Cin = x.shape
    K = p["w_expand"].shape[0]
    Ctmp = p["w_expand"].shape[3]
    C = p["w_squeeze"].shape[3]
    f = p["w_conv1"].shape[3]
    cr = p["w_du1"].shape[1]
    assert Cin == C, "residual add (ESA(out + x)) requires in_channels == out_channels"
    pad = (K - 1) // 2
    M = N * H * W

    # ---- exact weight folds (done once, f32, in the wrapper)
    w_fold = p["w_expand"].reshape(K * K * Cin, Ctmp) @ p["w_squeeze"].reshape(Ctmp, C)
    wf4 = p["w_conv_f"].reshape(f, f) @ p["w_conv4"].reshape(f, C)
    bf4 = p["b_conv_f"].reshape(1, f) @ p["w_conv4"].reshape(f, C) + p["b_conv4"].reshape(1, C)

    # ---- kernel A: trunk (folded conv + bias + residual, ESA conv1, folded conv_f@conv4)
    patches, _, _ = _im2col(x.astype(jnp.bfloat16), K, stride=1, padding=pad)
    x_flat = x.reshape(M, C)
    s, c1_, cf4 = _trunk_call(
        patches, x_flat,
        w_fold.astype(jnp.bfloat16), p["b_squeeze"].reshape(1, C),
        p["w_conv1"].reshape(C, f).astype(jnp.bfloat16), p["b_conv1"].reshape(1, f),
        wf4.astype(jnp.bfloat16), bf4)

    # ---- kernel B: ESA conv2 (3x3, stride 2, no padding); stride applied in the slicing
    c1_4d = c1_.reshape(N, H, W, f)                         # bf16 (halves patch bytes)
    patches2, H2, W2 = _im2col(c1_4d, 3, stride=2, padding=0)
    assert H2 >= 7 and W2 >= 7, "input too small for ESA's 7x7/stride-3 max-pool"
    c1 = _conv2_call(patches2, p["w_conv2"].reshape(9 * f, f).astype(jnp.bfloat16),
                     p["b_conv2"].reshape(1, f))            # (N*H2*W2, f) f32

    # ---- glue for kernel C (all tiny, low-res / per-channel operators)
    hp = (H2 - 7) // 3 + 1
    wp = (W2 - 7) // 3 + 1
    c1s = c1.reshape(N, H2, W2, f)
    pool_taps = jnp.concatenate(
        [c1s[:, dh:dh + (hp - 1) * 3 + 1:3, dw:dw + (wp - 1) * 3 + 1:3, :].reshape(N, hp, wp * f)
         for dh in range(7) for dw in range(7)], axis=1)    # (N, 49*hp, wp*f)

    eye_wp = jnp.eye(wp, dtype=jnp.float32)
    eye_C = jnp.eye(C, dtype=jnp.float32)

    def kron_taps(w):      # (3,3,f,f) -> (9, wp*f, wp*f) bf16 per-tap kron(I_wp, w)
        return jnp.stack([jnp.kron(eye_wp, w[dh, dw])
                          for dh in range(3) for dw in range(3)]).astype(jnp.bfloat16)

    def tile_bias(b):      # (f,) -> (1, wp*f)
        return jnp.tile(b.reshape(1, f), (1, wp))

    wm_k, bm_r = kron_taps(p["w_conv_max"]), tile_bias(p["b_conv_max"])
    w3_k, b3_r = kron_taps(p["w_conv3"]), tile_bias(p["b_conv3"])
    w3b_k, b3b_r = kron_taps(p["w_conv3_"]), tile_bias(p["b_conv3_"])
    w4_k = jnp.kron(eye_wp, p["w_conv4"].reshape(f, C)).astype(jnp.bfloat16)   # (wp*f, wp*C)

    # separable bilinear upsample operators (no dense (H*W, N*hp*wp) matrix)
    wy = _bilinear_matrix(hp, H)                                                # (H, hp) f32
    wx = _bilinear_matrix(wp, W)                                                # (W, wp) f32
    WxC = jnp.kron(wx.T, eye_C).astype(jnp.bfloat16)                            # (wp*C, W*C)

    # CCA channel-sum / channel-broadcast helpers in (H, W*C) slab layout
    selC = jnp.tile(eye_C, (W, 1))                                              # (W*C, C)
    tileT = jnp.tile(eye_C, (1, W))                                             # (C, W*C)

    # lane-dense slab layout for the full-res tensors (free, contiguous reshapes)
    s_slab = s.reshape(N, H, W * C)
    cf4_slab = cf4.reshape(N, H, W * C)

    # ---- kernel C: fused max-pool + low-res convs + upsample + gate + CCA + Hardtanh(0,1)
    out_slab = _tail_call(pool_taps, s_slab, cf4_slab,
                          wm_k, bm_r, w3_k, b3_r, w3b_k, b3b_r, w4_k,
                          wy, WxC, selC, tileT,
                          p["w_du1"], p["b_du1"].reshape(1, cr),
                          p["w_du2"], p["b_du2"].reshape(1, C),
                          hp=hp, wp=wp, f=f, C=C, H=H, W=W)
    return out_slab.reshape(N, H, W, C)


# ----------------------------------------------------------------------------- main

if __name__ == "__main__":
    key = jax.random.PRNGKey(0)
    kx, kp = jax.random.split(key)

    # Small shapes consistent with the module (H, W >= 16 so ESA's 7x7/stride-3 max-pool is valid).
    N, H, W, C = 2, 16, 16, 16
    tmp_channels = 32
    kernel_size = 3

    x = jax.random.uniform(kx, (N, H, W, C), jnp.float32)
    params = init_params(kp, C, C, tmp_channels, kernel_size)

    fwd = jax.jit(compressed_residual_attention_block)
    out = jax.block_until_ready(fwd(x, params))

    assert out.shape == (N, H, W, C)
    assert bool(jnp.all(jnp.isfinite(out)))
    assert bool(jnp.all(out >= 0.0)) and bool(jnp.all(out <= 1.0))  # Hardtanh(0,1) range
    print("KERNEL_OK")
</pallas_src>

<mosaic_0001>
module attributes {stable_mosaic.version = 11 : i64} {
  func.func private @main(%arg0: i32) attributes {dimension_semantics = [#tpu.dimension_semantics<core_parallel>], iteration_bounds = array<i64: 2>, tpu.core_type = #tpu.core_type<sc_scalar_subcore>, window_params = []} {
    return
  }
}

module attributes {stable_mosaic.version = 11 : i64} {
  func.func private @main(%arg0: i32) attributes {dimension_semantics = [#tpu.dimension_semantics<core_parallel>], iteration_bounds = array<i64: 2>, tpu.core_type = #tpu.core_type<sc_scalar_subcore>, window_params = []} {
    return
  }
}

module attributes {stable_mosaic.version = 11 : i64} {
  func.func @kernel(%arg0: i32, %arg1: memref<512x144xbf16, #tpu.memory_space<vmem>>, %arg2: memref<512x16xf32, #tpu.memory_space<vmem>>, %arg3: memref<144x16xbf16, #tpu.memory_space<vmem>>, %arg4: memref<1x16xf32, #tpu.memory_space<vmem>>, %arg5: memref<16x4xbf16, #tpu.memory_space<vmem>>, %arg6: memref<1x4xf32, #tpu.memory_space<vmem>>, %arg7: memref<4x16xbf16, #tpu.memory_space<vmem>>, %arg8: memref<1x16xf32, #tpu.memory_space<vmem>>, %arg9: memref<512x16xf32, #tpu.memory_space<vmem>>, %arg10: memref<512x4xbf16, #tpu.memory_space<vmem>>, %arg11: memref<512x16xf32, #tpu.memory_space<vmem>>) attributes {dimension_semantics = [#tpu.dimension_semantics<parallel>], iteration_bounds = array<i64: 1>, scalar_prefetch = 0 : i64, scratch_operands = 0 : i64, tpu.core_type = #tpu.core_type<tc>, window_params = [{transform_indices = @transform_0, window_bounds = array<i64: 512, 144>}, {transform_indices = @transform_1, window_bounds = array<i64: 512, 16>}, {pipeline_mode = #tpu.pipeline_mode<synchronous>, transform_indices = @transform_2, window_bounds = array<i64: 144, 16>}, {pipeline_mode = #tpu.pipeline_mode<synchronous>, transform_indices = @transform_3, window_bounds = array<i64: 1, 16>}, {pipeline_mode = #tpu.pipeline_mode<synchronous>, transform_indices = @transform_4, window_bounds = array<i64: 16, 4>}, {pipeline_mode = #tpu.pipeline_mode<synchronous>, transform_indices = @transform_5, window_bounds = array<i64: 1, 4>}, {pipeline_mode = #tpu.pipeline_mode<synchronous>, transform_indices = @transform_6, window_bounds = array<i64: 4, 16>}, {pipeline_mode = #tpu.pipeline_mode<synchronous>, transform_indices = @transform_7, window_bounds = array<i64: 1, 16>}, {transform_indices = @transform_8, window_bounds = array<i64: 512, 16>}, {transform_indices = @transform_9, window_bounds = array<i64: 512, 4>}, {transform_indices = @transform_10, window_bounds = array<i64: 512, 16>}]} {
    %c0 = arith.constant 0 : index
    %c0_0 = arith.constant 0 : index
    %0 = vector.load %arg1[%c0, %c0_0] : memref<512x144xbf16, #tpu.memory_space<vmem>>, vector<512x144xbf16>
    %c0_1 = arith.constant 0 : index
    %c0_2 = arith.constant 0 : index
    %1 = vector.load %arg3[%c0_1, %c0_2] : memref<144x16xbf16, #tpu.memory_space<vmem>>, vector<144x16xbf16>
    %cst = arith.constant dense<0.000000e+00> : vector<512x16xf32>
    %2 = tpu.matmul %0, %1, %cst {dimension_numbers = #tpu.dot_dimension_numbers<[1], [0], [0], [1], [0, 0, 1, 1], [], []>} : vector<512x144xbf16>, vector<144x16xbf16>, vector<512x16xf32> -> vector<512x16xf32>
    %c0_3 = arith.constant 0 : index
    %c0_4 = arith.constant 0 : index
    %3 = vector.load %arg4[%c0_3, %c0_4] : memref<1x16xf32, #tpu.memory_space<vmem>>, vector<1x16xf32>
    %4 = vector.broadcast %3 : vector<1x16xf32> to vector<512x16xf32>
    %5 = arith.addf %2, %4 : vector<512x16xf32>
    %c0_5 = arith.constant 0 : index
    %c0_6 = arith.constant 0 : index
    %6 = vector.load %arg2[%c0_5, %c0_6] : memref<512x16xf32, #tpu.memory_space<vmem>>, vector<512x16xf32>
    %7 = arith.addf %5, %6 : vector<512x16xf32>
    %c0_7 = arith.constant 0 : index
    %c0_8 = arith.constant 0 : index
    %8 = vector.load %arg9[%c0_7, %c0_8] : memref<512x16xf32, #tpu.memory_space<vmem>>, vector<512x16xf32>
    tpu.vector_store %arg9[%c0_7, %c0_8], %7 {strides = array<i32>} : memref<512x16xf32, #tpu.memory_space<vmem>>, vector<512x16xf32>,
    %9 = arith.truncf %7 : vector<512x16xf32> to vector<512x16xbf16>
    %c0_9 = arith.constant 0 : index
    %c0_10 = arith.constant 0 : index
    %10 = vector.load %arg5[%c0_9, %c0_10] : memref<16x4xbf16, #tpu.memory_space<vmem>>, vector<16x4xbf16>
    %cst_11 = arith.constant dense<0.000000e+00> : vector<512x4xf32>
    %11 = tpu.matmul %9, %10, %cst_11 {dimension_numbers = #tpu.dot_dimension_numbers<[1], [0], [0], [1], [0, 0, 1, 1], [], []>} : vector<512x16xbf16>, vector<16x4xbf16>, vector<512x4xf32> -> vector<512x4xf32>
    %c0_12 = arith.constant 0 : index
    %c0_13 = arith.constant 0 : index
    %12 = vector.load %arg6[%c0_12, %c0_13] : memref<1x4xf32, #tpu.memory_space<vmem>>, vector<1x4xf32>
    %13 = vector.broadcast %12 : vector<1x4xf32> to vector<512x4xf32>
    %14 = arith.addf %11, %13 : vector<512x4xf32>
    %15 = arith.truncf %14 : vector<512x4xf32> to vector<512x4xbf16>
    %c0_14 = arith.constant 0 : index
    %c0_15 = arith.constant 0 : index
    %16 = vector.load %arg10[%c0_14, %c0_15] : memref<512x4xbf16, #tpu.memory_space<vmem>>, vector<512x4xbf16>
    tpu.vector_store %arg10[%c0_14, %c0_15], %15 {strides = array<i32>} : memref<512x4xbf16, #tpu.memory_space<vmem>>, vector<512x4xbf16>,
    %17 = arith.truncf %14 : vector<512x4xf32> to vector<512x4xbf16>
    %c0_16 = arith.constant 0 : index
    %c0_17 = arith.constant 0 : index
    %18 = vector.load %arg7[%c0_16, %c0_17] : memref<4x16xbf16, #tpu.memory_space<vmem>>, vector<4x16xbf16>
    %cst_18 = arith.constant dense<0.000000e+00> : vector<512x16xf32>
    %19 = tpu.matmul %17, %18, %cst_18 {dimension_numbers = #tpu.dot_dimension_numbers<[1], [0], [0], [1], [0, 0, 1, 1], [], []>} : vector<512x4xbf16>, vector<4x16xbf16>, vector<512x16xf32> -> vector<512x16xf32>
    %c0_19 = arith.constant 0 : index
    %c0_20 = arith.constant 0 : index
    %20 = vector.load %arg8[%c0_19, %c0_20] : memref<1x16xf32, #tpu.memory_space<vmem>>, vector<1x16xf32>
    %21 = vector.broadcast %20 : vector<1x16xf32> to vector<512x16xf32>
    %22 = arith.addf %19, %21 : vector<512x16xf32>
    %c0_21 = arith.constant 0 : index
    %c0_22 = arith.constant 0 : index
    %23 = vector.load %arg11[%c0_21, %c0_22] : memref<512x16xf32, #tpu.memory_space<vmem>>, vector<512x16xf32>
    tpu.vector_store %arg11[%c0_21, %c0_22], %22 {strides = array<i32>} : memref<512x16xf32, #tpu.memory_space<vmem>>, vector<512x16xf32>,
    return
  }
  func.func @transform_0(%arg0: i32) -> (i32, i32) {
    %c0_i32 = arith.constant 0 : i32
    %c0_i32_0 = arith.constant 0 : i32
    return %arg0, %c0_i32 : i32, i32
  }
  func.func @transform_1(%arg0: i32) -> (i32, i32) {
    %c0_i32 = arith.constant 0 : i32
    %c0_i32_0 = arith.constant 0 : i32
    return %arg0, %c0_i32 : i32, i32
  }
  func.func @transform_2(%arg0: i32) -> (i32, i32) {
    %c0_i32 = arith.constant 0 : i32
    %c0_i32_0 = arith.constant 0 : i32
    %c0_i32_1 = arith.constant 0 : i32
    return %c0_i32, %c0_i32_0 : i32, i32
  }
  func.func @transform_3(%arg0: i32) -> (i32, i32) {
    %c0_i32 = arith.constant 0 : i32
    %c0_i32_0 = arith.constant 0 : i32
    %c0_i32_1 = arith.constant 0 : i32
    return %c0_i32, %c0_i32_0 : i32, i32
  }
  func.func @transform_4(%arg0: i32) -> (i32, i32) {
    %c0_i32 = arith.constant 0 : i32
    %c0_i32_0 = arith.constant 0 : i32
    %c0_i32_1 = arith.constant 0 : i32
    return %c0_i32, %c0_i32_0 : i32, i32
  }
  func.func @transform_5(%arg0: i32) -> (i32, i32) {
    %c0_i32 = arith.constant 0 : i32
    %c0_i32_0 = arith.constant 0 : i32
    %c0_i32_1 = arith.constant 0 : i32
    return %c0_i32, %c0_i32_0 : i32, i32
  }
  func.func @transform_6(%arg0: i32) -> (i32, i32) {
    %c0_i32 = arith.constant 0 : i32
    %c0_i32_0 = arith.constant 0 : i32
    %c0_i32_1 = arith.constant 0 : i32
    return %c0_i32, %c0_i32_0 : i32, i32
  }
  func.func @transform_7(%arg0: i32) -> (i32, i32) {
    %c0_i32 = arith.constant 0 : i32
    %c0_i32_0 = arith.constant 0 : i32
    %c0_i32_1 = arith.constant 0 : i32
    return %c0_i32, %c0_i32_0 : i32, i32
  }
  func.func @transform_8(%arg0: i32) -> (i32, i32) {
    %c0_i32 = arith.constant 0 : i32
    %c0_i32_0 = arith.constant 0 : i32
    return %arg0, %c0_i32 : i32, i32
  }
  func.func @transform_9(%arg0: i32) -> (i32, i32) {
    %c0_i32 = arith.constant 0 : i32
    %c0_i32_0 = arith.constant 0 : i32
    return %arg0, %c0_i32 : i32, i32
  }
  func.func @transform_10(%arg0: i32) -> (i32, i32) {
    %c0_i32 = arith.constant 0 : i32
    %c0_i32_0 = arith.constant 0 : i32
    return %arg0, %c0_i32 : i32, i32
  }
}

module attributes {stable_mosaic.version = 11 : i64} {
  func.func @kernel(%arg0: i32, %arg1: memref<112x36xbf16, #tpu.memory_space<vmem>>, %arg2: memref<36x4xbf16, #tpu.memory_space<vmem>>, %arg3: memref<1x4xf32, #tpu.memory_space<vmem>>, %arg4: memref<112x4xf32, #tpu.memory_space<vmem>>) attributes {dimension_semantics = [#tpu.dimension_semantics<parallel>], iteration_bounds = array<i64: 1>, scalar_prefetch = 0 : i64, scratch_operands = 0 : i64, tpu.core_type = #tpu.core_type<tc>, window_params = [{transform_indices = @transform_0, window_bounds = array<i64: 112, 36>}, {pipeline_mode = #tpu.pipeline_mode<synchronous>, transform_indices = @transform_1, window_bounds = array<i64: 36, 4>}, {pipeline_mode = #tpu.pipeline_mode<synchronous>, transform_indices = @transform_2, window_bounds = array<i64: 1, 4>}, {transform_indices = @transform_3, window_bounds = array<i64: 112, 4>}]} {
    %c0 = arith.constant 0 : index
    %c0_0 = arith.constant 0 : index
    %0 = vector.load %arg1[%c0, %c0_0] : memref<112x36xbf16, #tpu.memory_space<vmem>>, vector<112x36xbf16>
    %c0_1 = arith.constant 0 : index
    %c0_2 = arith.constant 0 : index
    %1 = vector.load %arg2[%c0_1, %c0_2] : memref<36x4xbf16, #tpu.memory_space<vmem>>, vector<36x4xbf16>
    %cst = arith.constant dense<0.000000e+00> : vector<112x4xf32>
    %2 = tpu.matmul %0, %1, %cst {dimension_numbers = #tpu.dot_dimension_numbers<[1], [0], [0], [1], [0, 0, 1, 1], [], []>} : vector<112x36xbf16>, vector<36x4xbf16>, vector<112x4xf32> -> vector<112x4xf32>
    %c0_3 = arith.constant 0 : index
    %c0_4 = arith.constant 0 : index
    %3 = vector.load %arg3[%c0_3, %c0_4] : memref<1x4xf32, #tpu.memory_space<vmem>>, vector<1x4xf32>
    %4 = vector.broadcast %3 : vector<1x4xf32> to vector<112x4xf32>
    %5 = arith.addf %2, %4 : vector<112x4xf32>
    %c0_5 = arith.constant 0 : index
    %c0_6 = arith.constant 0 : index
    %6 = vector.load %arg4[%c0_5, %c0_6] : memref<112x4xf32, #tpu.memory_space<vmem>>, vector<112x4xf32>
    tpu.vector_store %arg4[%c0_5, %c0_6], %5 {strides = array<i32>} : memref<112x4xf32, #tpu.memory_space<vmem>>, vector<112x4xf32>,
    return
  }
  func.func @transform_0(%arg0: i32) -> (i32, i32) {
    %c0_i32 = arith.constant 0 : i32
    %c0_i32_0 = arith.constant 0 : i32
    return %arg0, %c0_i32 : i32, i32
  }
  func.func @transform_1(%arg0: i32) -> (i32, i32) {
    %c0_i32 = arith.constant 0 : i32
    %c0_i32_0 = arith.constant 0 : i32
    %c0_i32_1 = arith.constant 0 : i32
    return %c0_i32, %c0_i32_0 : i32, i32
  }
  func.func @transform_2(%arg0: i32) -> (i32, i32) {
    %c0_i32 = arith.constant 0 : i32
    %c0_i32_0 = arith.constant 0 : i32
    %c0_i32_1 = arith.constant 0 : i32
    return %c0_i32, %c0_i32_0 : i32, i32
  }
  func.func @transform_3(%arg0: i32) -> (i32, i32) {
    %c0_i32 = arith.constant 0 : i32
    %c0_i32_0 = arith.constant 0 : i32
    return %arg0, %c0_i32 : i32, i32
  }
}

module attributes {stable_mosaic.version = 11 : i64} {
  func.func @kernel(%arg0: i32, %arg1: memref<1x49x4xf32, #tpu.memory_space<vmem>>, %arg2: memref<1x16x256xf32, #tpu.memory_space<vmem>>, %arg3: memref<1x16x256xf32, #tpu.memory_space<vmem>>, %arg4: memref<9x4x4xbf16, #tpu.memory_space<vmem>>, %arg5: memref<1x4xf32, #tpu.memory_space<vmem>>, %arg6: memref<9x4x4xbf16, #tpu.memory_space<vmem>>, %arg7: memref<1x4xf32, #tpu.memory_space<vmem>>, %arg8: memref<9x4x4xbf16, #tpu.memory_space<vmem>>, %arg9: memref<1x4xf32, #tpu.memory_space<vmem>>, %arg10: memref<4x16xbf16, #tpu.memory_space<vmem>>, %arg11: memref<16x1xf32, #tpu.memory_space<vmem>>, %arg12: memref<16x256xbf16, #tpu.memory_space<vmem>>, %arg13: memref<256x16xf32, #tpu.memory_space<vmem>>, %arg14: memref<16x256xf32, #tpu.memory_space<vmem>>, %arg15: memref<16x4xf32, #tpu.memory_space<vmem>>, %arg16: memref<1x4xf32, #tpu.memory_space<vmem>>, %arg17: memref<4x16xf32, #tpu.memory_space<vmem>>, %arg18: memref<1x16xf32, #tpu.memory_space<vmem>>, %arg19: memref<1x16x256xf32, #tpu.memory_space<vmem>>, %arg20: memref<3x12xf32, #tpu.memory_space<vmem>>) attributes {dimension_semantics = [#tpu.dimension_semantics<parallel>], iteration_bounds = array<i64: 2>, scalar_prefetch = 0 : i64, scratch_operands = 1 : i64, tpu.core_type = #tpu.core_type<tc>, window_params = [{transform_indices = @transform_0, window_bounds = array<i64: 1, 49, 4>}, {transform_indices = @transform_1, window_bounds = array<i64: 1, 16, 256>}, {transform_indices = @transform_2, window_bounds = array<i64: 1, 16, 256>}, {pipeline_mode = #tpu.pipeline_mode<synchronous>, transform_indices = @transform_3, window_bounds = array<i64: 9, 4, 4>}, {pipeline_mode = #tpu.pipeline_mode<synchronous>, transform_indices = @transform_4, window_bounds = array<i64: 1, 4>}, {pipeline_mode = #tpu.pipeline_mode<synchronous>, transform_indices = @transform_5, window_bounds = array<i64: 9, 4, 4>}, {pipeline_mode = #tpu.pipeline_mode<synchronous>, transform_indices = @transform_6, window_bounds = array<i64: 1, 4>}, {pipeline_mode = #tpu.pipeline_mode<synchronous>, transform_indices = @transform_7, window_bounds = array<i64: 9, 4, 4>}, {pipeline_mode = #tpu.pipeline_mode<synchronous>, transform_indices = @transform_8, window_bounds = array<i64: 1, 4>}, {pipeline_mode = #tpu.pipeline_mode<synchronous>, transform_indices = @transform_9, window_bounds = array<i64: 4, 16>}, {pipeline_mode = #tpu.pipeline_mode<synchronous>, transform_indices = @transform_10, window_bounds = array<i64: 16, 1>}, {pipeline_mode = #tpu.pipeline_mode<synchronous>, transform_indices = @transform_11, window_bounds = array<i64: 16, 256>}, {pipeline_mode = #tpu.pipeline_mode<synchronous>, transform_indices = @transform_12, window_bounds = array<i64: 256, 16>}, {pipeline_mode = #tpu.pipeline_mode<synchronous>, transform_indices = @transform_13, window_bounds = array<i64: 16, 256>}, {pipeline_mode = #tpu.pipeline_mode<synchronous>, transform_indices = @transform_14, window_bounds = array<i64: 16, 4>}, {pipeline_mode = #tpu.pipeline_mode<synchronous>, transform_indices = @transform_15, window_bounds = array<i64: 1, 4>}, {pipeline_mode = #tpu.pipeline_mode<synchronous>, transform_indices = @transform_16, window_bounds = array<i64: 4, 16>}, {pipeline_mode = #tpu.pipeline_mode<synchronous>, transform_indices = @transform_17, window_bounds = array<i64: 1, 16>}, {transform_indices = @transform_18, window_bounds = array<i64: 1, 16, 256>}]} {
    %c0 = arith.constant 0 : index
    %c0_0 = arith.constant 0 : index
    %c0_1 = arith.constant 0 : index
    %0 = vector.load %arg1[%c0, %c0_0, %c0_1] : memref<1x49x4xf32, #tpu.memory_space<vmem>>, vector<1x1x4xf32>
    %1 = vector.shape_cast %0 : vector<1x1x4xf32> to vector<1x4xf32>
    %c0_2 = arith.constant 0 : index
    %c1 = arith.constant 1 : index
    %c0_3 = arith.constant 0 : index
    %2 = vector.load %arg1[%c0_2, %c1, %c0_3] : memref<1x49x4xf32, #tpu.memory_space<vmem>>, vector<1x1x4xf32>
    %3 = vector.shape_cast %2 : vector<1x1x4xf32> to vector<1x4xf32>
    %c0_4 = arith.constant 0 : index
    %c2 = arith.constant 2 : index
    %c0_5 = arith.constant 0 : index
    %4 = vector.load %arg1[%c0_4, %c2, %c0_5] : memref<1x49x4xf32, #tpu.memory_space<vmem>>, vector<1x1x4xf32>
    %5 = vector.shape_cast %4 : vector<1x1x4xf32> to vector<1x4xf32>
    %c0_6 = arith.constant 0 : index
    %c3 = arith.constant 3 : index
    %c0_7 = arith.constant 0 : index
    %6 = vector.load %arg1[%c0_6, %c3, %c0_7] : memref<1x49x4xf32, #tpu.memory_space<vmem>>, vector<1x1x4xf32>
    %7 = vector.shape_cast %6 : vector<1x1x4xf32> to vector<1x4xf32>
    %c0_8 = arith.constant 0 : index
    %c4 = arith.constant 4 : index
    %c0_9 = arith.constant 0 : index
    %8 = vector.load %arg1[%c0_8, %c4, %c0_9] : memref<1x49x4xf32, #tpu.memory_space<vmem>>, vector<1x1x4xf32>
    %9 = vector.shape_cast %8 : vector<1x1x4xf32> to vector<1x4xf32>
    %c0_10 = arith.constant 0 : index
    %c5 = arith.constant 5 : index
    %c0_11 = arith.constant 0 : index
    %10 = vector.load %arg1[%c0_10, %c5, %c0_11] : memref<1x49x4xf32, #tpu.memory_space<vmem>>, vector<1x1x4xf32>
    %11 = vector.shape_cast %10 : vector<1x1x4xf32> to vector<1x4xf32>
    %c0_12 = arith.constant 0 : index
    %c6 = arith.constant 6 : index
    %c0_13 = arith.constant 0 : index
    %12 = vector.load %arg1[%c0_12, %c6, %c0_13] : memref<1x49x4xf32, #tpu.memory_space<vmem>>, vector<1x1x4xf32>
    %13 = vector.shape_cast %12 : vector<1x1x4xf32> to vector<1x4xf32>
    %c0_14 = arith.constant 0 : index
    %c7 = arith.constant 7 : index
    %c0_15 = arith.constant 0 : index
    %14 = vector.load %arg1[%c0_14, %c7, %c0_15] : memref<1x49x4xf32, #tpu.memory_space<vmem>>, vector<1x1x4xf32>
    %15 = vector.shape_cast %14 : vector<1x1x4xf32> to vector<1x4xf32>
    %c0_16 = arith.constant 0 : index
    %c8 = arith.constant 8 : index
    %c0_17 = arith.constant 0 : index
    %16 = vector.load %arg1[%c0_16, %c8, %c0_17] : memref<1x49x4xf32, #tpu.memory_space<vmem>>, vector<1x1x4xf32>
    %17 = vector.shape_cast %16 : vector<1x1x4xf32> to vector<1x4xf32>
    %c0_18 = arith.constant 0 : index
    %c9 = arith.constant 9 : index
    %c0_19 = arith.constant 0 : index
    %18 = vector.load %arg1[%c0_18, %c9, %c0_19] : memref<1x49x4xf32, #tpu.memory_space<vmem>>, vector<1x1x4xf32>
    %19 = vector.shape_cast %18 : vector<1x1x4xf32> to vector<1x4xf32>
    %c0_20 = arith.constant 0 : index
    %c10 = arith.constant 10 : index
    %c0_21 = arith.constant 0 : index
    %20 = vector.load %arg1[%c0_20, %c10, %c0_21] : memref<1x49x4xf32, #tpu.memory_space<vmem>>, vector<1x1x4xf32>
    %21 = vector.shape_cast %20 : vector<1x1x4xf32> to vector<1x4xf32>
    %c0_22 = arith.constant 0 : index
    %c11 = arith.constant 11 : index
    %c0_23 = arith.constant 0 : index
    %22 = vector.load %arg1[%c0_22, %c11, %c0_23] : memref<1x49x4xf32, #tpu.memory_space<vmem>>, vector<1x1x4xf32>
    %23 = vector.shape_cast %22 : vector<1x1x4xf32> to vector<1x4xf32>
    %c0_24 = arith.constant 0 : index
    %c12 = arith.constant 12 : index
    %c0_25 = arith.constant 0 : index
    %24 = vector.load %arg1[%c0_24, %c12, %c0_25] : memref<1x49x4xf32, #tpu.memory_space<vmem>>, vector<1x1x4xf32>
    %25 = vector.shape_cast %24 : vector<1x1x4xf32> to vector<1x4xf32>
    %c0_26 = arith.constant 0 : index
    %c13 = arith.constant 13 : index
    %c0_27 = arith.constant 0 : index
    %26 = vector.load %arg1[%c0_26, %c13, %c0_27] : memref<1x49x4xf32, #tpu.memory_space<vmem>>, vector<1x1x4xf32>
    %27 = vector.shape_cast %26 : vector<1x1x4xf32> to vector<1x4xf32>
    %c0_28 = arith.constant 0 : index
    %c14 = arith.constant 14 : index
    %c0_29 = arith.constant 0 : index
    %28 = vector.load %arg1[%c0_28, %c14, %c0_29] : memref<1x49x4xf32, #tpu.memory_space<vmem>>, vector<1x1x4xf32>
    %29 = vector.shape_cast %28 : vector<1x1x4xf32> to vector<1x4xf32>
    %c0_30 = arith.constant 0 : index
    %c15 = arith.constant 15 : index
    %c0_31 = arith.constant 0 : index
    %30 = vector.load %arg1[%c0_30, %c15, %c0_31] : memref<1x49x4xf32, #tpu.memory_space<vmem>>, vector<1x1x4xf32>
    %31 = vector.shape_cast %30 : vector<1x1x4xf32> to vector<1x4xf32>
    %c0_32 = arith.constant 0 : index
    %c16 = arith.constant 16 : index
    %c0_33 = arith.constant 0 : index
    %32 = vector.load %arg1[%c0_32, %c16, %c0_33] : memref<1x49x4xf32, #tpu.memory_space<vmem>>, vector<1x1x4xf32>
    %33 = vector.shape_cast %32 : vector<1x1x4xf32> to vector<1x4xf32>
    %c0_34 = arith.constant 0 : index
    %c17 = arith.constant 17 : index
    %c0_35 = arith.constant 0 : index
    %34 = vector.load %arg1[%c0_34, %c17, %c0_35] : memref<1x49x4xf32, #tpu.memory_space<vmem>>, vector<1x1x4xf32>
    %35 = vector.shape_cast %34 : vector<1x1x4xf32> to vector<1x4xf32>
    %c0_36 = arith.constant 0 : index
    %c18 = arith.constant 18 : index
    %c0_37 = arith.constant 0 : index
    %36 = vector.load %arg1[%c0_36, %c18, %c0_37] : memref<1x49x4xf32, #tpu.memory_space<vmem>>, vector<1x1x4xf32>
    %37 = vector.shape_cast %36 : vector<1x1x4xf32> to vector<1x4xf32>
    %c0_38 = arith.constant 0 : index
    %c19 = arith.constant 19 : index
    %c0_39 = arith.constant 0 : index
    %38 = vector.load %arg1[%c0_38, %c19, %c0_39] : memref<1x49x4xf32, #tpu.memory_space<vmem>>, vector<1x1x4xf32>
    %39 = vector.shape_cast %38 : vector<1x1x4xf32> to vector<1x4xf32>
    %c0_40 = arith.constant 0 : index
    %c20 = arith.constant 20 : index
    %c0_41 = arith.constant 0 : index
    %40 = vector.load %arg1[%c0_40, %c20, %c0_41] : memref<1x49x4xf32, #tpu.memory_space<vmem>>, vector<1x1x4xf32>
    %41 = vector.shape_cast %40 : vector<1x1x4xf32> to vector<1x4xf32>
    %c0_42 = arith.constant 0 : index
    %c21 = arith.constant 21 : index
    %c0_43 = arith.constant 0 : index
    %42 = vector.load %arg1[%c0_42, %c21, %c0_43] : memref<1x49x4xf32, #tpu.memory_space<vmem>>, vector<1x1x4xf32>
    %43 = vector.shape_cast %42 : vector<1x1x4xf32> to vector<1x4xf32>
    %c0_44 = arith.constant 0 : index
    %c22 = arith.constant 22 : index
    %c0_45 = arith.constant 0 : index
    %44 = vector.load %arg1[%c0_44, %c22, %c0_45] : memref<1x49x4xf32, #tpu.memory_space<vmem>>, vector<1x1x4xf32>
    %45 = vector.shape_cast %44 : vector<1x1x4xf32> to vector<1x4xf32>
    %c0_46 = arith.constant 0 : index
    %c23 = arith.constant 23 : index
    %c0_47 = arith.constant 0 : index
    %46 = vector.load %arg1[%c0_46, %c23, %c0_47] : memref<1x49x4xf32, #tpu.memory_space<vmem>>, vector<1x1x4xf32>
    %47 = vector.shape_cast %46 : vector<1x1x4xf32> to vector<1x4xf32>
    %c0_48 = arith.constant 0 : index
    %c24 = arith.constant 24 : index
    %c0_49 = arith.constant 0 : index
    %48 = vector.load %arg1[%c0_48, %c24, %c0_49] : memref<1x49x4xf32, #tpu.memory_space<vmem>>, vector<1x1x4xf32>
    %49 = vector.shape_cast %48 : vector<1x1x4xf32> to vector<1x4xf32>
    %c0_50 = arith.constant 0 : index
    %c25 = arith.constant 25 : index
    %c0_51 = arith.constant 0 : index
    %50 = vector.load %arg1[%c0_50, %c25, %c0_51] : memref<1x49x4xf32, #tpu.memory_space<vmem>>, vector<1x1x4xf32>
    %51 = vector.shape_cast %50 : vector<1x1x4xf32> to vector<1x4xf32>
    %c0_52 = arith.constant 0 : index
    %c26 = arith.constant 26 : index
    %c0_53 = arith.constant 0 : index
    %52 = vector.load %arg1[%c0_52, %c26, %c0_53] : memref<1x49x4xf32, #tpu.memory_space<vmem>>, vector<1x1x4xf32>
    %53 = vector.shape_cast %52 : vector<1x1x4xf32> to vector<1x4xf32>
    %c0_54 = arith.constant 0 : index
    %c27 = arith.constant 27 : index
    %c0_55 = arith.constant 0 : index
    %54 = vector.load %arg1[%c0_54, %c27, %c0_55] : memref<1x49x4xf32, #tpu.memory_space<vmem>>, vector<1x1x4xf32>
    %55 = vector.shape_cast %54 : vector<1x1x4xf32> to vector<1x4xf32>
    %c0_56 = arith.constant 0 : index
    %c28 = arith.constant 28 : index
    %c0_57 = arith.constant 0 : index
    %56 = vector.load %arg1[%c0_56, %c28, %c0_57] : memref<1x49x4xf32, #tpu.memory_space<vmem>>, vector<1x1x4xf32>
    %57 = vector.shape_cast %56 : vector<1x1x4xf32> to vector<1x4xf32>
    %c0_58 = arith.constant 0 : index
    %c29 = arith.constant 29 : index
    %c0_59 = arith.constant 0 : index
    %58 = vector.load %arg1[%c0_58, %c29, %c0_59] : memref<1x49x4xf32, #tpu.memory_space<vmem>>, vector<1x1x4xf32>
    %59 = vector.shape_cast %58 : vector<1x1x4xf32> to vector<1x4xf32>
    %c0_60 = arith.constant 0 : index
    %c30 = arith.constant 30 : index
    %c0_61 = arith.constant 0 : index
    %60 = vector.load %arg1[%c0_60, %c30, %c0_61] : memref<1x49x4xf32, #tpu.memory_space<vmem>>, vector<1x1x4xf32>
    %61 = vector.shape_cast %60 : vector<1x1x4xf32> to vector<1x4xf32>
    %c0_62 = arith.constant 0 : index
    %c31 = arith.constant 31 : index
    %c0_63 = arith.constant 0 : index
    %62 = vector.load %arg1[%c0_62, %c31, %c0_63] : memref<1x49x4xf32, #tpu.memory_space<vmem>>, vector<1x1x4xf32>
    %63 = vector.shape_cast %62 : vector<1x1x4xf32> to vector<1x4xf32>
    %c0_64 = arith.constant 0 : index
    %c32 = arith.constant 32 : index
    %c0_65 = arith.constant 0 : index
    %64 = vector.load %arg1[%c0_64, %c32, %c0_65] : memref<1x49x4xf32, #tpu.memory_space<vmem>>, vector<1x1x4xf32>
    %65 = vector.shape_cast %64 : vector<1x1x4xf32> to vector<1x4xf32>
    %c0_66 = arith.constant 0 : index
    %c33 = arith.constant 33 : index
    %c0_67 = arith.constant 0 : index
    %66 = vector.load %arg1[%c0_66, %c33, %c0_67] : memref<1x49x4xf32, #tpu.memory_space<vmem>>, vector<1x1x4xf32>
    %67 = vector.shape_cast %66 : vector<1x1x4xf32> to vector<1x4xf32>
    %c0_68 = arith.constant 0 : index
    %c34 = arith.constant 34 : index
    %c0_69 = arith.constant 0 : index
    %68 = vector.load %arg1[%c0_68, %c34, %c0_69] : memref<1x49x4xf32, #tpu.memory_space<vmem>>, vector<1x1x4xf32>
    %69 = vector.shape_cast %68 : vector<1x1x4xf32> to vector<1x4xf32>
    %c0_70 = arith.constant 0 : index
    %c35 = arith.constant 35 : index
    %c0_71 = arith.constant 0 : index
    %70 = vector.load %arg1[%c0_70, %c35, %c0_71] : memref<1x49x4xf32, #tpu.memory_space<vmem>>, vector<1x1x4xf32>
    %71 = vector.shape_cast %70 : vector<1x1x4xf32> to vector<1x4xf32>
    %c0_72 = arith.constant 0 : index
    %c36 = arith.constant 36 : index
    %c0_73 = arith.constant 0 : index
    %72 = vector.load %arg1[%c0_72, %c36, %c0_73] : memref<1x49x4xf32, #tpu.memory_space<vmem>>, vector<1x1x4xf32>
    %73 = vector.shape_cast %72 : vector<1x1x4xf32> to vector<1x4xf32>
    %c0_74 = arith.constant 0 : index
    %c37 = arith.constant 37 : index
    %c0_75 = arith.constant 0 : index
    %74 = vector.load %arg1[%c0_74, %c37, %c0_75] : memref<1x49x4xf32, #tpu.memory_space<vmem>>, vector<1x1x4xf32>
    %75 = vector.shape_cast %74 : vector<1x1x4xf32> to vector<1x4xf32>
    %c0_76 = arith.constant 0 : index
    %c38 = arith.constant 38 : index
    %c0_77 = arith.constant 0 : index
    %76 = vector.load %arg1[%c0_76, %c38, %c0_77] : memref<1x49x4xf32, #tpu.memory_space<vmem>>, vector<1x1x4xf32>
    %77 = vector.shape_cast %76 : vector<1x1x4xf32> to vector<1x4xf32>
    %c0_78 = arith.constant 0 : index
    %c39 = arith.constant 39 : index
    %c0_79 = arith.constant 0 : index
    %78 = vector.load %arg1[%c0_78, %c39, %c0_79] : memref<1x49x4xf32, #tpu.memory_space<vmem>>, vector<1x1x4xf32>
    %79 = vector.shape_cast %78 : vector<1x1x4xf32> to vector<1x4xf32>
    %c0_80 = arith.constant 0 : index
    %c40 = arith.constant 40 : index
    %c0_81 = arith.constant 0 : index
    %80 = vector.load %arg1[%c0_80, %c40, %c0_81] : memref<1x49x4xf32, #tpu.memory_space<vmem>>, vector<1x1x4xf32>
    %81 = vector.shape_cast %80 : vector<1x1x4xf32> to vector<1x4xf32>
    %c0_82 = arith.constant 0 : index
    %c41 = arith.constant 41 : index
    %c0_83 = arith.constant 0 : index
    %82 = vector.load %arg1[%c0_82, %c41, %c0_83] : memref<1x49x4xf32, #tpu.memory_space<vmem>>, vector<1x1x4xf32>
    %83 = vector.shape_cast %82 : vector<1x1x4xf32> to vector<1x4xf32>
    %c0_84 = arith.constant 0 : index
    %c42 = arith.constant 42 : index
    %c0_85 = arith.constant 0 : index
    %84 = vector.load %arg1[%c0_84, %c42, %c0_85] : memref<1x49x4xf32, #tpu.memory_space<vmem>>, vector<1x1x4xf32>
    %85 = vector.shape_cast %84 : vector<1x1x4xf32> to vector<1x4xf32>
    %c0_86 = arith.constant 0 : index
    %c43 = arith.constant 43 : index
    %c0_87 = arith.constant 0 : index
    %86 = vector.load %arg1[%c0_86, %c43, %c0_87] : memref<1x49x4xf32, #tpu.memory_space<vmem>>, vector<1x1x4xf32>
    %87 = vector.shape_cast %86 : vector<1x1x4xf32> to vector<1x4xf32>
    %c0_88 = arith.constant 0 : index
    %c44 = arith.constant 44 : index
    %c0_89 = arith.constant 0 : index
    %88 = vector.load %arg1[%c0_88, %c44, %c0_89] : memref<1x49x4xf32, #tpu.memory_space<vmem>>, vector<1x1x4xf32>
    %89 = vector.shape_cast %88 : vector<1x1x4xf32> to vector<1x4xf32>
    %c0_90 = arith.constant 0 : index
    %c45 = arith.constant 45 : index
    %c0_91 = arith.constant 0 : index
    %90 = vector.load %arg1[%c0_90, %c45, %c0_91] : memref<1x49x4xf32, #tpu.memory_space<vmem>>, vector<1x1x4xf32>
    %91 = vector.shape_cast %90 : vector<1x1x4xf32> to vector<1x4xf32>
    %c0_92 = arith.constant 0 : index
    %c46 = arith.constant 46 : index
    %c0_93 = arith.constant 0 : index
    %92 = vector.load %arg1[%c0_92, %c46, %c0_93] : memref<1x49x4xf32, #tpu.memory_space<vmem>>, vector<1x1x4xf32>
    %93 = vector.shape_cast %92 : vector<1x1x4xf32> to vector<1x4xf32>
    %c0_94 = arith.constant 0 : index
    %c47 = arith.constant 47 : index
    %c0_95 = arith.constant 0 : index
    %94 = vector.load %arg1[%c0_94, %c47, %c0_95] : memref<1x49x4xf32, #tpu.memory_space<vmem>>, vector<1x1x4xf32>
    %95 = vector.shape_cast %94 : vector<1x1x4xf32> to vector<1x4xf32>
    %c0_96 = arith.constant 0 : index
    %c48 = arith.constant 48 : index
    %c0_97 = arith.constant 0 : index
    %96 = vector.load %arg1[%c0_96, %c48, %c0_97] : memref<1x49x4xf32, #tpu.memory_space<vmem>>, vector<1x1x4xf32>
    %97 = vector.shape_cast %96 : vector<1x1x4xf32> to vector<1x4xf32>
    %98 = arith.maximumf %1, %3 : vector<1x4xf32>
    %99 = arith.maximumf %5, %7 : vector<1x4xf32>
    %100 = arith.maximumf %9, %11 : vector<1x4xf32>
    %101 = arith.maximumf %13, %15 : vector<1x4xf32>
    %102 = arith.maximumf %17, %19 : vector<1x4xf32>
    %103 = arith.maximumf %21, %23 : vector<1x4xf32>
    %104 = arith.maximumf %25, %27 : vector<1x4xf32>
    %105 = arith.maximumf %29, %31 : vector<1x4xf32>
    %106 = arith.maximumf %33, %35 : vector<1x4xf32>
    %107 = arith.maximumf %37, %39 : vector<1x4xf32>
    %108 = arith.maximumf %41, %43 : vector<1x4xf32>
    %109 = arith.maximumf %45, %47 : vector<1x4xf32>
    %110 = arith.maximumf %49, %51 : vector<1x4xf32>
    %111 = arith.maximumf %53, %55 : vector<1x4xf32>
    %112 = arith.maximumf %57, %59 : vector<1x4xf32>
    %113 = arith.maximumf %61, %63 : vector<1x4xf32>
    %114 = arith.maximumf %65, %67 : vector<1x4xf32>
    %115 = arith.maximumf %69, %71 : vector<1x4xf32>
    %116 = arith.maximumf %73, %75 : vector<1x4xf32>
    %117 = arith.maximumf %77, %79 : vector<1x4xf32>
    %118 = arith.maximumf %81, %83 : vector<1x4xf32>
    %119 = arith.maximumf %85, %87 : vector<1x4xf32>
    %120 = arith.maximumf %89, %91 : vector<1x4xf32>
    %121 = arith.maximumf %93, %95 : vector<1x4xf32>
    %122 = arith.maximumf %98, %99 : vector<1x4xf32>
    %123 = arith.maximumf %100, %101 : vector<1x4xf32>
    %124 = arith.maximumf %102, %103 : vector<1x4xf32>
    %125 = arith.maximumf %104, %105 : vector<1x4xf32>
    %126 = arith.maximumf %106, %107 : vector<1x4xf32>
    %127 = arith.maximumf %108, %109 : vector<1x4xf32>
    %128 = arith.maximumf %110, %111 : vector<1x4xf32>
    %129 = arith.maximumf %112, %113 : vector<1x4xf32>
    %130 = arith.maximumf %114, %115 : vector<1x4xf32>
    %131 = arith.maximumf %116, %117 : vector<1x4xf32>
    %132 = arith.maximumf %118, %119 : vector<1x4xf32>
    %133 = arith.maximumf %120, %121 : vector<1x4xf32>
    %134 = arith.maximumf %122, %123 : vector<1x4xf32>
    %135 = arith.maximumf %124, %125 : vector<1x4xf32>
    %136 = arith.maximumf %126, %127 : vector<1x4xf32>
    %137 = arith.maximumf %128, %129 : vector<1x4xf32>
    %138 = arith.maximumf %130, %131 : vector<1x4xf32>
    %139 = arith.maximumf %132, %133 : vector<1x4xf32>
    %140 = arith.maximumf %134, %135 : vector<1x4xf32>
    %141 = arith.maximumf %136, %137 : vector<1x4xf32>
    %142 = arith.maximumf %138, %139 : vector<1x4xf32>
    %143 = arith.maximumf %140, %141 : vector<1x4xf32>
    %144 = arith.maximumf %142, %97 : vector<1x4xf32>
    %145 = arith.maximumf %143, %144 : vector<1x4xf32>
    %cst = arith.constant 0.000000e+00 : f32
    %146 = vector.broadcast %cst : f32 to vector<3x12xf32>
    %c0_98 = arith.constant 0 : index
    %c0_99 = arith.constant 0 : index
    %147 = vector.load %arg20[%c0_98, %c0_99] : memref<3x12xf32, #tpu.memory_space<vmem>>, vector<3x12xf32>
    tpu.vector_store %arg20[%c0_98, %c0_99], %146 {strides = array<i32>} : memref<3x12xf32, #tpu.memory_space<vmem>>, vector<3x12xf32>,
    %c1_100 = arith.constant 1 : index
    %c4_101 = arith.constant 4 : index
    %148 = vector.load %arg20[%c1_100, %c4_101] : memref<3x12xf32, #tpu.memory_space<vmem>>, vector<1x4xf32>
    tpu.vector_store %arg20[%c1_100, %c4_101], %145 {strides = array<i32>} : memref<3x12xf32, #tpu.memory_space<vmem>>, vector<1x4xf32>,
    %cst_102 = arith.constant 0.000000e+00 : f32
    %149 = vector.broadcast %cst_102 : f32 to vector<1x4xf32>
    %c0_103 = arith.constant 0 : index
    %c0_104 = arith.constant 0 : index
    %150 = vector.load %arg5[%c0_103, %c0_104] : memref<1x4xf32, #tpu.memory_space<vmem>>, vector<1x4xf32>
    %151 = arith.addf %149, %150 : vector<1x4xf32>
    %c0_105 = arith.constant 0 : index
    %c0_106 = arith.constant 0 : index
    %152 = vector.load %arg20[%c0_105, %c0_106] : memref<3x12xf32, #tpu.memory_space<vmem>>, vector<1x4xf32>
    %153 = arith.truncf %152 : vector<1x4xf32> to vector<1x4xbf16>
    %c0_107 = arith.constant 0 : index
    %c0_108 = arith.constant 0 : index
    %c0_109 = arith.constant 0 : index
    %154 = vector.load %arg4[%c0_107, %c0_108, %c0_109] : memref<9x4x4xbf16, #tpu.memory_space<vmem>>, vector<1x4x4xbf16>
    %155 = vector.shape_cast %154 : vector<1x4x4xbf16> to vector<4x4xbf16>
    %cst_110 = arith.constant dense<0.000000e+00> : vector<1x4xf32>
    %156 = tpu.matmul %153, %155, %cst_110 {dimension_numbers = #tpu.dot_dimension_numbers<[1], [0], [0], [1], [0, 0, 1, 1], [], []>} : vector<1x4xbf16>, vector<4x4xbf16>, vector<1x4xf32> -> vector<1x4xf32>
    %157 = arith.addf %151, %156 : vector<1x4xf32>
    %c0_111 = arith.constant 0 : index
    %c4_112 = arith.constant 4 : index
    %158 = vector.load %arg20[%c0_111, %c4_112] : memref<3x12xf32, #tpu.memory_space<vmem>>, vector<1x4xf32>
    %159 = arith.truncf %158 : vector<1x4xf32> to vector<1x4xbf16>
    %c1_113 = arith.constant 1 : index
    %c0_114 = arith.constant 0 : index
    %c0_115 = arith.constant 0 : index
    %160 = vector.load %arg4[%c1_113, %c0_114, %c0_115] : memref<9x4x4xbf16, #tpu.memory_space<vmem>>, vector<1x4x4xbf16>
    %161 = vector.shape_cast %160 : vector<1x4x4xbf16> to vector<4x4xbf16>
    %cst_116 = arith.constant dense<0.000000e+00> : vector<1x4xf32>
    %162 = tpu.matmul %159, %161, %cst_116 {dimension_numbers = #tpu.dot_dimension_numbers<[1], [0], [0], [1], [0, 0, 1, 1], [], []>} : vector<1x4xbf16>, vector<4x4xbf16>, vector<1x4xf32> -> vector<1x4xf32>
    %163 = arith.addf %157, %162 : vector<1x4xf32>
    %c0_117 = arith.constant 0 : index
    %c8_118 = arith.constant 8 : index
    %164 = vector.load %arg20[%c0_117, %c8_118] : memref<3x12xf32, #tpu.memory_space<vmem>>, vector<1x4xf32>
    %165 = arith.truncf %164 : vector<1x4xf32> to vector<1x4xbf16>
    %c2_119 = arith.constant 2 : index
    %c0_120 = arith.constant 0 : index
    %c0_121 = arith.constant 0 : index
    %166 = vector.load %arg4[%c2_119, %c0_120, %c0_121] : memref<9x4x4xbf16, #tpu.memory_space<vmem>>, vector<1x4x4xbf16>
    %167 = vector.shape_cast %166 : vector<1x4x4xbf16> to vector<4x4xbf16>
    %cst_122 = arith.constant dense<0.000000e+00> : vector<1x4xf32>
    %168 = tpu.matmul %165, %167, %cst_122 {dimension_numbers = #tpu.dot_dimension_numbers<[1], [0], [0], [1], [0, 0, 1, 1], [], []>} : vector<1x4xbf16>, vector<4x4xbf16>, vector<1x4xf32> -> vector<1x4xf32>
    %169 = arith.addf %163, %168 : vector<1x4xf32>
    %c1_123 = arith.constant 1 : index
    %c0_124 = arith.constant 0 : index
    %170 = vector.load %arg20[%c1_123, %c0_124] : memref<3x12xf32, #tpu.memory_space<vmem>>, vector<1x4xf32>
    %171 = arith.truncf %170 : vector<1x4xf32> to vector<1x4xbf16>
    %c3_125 = arith.constant 3 : index
    %c0_126 = arith.constant 0 : index
    %c0_127 = arith.constant 0 : index
    %172 = vector.load %arg4[%c3_125, %c0_126, %c0_127] : memref<9x4x4xbf16, #tpu.memory_space<vmem>>, vector<1x4x4xbf16>
    %173 = vector.shape_cast %172 : vector<1x4x4xbf16> to vector<4x4xbf16>
    %cst_128 = arith.constant dense<0.000000e+00> : vector<1x4xf32>
    %174 = tpu.matmul %171, %173, %cst_128 {dimension_numbers = #tpu.dot_dimension_numbers<[1], [0], [0], [1], [0, 0, 1, 1], [], []>} : vector<1x4xbf16>, vector<4x4xbf16>, vector<1x4xf32> -> vector<1x4xf32>
    %175 = arith.addf %169, %174 : vector<1x4xf32>
    %c1_129 = arith.constant 1 : index
    %c4_130 = arith.constant 4 : index
    %176 = vector.load %arg20[%c1_129, %c4_130] : memref<3x12xf32, #tpu.memory_space<vmem>>, vector<1x4xf32>
    %177 = arith.truncf %176 : vector<1x4xf32> to vector<1x4xbf16>
    %c4_131 = arith.constant 4 : index
    %c0_132 = arith.constant 0 : index
    %c0_133 = arith.constant 0 : index
    %178 = vector.load %arg4[%c4_131, %c0_132, %c0_133] : memref<9x4x4xbf16, #tpu.memory_space<vmem>>, vector<1x4x4xbf16>
    %179 = vector.shape_cast %178 : vector<1x4x4xbf16> to vector<4x4xbf16>
    %cst_134 = arith.constant dense<0.000000e+00> : vector<1x4xf32>
    %180 = tpu.matmul %177, %179, %cst_134 {dimension_numbers = #tpu.dot_dimension_numbers<[1], [0], [0], [1], [0, 0, 1, 1], [], []>} : vector<1x4xbf16>, vector<4x4xbf16>, vector<1x4xf32> -> vector<1x4xf32>
    %181 = arith.addf %175, %180 : vector<1x4xf32>
    %c1_135 = arith.constant 1 : index
    %c8_136 = arith.constant 8 : index
    %182 = vector.load %arg20[%c1_135, %c8_136] : memref<3x12xf32, #tpu.memory_space<vmem>>, vector<1x4xf32>
    %183 = arith.truncf %182 : vector<1x4xf32> to vector<1x4xbf16>
    %c5_137 = arith.constant 5 : index
    %c0_138 = arith.constant 0 : index
    %c0_139 = arith.constant 0 : index
    %184 = vector.load %arg4[%c5_137, %c0_138, %c0_139] : memref<9x4x4xbf16, #tpu.memory_space<vmem>>, vector<1x4x4xbf16>
    %185 = vector.shape_cast %184 : vector<1x4x4xbf16> to vector<4x4xbf16>
    %cst_140 = arith.constant dense<0.000000e+00> : vector<1x4xf32>
    %186 = tpu.matmul %183, %185, %cst_140 {dimension_numbers = #tpu.dot_dimension_numbers<[1], [0], [0], [1], [0, 0, 1, 1], [], []>} : vector<1x4xbf16>, vector<4x4xbf16>, vector<1x4xf32> -> vector<1x4xf32>
    %187 = arith.addf %181, %186 : vector<1x4xf32>
    %c2_141 = arith.constant 2 : index
    %c0_142 = arith.constant 0 : index
    %188 = vector.load %arg20[%c2_141, %c0_142] : memref<3x12xf32, #tpu.memory_space<vmem>>, vector<1x4xf32>
    %189 = arith.truncf %188 : vector<1x4xf32> to vector<1x4xbf16>
    %c6_143 = arith.constant 6 : index
    %c0_144 = arith.constant 0 : index
    %c0_145 = arith.constant 0 : index
    %190 = vector.load %arg4[%c6_143, %c0_144, %c0_145] : memref<9x4x4xbf16, #tpu.memory_space<vmem>>, vector<1x4x4xbf16>
    %191 = vector.shape_cast %190 : vector<1x4x4xbf16> to vector<4x4xbf16>
    %cst_146 = arith.constant dense<0.000000e+00> : vector<1x4xf32>
    %192 = tpu.matmul %189, %191, %cst_146 {dimension_numbers = #tpu.dot_dimension_numbers<[1], [0], [0], [1], [0, 0, 1, 1], [], []>} : vector<1x4xbf16>, vector<4x4xbf16>, vector<1x4xf32> -> vector<1x4xf32>
    %193 = arith.addf %187, %192 : vector<1x4xf32>
    %c2_147 = arith.constant 2 : index
    %c4_148 = arith.constant 4 : index
    %194 = vector.load %arg20[%c2_147, %c4_148] : memref<3x12xf32, #tpu.memory_space<vmem>>, vector<1x4xf32>
    %195 = arith.truncf %194 : vector<1x4xf32> to vector<1x4xbf16>
    %c7_149 = arith.constant 7 : index
    %c0_150 = arith.constant 0 : index
    %c0_151 = arith.constant 0 : index
    %196 = vector.load %arg4[%c7_149, %c0_150, %c0_151] : memref<9x4x4xbf16, #tpu.memory_space<vmem>>, vector<1x4x4xbf16>
    %197 = vector.shape_cast %196 : vector<1x4x4xbf16> to vector<4x4xbf16>
    %cst_152 = arith.constant dense<0.000000e+00> : vector<1x4xf32>
    %198 = tpu.matmul %195, %197, %cst_152 {dimension_numbers = #tpu.dot_dimension_numbers<[1], [0], [0], [1], [0, 0, 1, 1], [], []>} : vector<1x4xbf16>, vector<4x4xbf16>, vector<1x4xf32> -> vector<1x4xf32>
    %199 = arith.addf %193, %198 : vector<1x4xf32>
    %c2_153 = arith.constant 2 : index
    %c8_154 = arith.constant 8 : index
    %200 = vector.load %arg20[%c2_153, %c8_154] : memref<3x12xf32, #tpu.memory_space<vmem>>, vector<1x4xf32>
    %201 = arith.truncf %200 : vector<1x4xf32> to vector<1x4xbf16>
    %c8_155 = arith.constant 8 : index
    %c0_156 = arith.constant 0 : index
    %c0_157 = arith.constant 0 : index
    %202 = vector.load %arg4[%c8_155, %c0_156, %c0_157] : memref<9x4x4xbf16, #tpu.memory_space<vmem>>, vector<1x4x4xbf16>
    %203 = vector.shape_cast %202 : vector<1x4x4xbf16> to vector<4x4xbf16>
    %cst_158 = arith.constant dense<0.000000e+00> : vector<1x4xf32>
    %204 = tpu.matmul %201, %203, %cst_158 {dimension_numbers = #tpu.dot_dimension_numbers<[1], [0], [0], [1], [0, 0, 1, 1], [], []>} : vector<1x4xbf16>, vector<4x4xbf16>, vector<1x4xf32> -> vector<1x4xf32>
    %205 = arith.addf %199, %204 : vector<1x4xf32>
    %cst_159 = arith.constant 0.000000e+00 : f32
    %206 = vector.broadcast %cst_159 : f32 to vector<1x4xf32>
    %207 = arith.maximumf %205, %206 : vector<1x4xf32>
    %cst_160 = arith.constant 0.000000e+00 : f32
    %208 = vector.broadcast %cst_160 : f32 to vector<3x12xf32>
    %c0_161 = arith.constant 0 : index
    %c0_162 = arith.constant 0 : index
    %209 = vector.load %arg20[%c0_161, %c0_162] : memref<3x12xf32, #tpu.memory_space<vmem>>, vector<3x12xf32>
    tpu.vector_store %arg20[%c0_161, %c0_162], %208 {strides = array<i32>} : memref<3x12xf32, #tpu.memory_space<vmem>>, vector<3x12xf32>,
    %c1_163 = arith.constant 1 : index
    %c4_164 = arith.constant 4 : index
    %210 = vector.load %arg20[%c1_163, %c4_164] : memref<3x12xf32, #tpu.memory_space<vmem>>, vector<1x4xf32>
    tpu.vector_store %arg20[%c1_163, %c4_164], %207 {strides = array<i32>} : memref<3x12xf32, #tpu.memory_space<vmem>>, vector<1x4xf32>,
    %cst_165 = arith.constant 0.000000e+00 : f32
    %211 = vector.broadcast %cst_165 : f32 to vector<1x4xf32>
    %c0_166 = arith.constant 0 : index
    %c0_167 = arith.constant 0 : index
    %212 = vector.load %arg7[%c0_166, %c0_167] : memref<1x4xf32, #tpu.memory_space<vmem>>, vector<1x4xf32>
    %213 = arith.addf %211, %212 : vector<1x4xf32>
    %c0_168 = arith.constant 0 : index
    %c0_169 = arith.constant 0 : index
    %214 = vector.load %arg20[%c0_168, %c0_169] : memref<3x12xf32, #tpu.memory_space<vmem>>, vector<1x4xf32>
    %215 = arith.truncf %214 : vector<1x4xf32> to vector<1x4xbf16>
    %c0_170 = arith.constant 0 : index
    %c0_171 = arith.constant 0 : index
    %c0_172 = arith.constant 0 : index
    %216 = vector.load %arg6[%c0_170, %c0_171, %c0_172] : memref<9x4x4xbf16, #tpu.memory_space<vmem>>, vector<1x4x4xbf16>
    %217 = vector.shape_cast %216 : vector<1x4x4xbf16> to vector<4x4xbf16>
    %cst_173 = arith.constant dense<0.000000e+00> : vector<1x4xf32>
    %218 = tpu.matmul %215, %217, %cst_173 {dimension_numbers = #tpu.dot_dimension_numbers<[1], [0], [0], [1], [0, 0, 1, 1], [], []>} : vector<1x4xbf16>, vector<4x4xbf16>, vector<1x4xf32> -> vector<1x4xf32>
    %219 = arith.addf %213, %218 : vector<1x4xf32>
    %c0_174 = arith.constant 0 : index
    %c4_175 = arith.constant 4 : index
    %220 = vector.load %arg20[%c0_174, %c4_175] : memref<3x12xf32, #tpu.memory_space<vmem>>, vector<1x4xf32>
    %221 = arith.truncf %220 : vector<1x4xf32> to vector<1x4xbf16>
    %c1_176 = arith.constant 1 : index
    %c0_177 = arith.constant 0 : index
    %c0_178 = arith.constant 0 : index
    %222 = vector.load %arg6[%c1_176, %c0_177, %c0_178] : memref<9x4x4xbf16, #tpu.memory_space<vmem>>, vector<1x4x4xbf16>
    %223 = vector.shape_cast %222 : vector<1x4x4xbf16> to vector<4x4xbf16>
    %cst_179 = arith.constant dense<0.000000e+00> : vector<1x4xf32>
    %224 = tpu.matmul %221, %223, %cst_179 {dimension_numbers = #tpu.dot_dimension_numbers<[1], [0], [0], [1], [0, 0, 1, 1], [], []>} : vector<1x4xbf16>, vector<4x4xbf16>, vector<1x4xf32> -> vector<1x4xf32>
    %225 = arith.addf %219, %224 : vector<1x4xf32>
    %c0_180 = arith.constant 0 : index
    %c8_181 = arith.constant 8 : index
    %226 = vector.load %arg20[%c0_180, %c8_181] : memref<3x12xf32, #tpu.memory_space<vmem>>, vector<1x4xf32>
    %227 = arith.truncf %226 : vector<1x4xf32> to vector<1x4xbf16>
    %c2_182 = arith.constant 2 : index
    %c0_183 = arith.constant 0 : index
    %c0_184 = arith.constant 0 : index
    %228 = vector.load %arg6[%c2_182, %c0_183, %c0_184] : memref<9x4x4xbf16, #tpu.memory_space<vmem>>, vector<1x4x4xbf16>
    %229 = vector.shape_cast %228 : vector<1x4x4xbf16> to vector<4x4xbf16>
    %cst_185 = arith.constant dense<0.000000e+00> : vector<1x4xf32>
    %230 = tpu.matmul %227, %229, %cst_185 {dimension_numbers = #tpu.dot_dimension_numbers<[1], [0], [0], [1], [0, 0, 1, 1], [], []>} : vector<1x4xbf16>, vector<4x4xbf16>, vector<1x4xf32> -> vector<1x4xf32>
    %231 = arith.addf %225, %230 : vector<1x4xf32>
    %c1_186 = arith.constant 1 : index
    %c0_187 = arith.constant 0 : index
    %232 = vector.load %arg20[%c1_186, %c0_187] : memref<3x12xf32, #tpu.memory_space<vmem>>, vector<1x4xf32>
    %233 = arith.truncf %232 : vector<1x4xf32> to vector<1x4xbf16>
    %c3_188 = arith.constant 3 : index
    %c0_189 = arith.constant 0 : index
    %c0_190 = arith.constant 0 : index
    %234 = vector.load %arg6[%c3_188, %c0_189, %c0_190] : memref<9x4x4xbf16, #tpu.memory_space<vmem>>, vector<1x4x4xbf16>
    %235 = vector.shape_cast %234 : vector<1x4x4xbf16> to vector<4x4xbf16>
    %cst_191 = arith.constant dense<0.000000e+00> : vector<1x4xf32>
    %236 = tpu.matmul %233, %235, %cst_191 {dimension_numbers = #tpu.dot_dimension_numbers<[1], [0], [0], [1], [0, 0, 1, 1], [], []>} : vector<1x4xbf16>, vector<4x4xbf16>, vector<1x4xf32> -> vector<1x4xf32>
    %237 = arith.addf %231, %236 : vector<1x4xf32>
    %c1_192 = arith.constant 1 : index
    %c4_193 = arith.constant 4 : index
    %238 = vector.load %arg20[%c1_192, %c4_193] : memref<3x12xf32, #tpu.memory_space<vmem>>, vector<1x4xf32>
    %239 = arith.truncf %238 : vector<1x4xf32> to vector<1x4xbf16>
    %c4_194 = arith.constant 4 : index
    %c0_195 = arith.constant 0 : index
    %c0_196 = arith.constant 0 : index
    %240 = vector.load %arg6[%c4_194, %c0_195, %c0_196] : memref<9x4x4xbf16, #tpu.memory_space<vmem>>, vector<1x4x4xbf16>
    %241 = vector.shape_cast %240 : vector<1x4x4xbf16> to vector<4x4xbf16>
    %cst_197 = arith.constant dense<0.000000e+00> : vector<1x4xf32>
    %242 = tpu.matmul %239, %241, %cst_197 {dimension_numbers = #tpu.dot_dimension_numbers<[1], [0], [0], [1], [0, 0, 1, 1], [], []>} : vector<1x4xbf16>, vector<4x4xbf16>, vector<1x4xf32> -> vector<1x4xf32>
    %243 = arith.addf %237, %242 : vector<1x4xf32>
    %c1_198 = arith.constant 1 : index
    %c8_199 = arith.constant 8 : index
    %244 = vector.load %arg20[%c1_198, %c8_199] : memref<3x12xf32, #tpu.memory_space<vmem>>, vector<1x4xf32>
    %245 = arith.truncf %244 : vector<1x4xf32> to vector<1x4xbf16>
    %c5_200 = arith.constant 5 : index
    %c0_201 = arith.constant 0 : index
    %c0_202 = arith.constant 0 : index
    %246 = vector.load %arg6[%c5_200, %c0_201, %c0_202] : memref<9x4x4xbf16, #tpu.memory_space<vmem>>, vector<1x4x4xbf16>
    %247 = vector.shape_cast %246 : vector<1x4x4xbf16> to vector<4x4xbf16>
    %cst_203 = arith.constant dense<0.000000e+00> : vector<1x4xf32>
    %248 = tpu.matmul %245, %247, %cst_203 {dimension_numbers = #tpu.dot_dimension_numbers<[1], [0], [0], [1], [0, 0, 1, 1], [], []>} : vector<1x4xbf16>, vector<4x4xbf16>, vector<1x4xf32> -> vector<1x4xf32>
    %249 = arith.addf %243, %248 : vector<1x4xf32>
    %c2_204 = arith.constant 2 : index
    %c0_205 = arith.constant 0 : index
    %250 = vector.load %arg20[%c2_204, %c0_205] : memref<3x12xf32, #tpu.memory_space<vmem>>, vector<1x4xf32>
    %251 = arith.truncf %250 : vector<1x4xf32> to vector<1x4xbf16>
    %c6_206 = arith.constant 6 : index
    %c0_207 = arith.constant 0 : index
    %c0_208 = arith.constant 0 : index
    %252 = vector.load %arg6[%c6_206, %c0_207, %c0_208] : memref<9x4x4xbf16, #tpu.memory_space<vmem>>, vector<1x4x4xbf16>
    %253 = vector.shape_cast %252 : vector<1x4x4xbf16> to vector<4x4xbf16>
    %cst_209 = arith.constant dense<0.000000e+00> : vector<1x4xf32>
    %254 = tpu.matmul %251, %253, %cst_209 {dimension_numbers = #tpu.dot_dimension_numbers<[1], [0], [0], [1], [0, 0, 1, 1], [], []>} : vector<1x4xbf16>, vector<4x4xbf16>, vector<1x4xf32> -> vector<1x4xf32>
    %255 = arith.addf %249, %254 : vector<1x4xf32>
    %c2_210 = arith.constant 2 : index
    %c4_211 = arith.constant 4 : index
    %256 = vector.load %arg20[%c2_210, %c4_211] : memref<3x12xf32, #tpu.memory_space<vmem>>, vector<1x4xf32>
    %257 = arith.truncf %256 : vector<1x4xf32> to vector<1x4xbf16>
    %c7_212 = arith.constant 7 : index
    %c0_213 = arith.constant 0 : index
    %c0_214 = arith.constant 0 : index
    %258 = vector.load %arg6[%c7_212, %c0_213, %c0_214] : memref<9x4x4xbf16, #tpu.memory_space<vmem>>, vector<1x4x4xbf16>
    %259 = vector.shape_cast %258 : vector<1x4x4xbf16> to vector<4x4xbf16>
    %cst_215 = arith.constant dense<0.000000e+00> : vector<1x4xf32>
    %260 = tpu.matmul %257, %259, %cst_215 {dimension_numbers = #tpu.dot_dimension_numbers<[1], [0], [0], [1], [0, 0, 1, 1], [], []>} : vector<1x4xbf16>, vector<4x4xbf16>, vector<1x4xf32> -> vector<1x4xf32>
    %261 = arith.addf %255, %260 : vector<1x4xf32>
    %c2_216 = arith.constant 2 : index
    %c8_217 = arith.constant 8 : index
    %262 = vector.load %arg20[%c2_216, %c8_217] : memref<3x12xf32, #tpu.memory_space<vmem>>, vector<1x4xf32>
    %263 = arith.truncf %262 : vector<1x4xf32> to vector<1x4xbf16>
    %c8_218 = arith.constant 8 : index
    %c0_219 = arith.constant 0 : index
    %c0_220 = arith.constant 0 : index
    %264 = vector.load %arg6[%c8_218, %c0_219, %c0_220] : memref<9x4x4xbf16, #tpu.memory_space<vmem>>, vector<1x4x4xbf16>
    %265 = vector.shape_cast %264 : vector<1x4x4xbf16> to vector<4x4xbf16>
    %cst_221 = arith.constant dense<0.000000e+00> : vector<1x4xf32>
    %266 = tpu.matmul %263, %265, %cst_221 {dimension_numbers = #tpu.dot_dimension_numbers<[1], [0], [0], [1], [0, 0, 1, 1], [], []>} : vector<1x4xbf16>, vector<4x4xbf16>, vector<1x4xf32> -> vector<1x4xf32>
    %267 = arith.addf %261, %266 : vector<1x4xf32>
    %cst_222 = arith.constant 0.000000e+00 : f32
    %268 = vector.broadcast %cst_222 : f32 to vector<1x4xf32>
    %269 = arith.maximumf %267, %268 : vector<1x4xf32>
    %cst_223 = arith.constant 0.000000e+00 : f32
    %270 = vector.broadcast %cst_223 : f32 to vector<3x12xf32>
    %c0_224 = arith.constant 0 : index
    %c0_225 = arith.constant 0 : index
    %271 = vector.load %arg20[%c0_224, %c0_225] : memref<3x12xf32, #tpu.memory_space<vmem>>, vector<3x12xf32>
    tpu.vector_store %arg20[%c0_224, %c0_225], %270 {strides = array<i32>} : memref<3x12xf32, #tpu.memory_space<vmem>>, vector<3x12xf32>,
    %c1_226 = arith.constant 1 : index
    %c4_227 = arith.constant 4 : index
    %272 = vector.load %arg20[%c1_226, %c4_227] : memref<3x12xf32, #tpu.memory_space<vmem>>, vector<1x4xf32>
    tpu.vector_store %arg20[%c1_226, %c4_227], %269 {strides = array<i32>} : memref<3x12xf32, #tpu.memory_space<vmem>>, vector<1x4xf32>,
    %cst_228 = arith.constant 0.000000e+00 : f32
    %273 = vector.broadcast %cst_228 : f32 to vector<1x4xf32>
    %c0_229 = arith.constant 0 : index
    %c0_230 = arith.constant 0 : index
    %274 = vector.load %arg9[%c0_229, %c0_230] : memref<1x4xf32, #tpu.memory_space<vmem>>, vector<1x4xf32>
    %275 = arith.addf %273, %274 : vector<1x4xf32>
    %c0_231 = arith.constant 0 : index
    %c0_232 = arith.constant 0 : index
    %276 = vector.load %arg20[%c0_231, %c0_232] : memref<3x12xf32, #tpu.memory_space<vmem>>, vector<1x4xf32>
    %277 = arith.truncf %276 : vector<1x4xf32> to vector<1x4xbf16>
    %c0_233 = arith.constant 0 : index
    %c0_234 = arith.constant 0 : index
    %c0_235 = arith.constant 0 : index
    %278 = vector.load %arg8[%c0_233, %c0_234, %c0_235] : memref<9x4x4xbf16, #tpu.memory_space<vmem>>, vector<1x4x4xbf16>
    %279 = vector.shape_cast %278 : vector<1x4x4xbf16> to vector<4x4xbf16>
    %cst_236 = arith.constant dense<0.000000e+00> : vector<1x4xf32>
    %280 = tpu.matmul %277, %279, %cst_236 {dimension_numbers = #tpu.dot_dimension_numbers<[1], [0], [0], [1], [0, 0, 1, 1], [], []>} : vector<1x4xbf16>, vector<4x4xbf16>, vector<1x4xf32> -> vector<1x4xf32>
    %281 = arith.addf %275, %280 : vector<1x4xf32>
    %c0_237 = arith.constant 0 : index
    %c4_238 = arith.constant 4 : index
    %282 = vector.load %arg20[%c0_237, %c4_238] : memref<3x12xf32, #tpu.memory_space<vmem>>, vector<1x4xf32>
    %283 = arith.truncf %282 : vector<1x4xf32> to vector<1x4xbf16>
    %c1_239 = arith.constant 1 : index
    %c0_240 = arith.constant 0 : index
    %c0_241 = arith.constant 0 : index
    %284 = vector.load %arg8[%c1_239, %c0_240, %c0_241] : memref<9x4x4xbf16, #tpu.memory_space<vmem>>, vector<1x4x4xbf16>
    %285 = vector.shape_cast %284 : vector<1x4x4xbf16> to vector<4x4xbf16>
    %cst_242 = arith.constant dense<0.000000e+00> : vector<1x4xf32>
    %286 = tpu.matmul %283, %285, %cst_242 {dimension_numbers = #tpu.dot_dimension_numbers<[1], [0], [0], [1], [0, 0, 1, 1], [], []>} : vector<1x4xbf16>, vector<4x4xbf16>, vector<1x4xf32> -> vector<1x4xf32>
    %287 = arith.addf %281, %286 : vector<1x4xf32>
    %c0_243 = arith.constant 0 : index
    %c8_244 = arith.constant 8 : index
    %288 = vector.load %arg20[%c0_243, %c8_244] : memref<3x12xf32, #tpu.memory_space<vmem>>, vector<1x4xf32>
    %289 = arith.truncf %288 : vector<1x4xf32> to vector<1x4xbf16>
    %c2_245 = arith.constant 2 : index
    %c0_246 = arith.constant 0 : index
    %c0_247 = arith.constant 0 : index
    %290 = vector.load %arg8[%c2_245, %c0_246, %c0_247] : memref<9x4x4xbf16, #tpu.memory_space<vmem>>, vector<1x4x4xbf16>
    %291 = vector.shape_cast %290 : vector<1x4x4xbf16> to vector<4x4xbf16>
    %cst_248 = arith.constant dense<0.000000e+00> : vector<1x4xf32>
    %292 = tpu.matmul %289, %291, %cst_248 {dimension_numbers = #tpu.dot_dimension_numbers<[1], [0], [0], [1], [0, 0, 1, 1], [], []>} : vector<1x4xbf16>, vector<4x4xbf16>, vector<1x4xf32> -> vector<1x4xf32>
    %293 = arith.addf %287, %292 : vector<1x4xf32>
    %c1_249 = arith.constant 1 : index
    %c0_250 = arith.constant 0 : index
    %294 = vector.load %arg20[%c1_249, %c0_250] : memref<3x12xf32, #tpu.memory_space<vmem>>, vector<1x4xf32>
    %295 = arith.truncf %294 : vector<1x4xf32> to vector<1x4xbf16>
    %c3_251 = arith.constant 3 : index
    %c0_252 = arith.constant 0 : index
    %c0_253 = arith.constant 0 : index
    %296 = vector.load %arg8[%c3_251, %c0_252, %c0_253] : memref<9x4x4xbf16, #tpu.memory_space<vmem>>, vector<1x4x4xbf16>
    %297 = vector.shape_cast %296 : vector<1x4x4xbf16> to vector<4x4xbf16>
    %cst_254 = arith.constant dense<0.000000e+00> : vector<1x4xf32>
    %298 = tpu.matmul %295, %297, %cst_254 {dimension_numbers = #tpu.dot_dimension_numbers<[1], [0], [0], [1], [0, 0, 1, 1], [], []>} : vector<1x4xbf16>, vector<4x4xbf16>, vector<1x4xf32> -> vector<1x4xf32>
    %299 = arith.addf %293, %298 : vector<1x4xf32>
    %c1_255 = arith.constant 1 : index
    %c4_256 = arith.constant 4 : index
    %300 = vector.load %arg20[%c1_255, %c4_256] : memref<3x12xf32, #tpu.memory_space<vmem>>, vector<1x4xf32>
    %301 = arith.truncf %300 : vector<1x4xf32> to vector<1x4xbf16>
    %c4_257 = arith.constant 4 : index
    %c0_258 = arith.constant 0 : index
    %c0_259 = arith.constant 0 : index
    %302 = vector.load %arg8[%c4_257, %c0_258, %c0_259] : memref<9x4x4xbf16, #tpu.memory_space<vmem>>, vector<1x4x4xbf16>
    %303 = vector.shape_cast %302 : vector<1x4x4xbf16> to vector<4x4xbf16>
    %cst_260 = arith.constant dense<0.000000e+00> : vector<1x4xf32>
    %304 = tpu.matmul %301, %303, %cst_260 {dimension_numbers = #tpu.dot_dimension_numbers<[1], [0], [0], [1], [0, 0, 1, 1], [], []>} : vector<1x4xbf16>, vector<4x4xbf16>, vector<1x4xf32> -> vector<1x4xf32>
    %305 = arith.addf %299, %304 : vector<1x4xf32>
    %c1_261 = arith.constant 1 : index
    %c8_262 = arith.constant 8 : index
    %306 = vector.load %arg20[%c1_261, %c8_262] : memref<3x12xf32, #tpu.memory_space<vmem>>, vector<1x4xf32>
    %307 = arith.truncf %306 : vector<1x4xf32> to vector<1x4xbf16>
    %c5_263 = arith.constant 5 : index
    %c0_264 = arith.constant 0 : index
    %c0_265 = arith.constant 0 : index
    %308 = vector.load %arg8[%c5_263, %c0_264, %c0_265] : memref<9x4x4xbf16, #tpu.memory_space<vmem>>, vector<1x4x4xbf16>
    %309 = vector.shape_cast %308 : vector<1x4x4xbf16> to vector<4x4xbf16>
    %cst_266 = arith.constant dense<0.000000e+00> : vector<1x4xf32>
    %310 = tpu.matmul %307, %309, %cst_266 {dimension_numbers = #tpu.dot_dimension_numbers<[1], [0], [0], [1], [0, 0, 1, 1], [], []>} : vector<1x4xbf16>, vector<4x4xbf16>, vector<1x4xf32> -> vector<1x4xf32>
    %311 = arith.addf %305, %310 : vector<1x4xf32>
    %c2_267 = arith.constant 2 : index
    %c0_268 = arith.constant 0 : index
    %312 = vector.load %arg20[%c2_267, %c0_268] : memref<3x12xf32, #tpu.memory_space<vmem>>, vector<1x4xf32>
    %313 = arith.truncf %312 : vector<1x4xf32> to vector<1x4xbf16>
    %c6_269 = arith.constant 6 : index
    %c0_270 = arith.constant 0 : index
    %c0_271 = arith.constant 0 : index
    %314 = vector.load %arg8[%c6_269, %c0_270, %c0_271] : memref<9x4x4xbf16, #tpu.memory_space<vmem>>, vector<1x4x4xbf16>
    %315 = vector.shape_cast %314 : vector<1x4x4xbf16> to vector<4x4xbf16>
    %cst_272 = arith.constant dense<0.000000e+00> : vector<1x4xf32>
    %316 = tpu.matmul %313, %315, %cst_272 {dimension_numbers = #tpu.dot_dimension_numbers<[1], [0], [0], [1], [0, 0, 1, 1], [], []>} : vector<1x4xbf16>, vector<4x4xbf16>, vector<1x4xf32> -> vector<1x4xf32>
    %317 = arith.addf %311, %316 : vector<1x4xf32>
    %c2_273 = arith.constant 2 : index
    %c4_274 = arith.constant 4 : index
    %318 = vector.load %arg20[%c2_273, %c4_274] : memref<3x12xf32, #tpu.memory_space<vmem>>, vector<1x4xf32>
    %319 = arith.truncf %318 : vector<1x4xf32> to vector<1x4xbf16>
    %c7_275 = arith.constant 7 : index
    %c0_276 = arith.constant 0 : index
    %c0_277 = arith.constant 0 : index
    %320 = vector.load %arg8[%c7_275, %c0_276, %c0_277] : memref<9x4x4xbf16, #tpu.memory_space<vmem>>, vector<1x4x4xbf16>
    %321 = vector.shape_cast %320 : vector<1x4x4xbf16> to vector<4x4xbf16>
    %cst_278 = arith.constant dense<0.000000e+00> : vector<1x4xf32>
    %322 = tpu.matmul %319, %321, %cst_278 {dimension_numbers = #tpu.dot_dimension_numbers<[1], [0], [0], [1], [0, 0, 1, 1], [], []>} : vector<1x4xbf16>, vector<4x4xbf16>, vector<1x4xf32> -> vector<1x4xf32>
    %323 = arith.addf %317, %322 : vector<1x4xf32>
    %c2_279 = arith.constant 2 : index
    %c8_280 = arith.constant 8 : index
    %324 = vector.load %arg20[%c2_279, %c8_280] : memref<3x12xf32, #tpu.memory_space<vmem>>, vector<1x4xf32>
    %325 = arith.truncf %324 : vector<1x4xf32> to vector<1x4xbf16>
    %c8_281 = arith.constant 8 : index
    %c0_282 = arith.constant 0 : index
    %c0_283 = arith.constant 0 : index
    %326 = vector.load %arg8[%c8_281, %c0_282, %c0_283] : memref<9x4x4xbf16, #tpu.memory_space<vmem>>, vector<1x4x4xbf16>
    %327 = vector.shape_cast %326 : vector<1x4x4xbf16> to vector<4x4xbf16>
    %cst_284 = arith.constant dense<0.000000e+00> : vector<1x4xf32>
    %328 = tpu.matmul %325, %327, %cst_284 {dimension_numbers = #tpu.dot_dimension_numbers<[1], [0], [0], [1], [0, 0, 1, 1], [], []>} : vector<1x4xbf16>, vector<4x4xbf16>, vector<1x4xf32> -> vector<1x4xf32>
    %329 = arith.addf %323, %328 : vector<1x4xf32>
    %330 = arith.truncf %329 : vector<1x4xf32> to vector<1x4xbf16>
    %c0_285 = arith.constant 0 : index
    %c0_286 = arith.constant 0 : index
    %331 = vector.load %arg10[%c0_285, %c0_286] : memref<4x16xbf16, #tpu.memory_space<vmem>>, vector<4x16xbf16>
    %cst_287 = arith.constant dense<0.000000e+00> : vector<1x16xf32>
    %332 = tpu.matmul %330, %331, %cst_287 {dimension_numbers = #tpu.dot_dimension_numbers<[1], [0], [0], [1], [0, 0, 1, 1], [], []>} : vector<1x4xbf16>, vector<4x16xbf16>, vector<1x16xf32> -> vector<1x16xf32>
    %c0_288 = arith.constant 0 : index
    %c0_289 = arith.constant 0 : index
    %333 = vector.load %arg11[%c0_288, %c0_289] : memref<16x1xf32, #tpu.memory_space<vmem>>, vector<16x1xf32>
    %cst_290 = arith.constant dense<0.000000e+00> : vector<16x16xf32>
    %334 = tpu.matmul %333, %332, %cst_290 {dimension_numbers = #tpu.dot_dimension_numbers<[1], [0], [0], [1], [0, 0, 1, 1], [], []>} : vector<16x1xf32>, vector<1x16xf32>, vector<16x16xf32> -> vector<16x16xf32>
    %335 = arith.truncf %334 : vector<16x16xf32> to vector<16x16xbf16>
    %c0_291 = arith.constant 0 : index
    %c0_292 = arith.constant 0 : index
    %336 = vector.load %arg12[%c0_291, %c0_292] : memref<16x256xbf16, #tpu.memory_space<vmem>>, vector<16x256xbf16>
    %cst_293 = arith.constant dense<0.000000e+00> : vector<16x256xf32>
    %337 = tpu.matmul %335, %336, %cst_293 {dimension_numbers = #tpu.dot_dimension_numbers<[1], [0], [0], [1], [0, 0, 1, 1], [], []>} : vector<16x16xbf16>, vector<16x256xbf16>, vector<16x256xf32> -> vector<16x256xf32>
    %c0_294 = arith.constant 0 : index
    %c0_295 = arith.constant 0 : index
    %c0_296 = arith.constant 0 : index
    %338 = vector.load %arg3[%c0_294, %c0_295, %c0_296] : memref<1x16x256xf32, #tpu.memory_space<vmem>>, vector<1x16x256xf32>
    %339 = vector.shape_cast %338 : vector<1x16x256xf32> to vector<16x256xf32>
    %340 = arith.addf %337, %339 : vector<16x256xf32>
    %cst_297 = arith.constant 0.000000e+00 : f32
    %341 = vector.broadcast %cst_297 : f32 to vector<16x256xf32>
    %342 = arith.subf %341, %340 : vector<16x256xf32>
    %343 = math.exp %342 : vector<16x256xf32>
    %cst_298 = arith.constant 1.000000e+00 : f32
    %344 = vector.broadcast %cst_298 : f32 to vector<16x256xf32>
    %345 = arith.addf %344, %343 : vector<16x256xf32>
    %cst_299 = arith.constant 1.000000e+00 : f32
    %346 = vector.broadcast %cst_299 : f32 to vector<16x256xf32>
    %347 = arith.divf %346, %345 : vector<16x256xf32>
    %c0_300 = arith.constant 0 : index
    %c0_301 = arith.constant 0 : index
    %c0_302 = arith.constant 0 : index
    %348 = vector.load %arg2[%c0_300, %c0_301, %c0_302] : memref<1x16x256xf32, #tpu.memory_space<vmem>>, vector<1x16x256xf32>
    %349 = vector.shape_cast %348 : vector<1x16x256xf32> to vector<16x256xf32>
    %350 = arith.mulf %349, %347 : vector<16x256xf32>
    %cst_303 = arith.constant dense<0.000000e+00> : vector<256xf32>
    %351 = vector.multi_reduction <add>, %350, %cst_303 [0] : vector<16x256xf32> to vector<256xf32>
    %352 = vector.shape_cast %351 : vector<256xf32> to vector<1x256xf32>
    %c0_304 = arith.constant 0 : index
    %c0_305 = arith.constant 0 : index
    %353 = vector.load %arg13[%c0_304, %c0_305] : memref<256x16xf32, #tpu.memory_space<vmem>>, vector<256x16xf32>
    %cst_306 = arith.constant dense<0.000000e+00> : vector<1x16xf32>
    %354 = tpu.matmul %352, %353, %cst_306 {dimension_numbers = #tpu.dot_dimension_numbers<[1], [0], [0], [1], [0, 0, 1, 1], [], []>} : vector<1x256xf32>, vector<256x16xf32>, vector<1x16xf32> -> vector<1x16xf32>
    %cst_307 = arith.constant 3.906250e-03 : f32
    %355 = vector.broadcast %cst_307 : f32 to vector<1x16xf32>
    %356 = arith.mulf %354, %355 : vector<1x16xf32>
    %c0_308 = arith.constant 0 : index
    %c0_309 = arith.constant 0 : index
    %357 = vector.load %arg14[%c0_308, %c0_309] : memref<16x256xf32, #tpu.memory_space<vmem>>, vector<16x256xf32>
    %cst_310 = arith.constant dense<0.000000e+00> : vector<1x256xf32>
    %358 = tpu.matmul %356, %357, %cst_310 {dimension_numbers = #tpu.dot_dimension_numbers<[1], [0], [0], [1], [0, 0, 1, 1], [], []>} : vector<1x16xf32>, vector<16x256xf32>, vector<1x256xf32> -> vector<1x256xf32>
    %359 = vector.broadcast %358 : vector<1x256xf32> to vector<16x256xf32>
    %360 = arith.subf %350, %359 : vector<16x256xf32>
    %361 = arith.mulf %360, %360 : vector<16x256xf32>
    %cst_311 = arith.constant dense<0.000000e+00> : vector<256xf32>
    %362 = vector.multi_reduction <add>, %361, %cst_311 [0] : vector<16x256xf32> to vector<256xf32>
    %363 = vector.shape_cast %362 : vector<256xf32> to vector<1x256xf32>
    %c0_312 = arith.constant 0 : index
    %c0_313 = arith.constant 0 : index
    %364 = vector.load %arg13[%c0_312, %c0_313] : memref<256x16xf32, #tpu.memory_space<vmem>>, vector<256x16xf32>
    %cst_314 = arith.constant dense<0.000000e+00> : vector<1x16xf32>
    %365 = tpu.matmul %363, %364, %cst_314 {dimension_numbers = #tpu.dot_dimension_numbers<[1], [0], [0], [1], [0, 0, 1, 1], [], []>} : vector<1x256xf32>, vector<256x16xf32>, vector<1x16xf32> -> vector<1x16xf32>
    %cst_315 = arith.constant 3.906250e-03 : f32
    %366 = vector.broadcast %cst_315 : f32 to vector<1x16xf32>
    %367 = arith.mulf %365, %366 : vector<1x16xf32>
    %cst_316 = arith.constant 0.000000e+00 : f32
    %368 = vector.broadcast %cst_316 : f32 to vector<1x16xf32>
    %369 = arith.maximumf %367, %368 : vector<1x16xf32>
    %370 = math.sqrt %369 : vector<1x16xf32>
    %371 = arith.addf %370, %356 : vector<1x16xf32>
    %c0_317 = arith.constant 0 : index
    %c0_318 = arith.constant 0 : index
    %372 = vector.load %arg15[%c0_317, %c0_318] : memref<16x4xf32, #tpu.memory_space<vmem>>, vector<16x4xf32>
    %cst_319 = arith.constant dense<0.000000e+00> : vector<1x4xf32>
    %373 = tpu.matmul %371, %372, %cst_319 {dimension_numbers = #tpu.dot_dimension_numbers<[1], [0], [0], [1], [0, 0, 1, 1], [], []>} : vector<1x16xf32>, vector<16x4xf32>, vector<1x4xf32> -> vector<1x4xf32>
    %c0_320 = arith.constant 0 : index
    %c0_321 = arith.constant 0 : index
    %374 = vector.load %arg16[%c0_320, %c0_321] : memref<1x4xf32, #tpu.memory_space<vmem>>, vector<1x4xf32>
    %375 = arith.addf %373, %374 : vector<1x4xf32>
    %cst_322 = arith.constant 0.000000e+00 : f32
    %376 = vector.broadcast %cst_322 : f32 to vector<1x4xf32>
    %377 = arith.maximumf %375, %376 : vector<1x4xf32>
    %c0_323 = arith.constant 0 : index
    %c0_324 = arith.constant 0 : index
    %378 = vector.load %arg17[%c0_323, %c0_324] : memref<4x16xf32, #tpu.memory_space<vmem>>, vector<4x16xf32>
    %cst_325 = arith.constant dense<0.000000e+00> : vector<1x16xf32>
    %379 = tpu.matmul %377, %378, %cst_325 {dimension_numbers = #tpu.dot_dimension_numbers<[1], [0], [0], [1], [0, 0, 1, 1], [], []>} : vector<1x4xf32>, vector<4x16xf32>, vector<1x16xf32> -> vector<1x16xf32>
    %c0_326 = arith.constant 0 : index
    %c0_327 = arith.constant 0 : index
    %380 = vector.load %arg18[%c0_326, %c0_327] : memref<1x16xf32, #tpu.memory_space<vmem>>, vector<1x16xf32>
    %381 = arith.addf %379, %380 : vector<1x16xf32>
    %cst_328 = arith.constant 0.000000e+00 : f32
    %382 = vector.broadcast %cst_328 : f32 to vector<1x16xf32>
    %383 = arith.subf %382, %381 : vector<1x16xf32>
    %384 = math.exp %383 : vector<1x16xf32>
    %cst_329 = arith.constant 1.000000e+00 : f32
    %385 = vector.broadcast %cst_329 : f32 to vector<1x16xf32>
    %386 = arith.addf %385, %384 : vector<1x16xf32>
    %cst_330 = arith.constant 1.000000e+00 : f32
    %387 = vector.broadcast %cst_330 : f32 to vector<1x16xf32>
    %388 = arith.divf %387, %386 : vector<1x16xf32>
    %c0_331 = arith.constant 0 : index
    %c0_332 = arith.constant 0 : index
    %389 = vector.load %arg14[%c0_331, %c0_332] : memref<16x256xf32, #tpu.memory_space<vmem>>, vector<16x256xf32>
    %cst_333 = arith.constant dense<0.000000e+00> : vector<1x256xf32>
    %390 = tpu.matmul %388, %389, %cst_333 {dimension_numbers = #tpu.dot_dimension_numbers<[1], [0], [0], [1], [0, 0, 1, 1], [], []>} : vector<1x16xf32>, vector<16x256xf32>, vector<1x256xf32> -> vector<1x256xf32>
    %391 = vector.broadcast %390 : vector<1x256xf32> to vector<16x256xf32>
    %392 = arith.mulf %350, %391 : vector<16x256xf32>
    %cst_334 = arith.constant 0.000000e+00 : f32
    %cst_335 = arith.constant 1.000000e+00 : f32
    %393 = vector.broadcast %cst_334 : f32 to vector<16x256xf32>
    %394 = arith.maximumf %393, %392 : vector<16x256xf32>
    %395 = vector.broadcast %cst_335 : f32 to vector<16x256xf32>
    %396 = arith.minimumf %395, %394 : vector<16x256xf32>
    %c0_336 = arith.constant 0 : index
    %c0_337 = arith.constant 0 : index
    %c0_338 = arith.constant 0 : index
    %397 = vector.load %arg19[%c0_336, %c0_337, %c0_338] : memref<1x16x256xf32, #tpu.memory_space<vmem>>, vector<1x16x256xf32>
    %398 = vector.shape_cast %397 : vector<1x16x256xf32> to vector<16x256xf32>
    %399 = vector.shape_cast %396 : vector<16x256xf32> to vector<1x16x256xf32>
    tpu.vector_store %arg19[%c0_336, %c0_337, %c0_338], %399 {strides = array<i32>} : memref<1x16x256xf32, #tpu.memory_space<vmem>>, vector<1x16x256xf32>,
    return
  }
  func.func @transform_0(%arg0: i32) -> (i32, i32, i32) {
    %c0_i32 = arith.constant 0 : i32
    %c0_i32_0 = arith.constant 0 : i32
    %c0_i32_1 = arith.constant 0 : i32
    return %arg0, %c0_i32, %c0_i32_0 : i32, i32, i32
  }
  func.func @transform_1(%arg0: i32) -> (i32, i32, i32) {
    %c0_i32 = arith.constant 0 : i32
    %c0_i32_0 = arith.constant 0 : i32
    %c0_i32_1 = arith.constant 0 : i32
    return %arg0, %c0_i32, %c0_i32_0 : i32, i32, i32
  }
  func.func @transform_2(%arg0: i32) -> (i32, i32, i32) {
    %c0_i32 = arith.constant 0 : i32
    %c0_i32_0 = arith.constant 0 : i32
    %c0_i32_1 = arith.constant 0 : i32
    return %arg0, %c0_i32, %c0_i32_0 : i32, i32, i32
  }
  func.func @transform_3(%arg0: i32) -> (i32, i32, i32) {
    %c0_i32 = arith.constant 0 : i32
    %c0_i32_0 = arith.constant 0 : i32
    %c0_i32_1 = arith.constant 0 : i32
    %c0_i32_2 = arith.constant 0 : i32
    return %c0_i32, %c0_i32_0, %c0_i32_1 : i32, i32, i32
  }
  func.func @transform_4(%arg0: i32) -> (i32, i32) {
    %c0_i32 = arith.constant 0 : i32
    %c0_i32_0 = arith.constant 0 : i32
    %c0_i32_1 = arith.constant 0 : i32
    return %c0_i32, %c0_i32_0 : i32, i32
  }
  func.func @transform_5(%arg0: i32) -> (i32, i32, i32) {
    %c0_i32 = arith.constant 0 : i32
    %c0_i32_0 = arith.constant 0 : i32
    %c0_i32_1 = arith.constant 0 : i32
    %c0_i32_2 = arith.constant 0 : i32
    return %c0_i32, %c0_i32_0, %c0_i32_1 : i32, i32, i32
  }
  func.func @transform_6(%arg0: i32) -> (i32, i32) {
    %c0_i32 = arith.constant 0 : i32
    %c0_i32_0 = arith.constant 0 : i32
    %c0_i32_1 = arith.constant 0 : i32
    return %c0_i32, %c0_i32_0 : i32, i32
  }
  func.func @transform_7(%arg0: i32) -> (i32, i32, i32) {
    %c0_i32 = arith.constant 0 : i32
    %c0_i32_0 = arith.constant 0 : i32
    %c0_i32_1 = arith.constant 0 : i32
    %c0_i32_2 = arith.constant 0 : i32
    return %c0_i32, %c0_i32_0, %c0_i32_1 : i32, i32, i32
  }
  func.func @transform_8(%arg0: i32) -> (i32, i32) {
    %c0_i32 = arith.constant 0 : i32
    %c0_i32_0 = arith.constant 0 : i32
    %c0_i32_1 = arith.constant 0 : i32
    return %c0_i32, %c0_i32_0 : i32, i32
  }
  func.func @transform_9(%arg0: i32) -> (i32, i32) {
    %c0_i32 = arith.constant 0 : i32
    %c0_i32_0 = arith.constant 0 : i32
    %c0_i32_1 = arith.constant 0 : i32
    return %c0_i32, %c0_i32_0 : i32, i32
  }
  func.func @transform_10(%arg0: i32) -> (i32, i32) {
    %c0_i32 = arith.constant 0 : i32
    %c0_i32_0 = arith.constant 0 : i32
    %c0_i32_1 = arith.constant 0 : i32
    return %c0_i32, %c0_i32_0 : i32, i32
  }
  func.func @transform_11(%arg0: i32) -> (i32, i32) {
    %c0_i32 = arith.constant 0 : i32
    %c0_i32_0 = arith.constant 0 : i32
    %c0_i32_1 = arith.constant 0 : i32
    return %c0_i32, %c0_i32_0 : i32, i32
  }
  func.func @transform_12(%arg0: i32) -> (i32, i32) {
    %c0_i32 = arith.constant 0 : i32
    %c0_i32_0 = arith.constant 0 : i32
    %c0_i32_1 = arith.constant 0 : i32
    return %c0_i32, %c0_i32_0 : i32, i32
  }
  func.func @transform_13(%arg0: i32) -> (i32, i32) {
    %c0_i32 = arith.constant 0 : i32
    %c0_i32_0 = arith.constant 0 : i32
    %c0_i32_1 = arith.constant 0 : i32
    return %c0_i32, %c0_i32_0 : i32, i32
  }
  func.func @transform_14(%arg0: i32) -> (i32, i32) {
    %c0_i32 = arith.constant 0 : i32
    %c0_i32_0 = arith.constant 0 : i32
    %c0_i32_1 = arith.constant 0 : i32
    return %c0_i32, %c0_i32_0 : i32, i32
  }
  func.func @transform_15(%arg0: i32) -> (i32, i32) {
    %c0_i32 = arith.constant 0 : i32
    %c0_i32_0 = arith.constant 0 : i32
    %c0_i32_1 = arith.constant 0 : i32
    return %c0_i32, %c0_i32_0 : i32, i32
  }
  func.func @transform_16(%arg0: i32) -> (i32, i32) {
    %c0_i32 = arith.constant 0 : i32
    %c0_i32_0 = arith.constant 0 : i32
    %c0_i32_1 = arith.constant 0 : i32
    return %c0_i32, %c0_i32_0 : i32, i32
  }
  func.func @transform_17(%arg0: i32) -> (i32, i32) {
    %c0_i32 = arith.constant 0 : i32
    %c0_i32_0 = arith.constant 0 : i32
    %c0_i32_1 = arith.constant 0 : i32
    return %c0_i32, %c0_i32_0 : i32, i32
  }
  func.func @transform_18(%arg0: i32) -> (i32, i32, i32) {
    %c0_i32 = arith.constant 0 : i32
    %c0_i32_0 = arith.constant 0 : i32
    %c0_i32_1 = arith.constant 0 : i32
    return %arg0, %c0_i32, %c0_i32_0 : i32, i32, i32
  }
}

</mosaic_0001>

<bundles_post_ra>
// kernel: compressed_residual_attention_block.3
= control target key start
LH: loop header
LB: loop body
LE: loop exit
PB: predicated region body
PF: predicated region fallthrough
CT: control target
= control target key end

     0   :  { %v2876_v0 = vmov 0   ;;  %vm464_vm0 = vcmask 130048   ;;  %vm1900_vm1 = vcmask 1041408   ;;  %vm1730_vm2 = vcmask 27648   ;;  %s4443_s2 = inlined_call_operand.vmem [shape: bf16[144,16], index: 2, kind: input, shape index: {}]   ;;  %s4444_s0 = inlined_call_operand.vmem [shape: bf16[512,144], index: 0, kind: input, shape index: {}]   ;;  %s4445_s4 = inlined_call_operand.vmem [shape: bf16[16,4], index: 4, kind: input, shape index: {}]   ;;  %s4446_s3 = inlined_call_operand.vmem [shape: f32[1,16], index: 3, kind: input, shape index: {}]   ;;  %s4447_s1 = inlined_call_operand.vmem [shape: f32[512,16], index: 1, kind: input, shape index: {}]   ;;  %s4448_s8 = inlined_call_operand.vmem [shape: f32[512,16], index: 8, kind: output, shape index: {0}]   ;;  %s4449_s6 = inlined_call_operand.vmem [shape: bf16[4,16], index: 6, kind: input, shape index: {}]   ;;  %s4450_s5 = inlined_call_operand.vmem [shape: f32[1,4], index: 5, kind: input, shape index: {}]   ;;  %s4451_s9 = inlined_call_operand.vmem [shape: bf16[512,4], index: 9, kind: output, shape index: {1}]   ;;  %s4452_s7 = inlined_call_operand.vmem [shape: f32[1,16], index: 7, kind: input, shape index: {}]   ;;  %s4453_s10 = inlined_call_operand.vmem [shape: f32[512,16], index: 10, kind: output, shape index: {2}]  }
   0x1   :  { %561 = vmatprep.subr.bf16.mxu0 %v2876_v0  ;;  %v2770_v1 = vld [vmem:[%s4443_s2] sm:$0xff]   ;;  %v2771_v2 = vld [vmem:[%s4443_s2 + $0x8] sm:$0xff]   ;;  %v2772_v3 = vld [vmem:[%s4443_s2 + $0x10] sm:$0xff]   ;;  %vm1803_vm3 = vcmask 31744  }
   0x2   :  { %562 = vmatpush1.bf16.msra.mxu0 %v2770_v1  ;;  %v2773_v4 = vld [vmem:[%s4443_s2 + $0x18] sm:$0xff]   ;;  %v2781_v5 = vld [vmem:[%s4444_s0 + $0x4] ss:$8 sps:$4 sm:$0xff]   ;;  %v2776_v8 = vld [vmem:[%s4443_s2 + $0x30] sm:$0xff]  }
   0x3   :  { %563 = vmatprep.subr.bf16.mxu0 %v2876_v0  ;;  %2343 = vmatprep.mubr.msk.bf16.mxu0 %vm464_vm0, %v2781_v5  ;;  %v2774_v6 = vld [vmem:[%s4443_s2 + $0x20] sm:$0xff]   ;;  %v2775_v7 = vld [vmem:[%s4443_s2 + $0x28] sm:$0xff]   ;;  %v2777_v9 = vld [vmem:[%s4443_s2 + $0x38] sm:$0xff]  }
   0x4   :  { %v2778_v10 = vld [vmem:[%s4443_s2 + $0x40] sm:$0xff]   ;;  %v2782_v12 = vld [vmem:[%s4444_s0 + $0x14] ss:$8 sps:$4 sm:$0xff]   ;;  %v2784_v13 = vld [vmem:[%s4444_s0 + $0x10] ss:$8 sps:$4 sm:$0xff]  }
   0x5   :  { %v2779_v11 = vld [vmem:[%s4444_s0] ss:$8 sps:$4 sm:$0xff]   ;;  %v2785_v14 = vld [vmem:[%s4444_s0 + $0x24] ss:$8 sps:$4 sm:$0xff]   ;;  %v2788_v16 = vld [vmem:[%s4444_s0 + $0x34] ss:$8 sps:$4 sm:$0xff]  }
   0x6   :  { %564 = vmatpush1.bf16.msra.mxu0 %v2771_v2  ;;  %v2787_v15 = vld [vmem:[%s4444_s0 + $0x20] ss:$8 sps:$4 sm:$0xff]   ;;  %v2790_v17 = vld [vmem:[%s4444_s0 + $0x30] ss:$8 sps:$4 sm:$0xff]   ;;  %v2791_v18 = vld [vmem:[%s4444_s0 + $0x44] ss:$8 sps:$4 sm:$0xff]  }
   0x7   :  { %565 = vmatprep.subr.bf16.mxu0 %v2876_v0  ;;  %v2793_v19 = vld [vmem:[%s4444_s0 + $0x40] ss:$8 sps:$4 sm:$0xff]   ;;  %v2794_v20 = vld [vmem:[%s4444_s0 + $0x54] ss:$8 sps:$4 sm:$0xff]   ;;  %v2796_v21 = vld [vmem:[%s4444_s0 + $0x50] ss:$8 sps:$4 sm:$0xff]  }
   0x8   :  { %v2797_v22 = vld [vmem:[%s4444_s0 + $0x64] ss:$8 sps:$4 sm:$0xff]   ;;  %v2799_v23 = vld [vmem:[%s4444_s0 + $0x60] ss:$8 sps:$4 sm:$0xff]   ;;  %v2800_v24 = vld [vmem:[%s4444_s0 + $0x74] ss:$8 sps:$4 sm:$0xff]  }
   0x9   :  { %v2802_v25 = vld [vmem:[%s4444_s0 + $0x70] ss:$8 sps:$4 sm:$0xff]   ;;  %v2803_v26 = vld [vmem:[%s4444_s0 + $0x84] ss:$8 sps:$4 sm:$0xff]   ;;  %v2805_v27 = vld [vmem:[%s4444_s0 + $0x80] ss:$8 sps:$4 sm:$0xff]  }
   0xa   :  { %566 = vmatpush1.bf16.msra.mxu0 %v2772_v3  ;;  %v2806_v28 = vld [vmem:[%s4444_s0 + $0x94] ss:$8 sps:$4 sm:$0xff]   ;;  %v2808_v29 = vld [vmem:[%s4444_s0 + $0x90] ss:$8 sps:$4 sm:$0xff]   ;;  %v2809_v30 = vld [vmem:[%s4444_s0 + $0xa4] ss:$8 sps:$4 sm:$0xff]  }
   0xb   :  { %567 = vmatprep.subr.bf16.mxu0 %v2876_v0  ;;  %v2811_v31 = vld [vmem:[%s4444_s0 + $0xa0] ss:$8 sps:$4 sm:$0xff]   ;;  %v2812_v32 = vld [vmem:[%s4444_s0 + $0xb4] ss:$8 sps:$4 sm:$0xff]   ;;  %v2814_v33 = vld [vmem:[%s4444_s0 + $0xb0] ss:$8 sps:$4 sm:$0xff]  }
   0xc   :  { %v2815_v34 = vld [vmem:[%s4444_s0 + $0xc4] ss:$8 sps:$4 sm:$0xff]   ;;  %v2817_v35 = vld [vmem:[%s4444_s0 + $0xc0] ss:$8 sps:$4 sm:$0xff]   ;;  %v2818_v36 = vld [vmem:[%s4444_s0 + $0xd4] ss:$8 sps:$4 sm:$0xff]  }
   0xd   :  { %v2866_v37 = vld [vmem:[%s4445_s4] sm:$0xff]   ;;  %v2820_v38 = vld [vmem:[%s4444_s0 + $0xd0] ss:$8 sps:$4 sm:$0xff]   ;;  %v2824_v41 = vld [vmem:[%s4444_s0 + $0xf4] ss:$8 sps:$4 sm:$0xff]  }
   0xe   :  { %568 = vmatpush1.bf16.msra.mxu0 %v2773_v4  ;;  %2636 = vmatprep.subr.bf16.mxu1 %v2866_v37  ;;  %v2821_v39 = vld [vmem:[%s4444_s0 + $0xe4] ss:$8 sps:$4 sm:$0xff]   ;;  %v2823_v40 = vld [vmem:[%s4444_s0 + $0xe0] ss:$8 sps:$4 sm:$0xff]   ;;  %v2826_v42 = vld [vmem:[%s4444_s0 + $0xf0] ss:$8 sps:$4 sm:$0xff]  }
   0xf   :  { %569 = vmatprep.subr.bf16.mxu0 %v2876_v0  ;;  %2637 = vmatpush3.bf16.msra.mxu1 %v2866_v37  ;;  %v2827_v43 = vld [vmem:[%s4444_s0 + $0x104] ss:$8 sps:$4 sm:$0xff]   ;;  %v2829_v44 = vld [vmem:[%s4444_s0 + $0x100] ss:$8 sps:$4 sm:$0xff]   ;;  %v2830_v45 = vld [vmem:[%s4444_s0 + $0x114] ss:$8 sps:$4 sm:$0xff]  }
  0x10   :  { %v2832_v46 = vld [vmem:[%s4444_s0 + $0x110] ss:$8 sps:$4 sm:$0xff]   ;;  %v2833_v47 = vld [vmem:[%s4444_s0 + $0x124] ss:$8 sps:$4 sm:$0xff]   ;;  %v2835_v48 = vld [vmem:[%s4444_s0 + $0x120] ss:$8 sps:$4 sm:$0xff]  }
  0x11   :  { %v2836_v49 = vld [vmem:[%s4444_s0 + $0x134] ss:$8 sps:$4 sm:$0xff]   ;;  %v2838_v50 = vld [vmem:[%s4444_s0 + $0x130] ss:$8 sps:$4 sm:$0xff]   ;;  %v2839_v51 = vld [vmem:[%s4444_s0 + $0x144] ss:$8 sps:$4 sm:$0xff]  }
  0x12   :  { %570 = vmatpush1.bf16.msra.mxu0 %v2774_v6  ;;  %v2841_v52 = vld [vmem:[%s4444_s0 + $0x140] ss:$8 sps:$4 sm:$0xff]   ;;  %v2842_v53 = vld [vmem:[%s4444_s0 + $0x154] ss:$8 sps:$4 sm:$0xff]   ;;  %v2844_v54 = vld [vmem:[%s4444_s0 + $0x150] ss:$8 sps:$4 sm:$0xff]  }
  0x13   :  { %571 = vmatprep.subr.bf16.mxu0 %v2876_v0  ;;  %v2845_v55 = vld [vmem:[%s4444_s0 + $0x164] ss:$8 sps:$4 sm:$0xff]   ;;  %v2847_v56 = vld [vmem:[%s4444_s0 + $0x160] ss:$8 sps:$4 sm:$0xff]   ;;  %v2848_v57 = vld [vmem:[%s4444_s0 + $0x174] ss:$8 sps:$4 sm:$0xff]  }
  0x14   :  { %v2850_v58 = vld [vmem:[%s4444_s0 + $0x170] ss:$8 sps:$4 sm:$0xff]   ;;  %v2851_v59 = vld [vmem:[%s4444_s0 + $0x184] ss:$8 sps:$4 sm:$0xff]   ;;  %v2853_v60 = vld [vmem:[%s4444_s0 + $0x180] ss:$8 sps:$4 sm:$0xff]  }
  0x15   :  { %v2854_v61 = vld [vmem:[%s4444_s0 + $0x194] ss:$8 sps:$4 sm:$0xff]   ;;  %v2856_v62 = vld [vmem:[%s4444_s0 + $0x190] ss:$8 sps:$4 sm:$0xff]   ;;  %v2857_v63 = vld [vmem:[%s4444_s0 + $0x1a4] ss:$8 sps:$4 sm:$0xff]  }
  0x16   :  { %572 = vmatpush1.bf16.msra.mxu0 %v2775_v7  ;;  %v2860_v1 = vld [vmem:[%s4444_s0 + $0x1b4] ss:$8 sps:$4 sm:$0xff]   ;;  %v3157_v2 = vld [vmem:[%s4446_s3] ss:$0 sm:$0xff]  ;;  %v2862_v7 = vld [vmem:[%s4444_s0 + $0x1b0] ss:$8 sps:$4 sm:$0xff]  }
  0x17   :  { %573 = vmatprep.subr.bf16.mxu0 %v2876_v0  ;;  %v850_v4 = vld [vmem:[%s4447_s1] sm:$0xff] }
  0x1a   :  { %574 = vmatpush1.bf16.msra.mxu0 %v2776_v8 }
  0x1b   :  { %575 = vmatprep.subr.bf16.mxu0 %v2876_v0 }
  0x1e   :  { %576 = vmatpush1.bf16.msra.mxu0 %v2777_v9  ;;  %v851_v9 = vld [vmem:[%s4447_s1 + $0x8] sm:$0xff] }
  0x1f   :  { %577 = vmatprep.subr.bf16.mxu0 %v2876_v0  ;;  %v2859_v0 = vld [vmem:[%s4444_s0 + $0x1a0] ss:$8 sps:$4 sm:$0xff]  }
  0x22   :  { %578 = vmatpush1.bf16.msra.mxu0 %v2778_v10  ;;  %v2863_v10 = vld [vmem:[%s4444_s0 + $0x1c4] ss:$8 sps:$4 sm:$0xff]  }
  0x25   :  { %594 = vmatmul.mubr.bf16.vlgmr.msra.gmra.mrb[0].mxu0 %v2779_v11 }
  0x26   :  { %2344 = vmatprep.mubr.msk.bf16.mxu0 %vm464_vm0, %v2782_v12 }
  0x2d   :  { %602 = vmatmul.mubr.bf16.gmra.mrb[4].mxu0 %v2784_v13 }
  0x2e   :  { %2345 = vmatprep.mubr.msk.bf16.mxu0 %vm464_vm0, %v2785_v14 }
  0x35   :  { %610 = vmatmul.mubr.bf16.gmra.mrb[8].mxu0 %v2787_v15 }
  0x36   :  { %2346 = vmatprep.mubr.msk.bf16.mxu0 %vm464_vm0, %v2788_v16 }
  0x3d   :  { %618 = vmatmul.mubr.bf16.gmra.mrb[12].mxu0 %v2790_v17  ;;  %v852_v17 = vld [vmem:[%s4447_s1 + $0x10] sm:$0xff] }
  0x3e   :  { %2347 = vmatprep.mubr.msk.bf16.mxu0 %vm464_vm0, %v2791_v18 }
  0x45   :  { %626 = vmatmul.mubr.bf16.gmra.mrb[16].mxu0 %v2793_v19 }
  0x46   :  { %2348 = vmatprep.mubr.msk.bf16.mxu0 %vm464_vm0, %v2794_v20  ;;  %v2865_v20 = vld [vmem:[%s4444_s0 + $0x1c0] ss:$8 sps:$4 sm:$0xff]  }
  0x4d   :  { %634 = vmatmul.mubr.bf16.gmra.mrb[20].mxu0 %v2796_v21 }
  0x4e   :  { %2349 = vmatprep.mubr.msk.bf16.mxu0 %vm464_vm0, %v2797_v22  ;;  %v853_v22 = vld [vmem:[%s4447_s1 + $0x18] sm:$0xff] }
  0x55   :  { %642 = vmatmul.mubr.bf16.gmra.mrb[24].mxu0 %v2799_v23  ;;  %v2867_v23 = vld [vmem:[%s4444_s0 + $0x1d4] ss:$8 sps:$4 sm:$0xff]  }
  0x56   :  { %2350 = vmatprep.mubr.msk.bf16.mxu0 %vm464_vm0, %v2800_v24 }
  0x5d   :  { %650 = vmatmul.mubr.bf16.gmra.mrb[28].mxu0 %v2802_v25 }
  0x5e   :  { %2351 = vmatprep.mubr.msk.bf16.mxu0 %vm464_vm0, %v2803_v26 }
  0x65   :  { %658 = vmatmul.mubr.bf16.gmra.mrb[32].mxu0 %v2805_v27 }
  0x66   :  { %2352 = vmatprep.mubr.msk.bf16.mxu0 %vm464_vm0, %v2806_v28 }
  0x6d   :  { %666 = vmatmul.mubr.bf16.gmra.mrb[36].mxu0 %v2808_v29 }
  0x6e   :  { %2353 = vmatprep.mubr.msk.bf16.mxu0 %vm464_vm0, %v2809_v30  ;;  %v854_v30 = vld [vmem:[%s4447_s1 + $0x20] sm:$0xff] }
  0x75   :  { %674 = vmatmul.mubr.bf16.gmra.mrb[40].mxu0 %v2811_v31 }
  0x76   :  { %2354 = vmatprep.mubr.msk.bf16.mxu0 %vm464_vm0, %v2812_v32 }
  0x7d   :  { %682 = vmatmul.mubr.bf16.gmra.mrb[44].mxu0 %v2814_v33  ;;  %v2869_v33 = vld [vmem:[%s4444_s0 + $0x1d0] ss:$8 sps:$4 sm:$0xff]  }
  0x7e   :  { %2355 = vmatprep.mubr.msk.bf16.mxu0 %vm464_vm0, %v2815_v34 }
  0x85   :  { %690 = vmatmul.mubr.bf16.gmra.mrb[48].mxu0 %v2817_v35  ;;  %v855_v35 = vld [vmem:[%s4447_s1 + $0x28] sm:$0xff] }
  0x86   :  { %2356 = vmatprep.mubr.msk.bf16.mxu0 %vm464_vm0, %v2818_v36  ;;  %v2870_v36 = vld [vmem:[%s4444_s0 + $0x1e4] ss:$8 sps:$4 sm:$0xff]  }
  0x8d   :  { %698 = vmatmul.mubr.bf16.gmra.mrb[52].mxu0 %v2820_v38 }
  0x8e   :  { %2357 = vmatprep.mubr.msk.bf16.mxu0 %vm464_vm0, %v2821_v39 }
  0x95   :  { %706 = vmatmul.mubr.bf16.gmra.mrb[56].mxu0 %v2823_v40 }
  0x96   :  { %2358 = vmatprep.mubr.msk.bf16.mxu0 %vm464_vm0, %v2824_v41 }
  0x9d   :  { %714 = vmatmul.mubr.bf16.gmra.mrb[60].mxu0 %v2826_v42 }
  0x9e   :  { %2359 = vmatprep.mubr.msk.bf16.mxu0 %vm464_vm0, %v2827_v43  ;;  %v856_v43 = vld [vmem:[%s4447_s1 + $0x30] sm:$0xff] }
  0xa5   :  { %722 = vmatmul.mubr.bf16.gmra.mrb[64].mxu0 %v2829_v44 }
  0xa6   :  { %2360 = vmatprep.mubr.msk.bf16.mxu0 %vm464_vm0, %v2830_v45 }
  0xad   :  { %730 = vmatmul.mubr.bf16.gmra.mrb[68].mxu0 %v2832_v46  ;;  %v2872_v46 = vld [vmem:[%s4444_s0 + $0x1e0] ss:$8 sps:$4 sm:$0xff]  }
  0xae   :  { %2361 = vmatprep.mubr.msk.bf16.mxu0 %vm464_vm0, %v2833_v47 }
  0xb5   :  { %738 = vmatmul.mubr.bf16.gmra.mrb[72].mxu0 %v2835_v48  ;;  %v857_v48 = vld [vmem:[%s4447_s1 + $0x38] sm:$0xff] }
  0xb6   :  { %2362 = vmatprep.mubr.msk.bf16.mxu0 %vm464_vm0, %v2836_v49  ;;  %v2873_v49 = vld [vmem:[%s4444_s0 + $0x1f4] ss:$8 sps:$4 sm:$0xff]  }
  0xbd   :  { %746 = vmatmul.mubr.bf16.gmra.mrb[76].mxu0 %v2838_v50 }
  0xbe   :  { %2363 = vmatprep.mubr.msk.bf16.mxu0 %vm464_vm0, %v2839_v51 }
  0xc5   :  { %754 = vmatmul.mubr.bf16.gmra.mrb[80].mxu0 %v2841_v52 }
  0xc6   :  { %2364 = vmatprep.mubr.msk.bf16.mxu0 %vm464_vm0, %v2842_v53 }
  0xcd   :  { %762 = vmatmul.mubr.bf16.gmra.mrb[84].mxu0 %v2844_v54 }
  0xce   :  { %2365 = vmatprep.mubr.msk.bf16.mxu0 %vm464_vm0, %v2845_v55 }
  0xd5   :  { %770 = vmatmul.mubr.bf16.gmra.mrb[88].mxu0 %v2847_v56  ;;  %v858_v56 = vld [vmem:[%s4447_s1 + $0x40] sm:$0xff] }
  0xd6   :  { %2366 = vmatprep.mubr.msk.bf16.mxu0 %vm464_vm0, %v2848_v57 }
  0xdd   :  { %778 = vmatmul.mubr.bf16.gmra.mrb[92].mxu0 %v2850_v58 }
  0xde   :  { %2367 = vmatprep.mubr.msk.bf16.mxu0 %vm464_vm0, %v2851_v59  ;;  %v2875_v59 = vld [vmem:[%s4444_s0 + $0x1f0] ss:$8 sps:$4 sm:$0xff]  }
  0xe5   :  { %786 = vmatmul.mubr.bf16.gmra.mrb[96].mxu0 %v2853_v60 }
  0xe6   :  { %2368 = vmatprep.mubr.msk.bf16.mxu0 %vm464_vm0, %v2854_v61  ;;  %v859_v61 = vld [vmem:[%s4447_s1 + $0x48] sm:$0xff] }
  0xed   :  { %794 = vmatmul.mubr.bf16.gmra.mrb[100].mxu0 %v2856_v62 }
  0xee   :  { %2369 = vmatprep.mubr.msk.bf16.mxu0 %vm464_vm0, %v2857_v63 }
  0xf5   :  { %802 = vmatmul.mubr.bf16.gmra.mrb[104].mxu0 %v2859_v0 }
  0xf6   :  { %2370 = vmatprep.mubr.msk.bf16.mxu0 %vm464_vm0, %v2860_v1 }
  0xf8   :  { %v595_v3 = vpop.f32.mrb[0].mxu0 }
  0xf9   :  { %v596_v5 = vadd.f32 %v3157_v2, %v595_v3  ;;  %v597_v6 = vpop.f32.mrb[1].mxu0 }
  0xfa   :  { %v598_v8 = vpop.f32.mrb[2].mxu0 }
  0xfb   :  { %v914_v11 = vadd.f32 %v850_v4, %v596_v5  ;;  %v599_v12 = vadd.f32 %v3157_v2, %v598_v8  ;;  %v600_v13 = vpop.f32.mrb[3].mxu0  ;;  %v860_v5 = vld [vmem:[%s4447_s1 + $0x50] sm:$0xff] }
  0xfd   :  { %978 = vst.msk [vmem:[%s4448_s8] sm:$0xff] %vm464_vm0, %v914_v11  ;;  %v915_v14 = vadd.f32 %v851_v9, %v599_v12  ;;  %810 = vmatmul.mubr.bf16.gmra.mrb[108].mxu0 %v2862_v7  ;;  %v861_v9 = vld [vmem:[%s4447_s1 + $0x58] sm:$0xff] }
  0xfe   :  { %2371 = vmatprep.mubr.msk.bf16.mxu0 %vm464_vm0, %v2863_v10 }
  0xff   :  { %979 = vst.msk [vmem:[%s4448_s8 + $0x8] sm:$0xff] %vm464_vm0, %v915_v14  ;;  %v1042_v15 = vpack.c.bf16 %v915_v14, %v914_v11 }
 0x100   :  { %v603_v16 = vpop.f32.mrb[4].mxu0 }
 0x101   :  { %v604_v18 = vadd.f32 %v3157_v2, %v603_v16  ;;  %v605_v19 = vpop.f32.mrb[5].mxu0  ;;  %2638 = vmatprep.mubr.msk.bf16.mxu1 %vm464_vm0, %v1042_v15  ;;  %v862_v16 = vld [vmem:[%s4447_s1 + $0x60] sm:$0xff] }
 0x102   :  { %v606_v21 = vpop.f32.mrb[6].mxu0 }
 0x103   :  { %v916_v24 = vadd.f32 %v852_v17, %v604_v18  ;;  %v607_v25 = vadd.f32 %v3157_v2, %v606_v21  ;;  %v608_v26 = vpop.f32.mrb[7].mxu0 }
 0x105   :  { %980 = vst.msk [vmem:[%s4448_s8 + $0x10] sm:$0xff] %vm464_vm0, %v916_v24  ;;  %v917_v27 = vadd.f32 %v853_v22, %v607_v25  ;;  %818 = vmatmul.mubr.bf16.gmra.mrb[112].mxu0 %v2865_v20  ;;  %v863_v20 = vld [vmem:[%s4447_s1 + $0x68] sm:$0xff] }
 0x106   :  { %2372 = vmatprep.mubr.msk.bf16.mxu0 %vm464_vm0, %v2867_v23 }
 0x107   :  { %981 = vst.msk [vmem:[%s4448_s8 + $0x18] sm:$0xff] %vm464_vm0, %v917_v27  ;;  %v1043_v28 = vpack.c.bf16 %v917_v27, %v916_v24  ;;  %v864_v27 = vld [vmem:[%s4447_s1 + $0x70] sm:$0xff] }
 0x108   :  { %v611_v29 = vpop.f32.mrb[8].mxu0 }
 0x109   :  { %v612_v31 = vadd.f32 %v3157_v2, %v611_v29  ;;  %v613_v32 = vpop.f32.mrb[9].mxu0  ;;  %2639 = vmatmul.mubr.msk.bf16.vlgmr.msra.gmra.mrb[0].mxu1 %vm464_vm0, %v1043_v28 }
 0x10a   :  { %v614_v34 = vpop.f32.mrb[10].mxu0 }
 0x10b   :  { %v918_v37 = vadd.f32 %v854_v30, %v612_v31  ;;  %v615_v38 = vadd.f32 %v3157_v2, %v614_v34  ;;  %v616_v39 = vpop.f32.mrb[11].mxu0  ;;  %v865_v31 = vld [vmem:[%s4447_s1 + $0x78] sm:$0xff] }
 0x10d   :  { %982 = vst.msk [vmem:[%s4448_s8 + $0x20] sm:$0xff] %vm464_vm0, %v918_v37  ;;  %v919_v40 = vadd.f32 %v855_v35, %v615_v38  ;;  %826 = vmatmul.mubr.bf16.gmra.mrb[116].mxu0 %v2869_v33  ;;  %v866_v38 = vld [vmem:[%s4447_s1 + $0x80] sm:$0xff] }
 0x10e   :  { %2373 = vmatprep.mubr.msk.bf16.mxu0 %vm464_vm0, %v2870_v36 }
 0x10f   :  { %983 = vst.msk [vmem:[%s4448_s8 + $0x28] sm:$0xff] %vm464_vm0, %v919_v40  ;;  %v1044_v41 = vpack.c.bf16 %v919_v40, %v918_v37 }
 0x110   :  { %v619_v42 = vpop.f32.mrb[12].mxu0 }
 0x111   :  { %v620_v44 = vadd.f32 %v3157_v2, %v619_v42  ;;  %v621_v45 = vpop.f32.mrb[13].mxu0  ;;  %2642 = vmatprep.mubr.msk.bf16.mxu1 %vm464_vm0, %v1044_v41  ;;  %v867_v42 = vld [vmem:[%s4447_s1 + $0x88] sm:$0xff] }
 0x112   :  { %v622_v47 = vpop.f32.mrb[14].mxu0 }
 0x113   :  { %v920_v50 = vadd.f32 %v856_v43, %v620_v44  ;;  %v623_v51 = vadd.f32 %v3157_v2, %v622_v47  ;;  %v624_v52 = vpop.f32.mrb[15].mxu0 }
 0x115   :  { %984 = vst.msk [vmem:[%s4448_s8 + $0x30] sm:$0xff] %vm464_vm0, %v920_v50  ;;  %v921_v53 = vadd.f32 %v857_v48, %v623_v51  ;;  %834 = vmatmul.mubr.bf16.gmra.mrb[120].mxu0 %v2872_v46 }
 0x116   :  { %2374 = vmatprep.mubr.msk.bf16.mxu0 %vm464_vm0, %v2873_v49  ;;  %v868_v49 = vld [vmem:[%s4447_s1 + $0x90] sm:$0xff] }
 0x117   :  { %985 = vst.msk [vmem:[%s4448_s8 + $0x38] sm:$0xff] %vm464_vm0, %v921_v53  ;;  %v1045_v54 = vpack.c.bf16 %v921_v53, %v920_v50  ;;  %v869_v53 = vld [vmem:[%s4447_s1 + $0x98] sm:$0xff] }
 0x118   :  { %v627_v55 = vpop.f32.mrb[16].mxu0 }
 0x119   :  { %v628_v57 = vadd.f32 %v3157_v2, %v627_v55  ;;  %v629_v58 = vpop.f32.mrb[17].mxu0  ;;  %2643 = vmatmul.mubr.msk.bf16.gmra.mrb[4].mxu1 %vm464_vm0, %v1045_v54 }
 0x11a   :  { %v630_v60 = vpop.f32.mrb[18].mxu0 }
 0x11b   :  { %v922_v62 = vadd.f32 %v858_v56, %v628_v57  ;;  %v631_v63 = vadd.f32 %v3157_v2, %v630_v60  ;;  %v632_v0 = vpop.f32.mrb[19].mxu0  ;;  %v870_v60 = vld [vmem:[%s4447_s1 + $0xa0] sm:$0xff] }
 0x11c   :  { %v871_v0 = vld [vmem:[%s4447_s1 + $0xa8] sm:$0xff] }
 0x11d   :  { %986 = vst.msk [vmem:[%s4448_s8 + $0x40] sm:$0xff] %vm464_vm0, %v922_v62  ;;  %v923_v1 = vadd.f32 %v859_v61, %v631_v63  ;;  %842 = vmatmul.mubr.bf16.gmra.mrb[124].mxu0 %v2875_v59 }
 0x11f   :  { %987 = vst.msk [vmem:[%s4448_s8 + $0x48] sm:$0xff] %vm464_vm0, %v923_v1  ;;  %v1046_v3 = vpack.c.bf16 %v923_v1, %v922_v62 }
 0x120   :  { %v635_v4 = vpop.f32.mrb[20].mxu0 }
 0x121   :  { %v636_v6 = vadd.f32 %v3157_v2, %v635_v4  ;;  %v637_v7 = vpop.f32.mrb[21].mxu0  ;;  %2646 = vmatprep.mubr.msk.bf16.mxu1 %vm464_vm0, %v1046_v3 }
 0x122   :  { %v638_v8 = vpop.f32.mrb[22].mxu0 }
 0x123   :  { %v924_v10 = vadd.f32 %v860_v5, %v636_v6  ;;  %v639_v11 = vadd.f32 %v3157_v2, %v638_v8  ;;  %v640_v12 = vpop.f32.mrb[23].mxu0  ;;  %v872_v8 = vld [vmem:[%s4447_s1 + $0xb0] sm:$0xff] }
 0x124   :  { %v873_v12 = vld [vmem:[%s4447_s1 + $0xb8] sm:$0xff] }
 0x125   :  { %988 = vst.msk [vmem:[%s4448_s8 + $0x50] sm:$0xff] %vm464_vm0, %v924_v10  ;;  %v925_v13 = vadd.f32 %v861_v9, %v639_v11 }
 0x127   :  { %989 = vst.msk [vmem:[%s4448_s8 + $0x58] sm:$0xff] %vm464_vm0, %v925_v13  ;;  %v1047_v14 = vpack.c.bf16 %v925_v13, %v924_v10 }
 0x128   :  { %v643_v15 = vpop.f32.mrb[24].mxu0 }
 0x129   :  { %v644_v17 = vadd.f32 %v3157_v2, %v643_v15  ;;  %v645_v18 = vpop.f32.mrb[25].mxu0  ;;  %2647 = vmatmul.mubr.msk.bf16.gmra.mrb[8].mxu1 %vm464_vm0, %v1047_v14 }
 0x12a   :  { %v646_v19 = vpop.f32.mrb[26].mxu0 }
 0x12b   :  { %v926_v21 = vadd.f32 %v862_v16, %v644_v17  ;;  %v647_v22 = vadd.f32 %v3157_v2, %v646_v19  ;;  %v648_v23 = vpop.f32.mrb[27].mxu0  ;;  %v874_v19 = vld [vmem:[%s4447_s1 + $0xc0] sm:$0xff] }
 0x12c   :  { %v875_v23 = vld [vmem:[%s4447_s1 + $0xc8] sm:$0xff] }
 0x12d   :  { %990 = vst.msk [vmem:[%s4448_s8 + $0x60] sm:$0xff] %vm464_vm0, %v926_v21  ;;  %v927_v24 = vadd.f32 %v863_v20, %v647_v22 }
 0x12f   :  { %991 = vst.msk [vmem:[%s4448_s8 + $0x68] sm:$0xff] %vm464_vm0, %v927_v24  ;;  %v1048_v25 = vpack.c.bf16 %v927_v24, %v926_v21 }
 0x130   :  { %v651_v26 = vpop.f32.mrb[28].mxu0 }
 0x131   :  { %v652_v28 = vadd.f32 %v3157_v2, %v651_v26  ;;  %v653_v29 = vpop.f32.mrb[29].mxu0  ;;  %2650 = vmatprep.mubr.msk.bf16.mxu1 %vm464_vm0, %v1048_v25 }
 0x132   :  { %v654_v30 = vpop.f32.mrb[30].mxu0 }
 0x133   :  { %v928_v32 = vadd.f32 %v864_v27, %v652_v28  ;;  %v655_v33 = vadd.f32 %v3157_v2, %v654_v30  ;;  %v656_v34 = vpop.f32.mrb[31].mxu0  ;;  %v876_v30 = vld [vmem:[%s4447_s1 + $0xd0] sm:$0xff] }
 0x134   :  { %v877_v34 = vld [vmem:[%s4447_s1 + $0xd8] sm:$0xff] }
 0x135   :  { %992 = vst.msk [vmem:[%s4448_s8 + $0x70] sm:$0xff] %vm464_vm0, %v928_v32  ;;  %v929_v35 = vadd.f32 %v865_v31, %v655_v33 }
 0x137   :  { %993 = vst.msk [vmem:[%s4448_s8 + $0x78] sm:$0xff] %vm464_vm0, %v929_v35  ;;  %v1049_v36 = vpack.c.bf16 %v929_v35, %v928_v32  ;;  %v1795_v35 = vld [vmem:[%s4449_s6] sm:$0x3] }
 0x138   :  { %v659_v37 = vpop.f32.mrb[32].mxu0  ;;  %2768 = vmatprep.subr.msk.bf16.mxu1 %vm1900_vm1, %v1795_v35 }
 0x139   :  { %v660_v39 = vadd.f32 %v3157_v2, %v659_v37  ;;  %v661_v40 = vpop.f32.mrb[33].mxu0  ;;  %2651 = vmatmul.mubr.msk.bf16.gmra.mrb[12].mxu1 %vm464_vm0, %v1049_v36 }
 0x13a   :  { %v662_v41 = vpop.f32.mrb[34].mxu0 }
 0x13b   :  { %v930_v43 = vadd.f32 %v866_v38, %v660_v39  ;;  %v663_v44 = vadd.f32 %v3157_v2, %v662_v41  ;;  %v664_v45 = vpop.f32.mrb[35].mxu0  ;;  %v1902_v39 = vsel %vm1900_vm1, %v1795_v35, 0  ;;  %v888_v35 = vld [vmem:[%s4447_s1 + $0x130] sm:$0xff] }
 0x13c   :  { %2703 = vmatpush3.bf16.msra.mxu1 %v1902_v39  ;;  %v889_v39 = vld [vmem:[%s4447_s1 + $0x138] sm:$0xff] }
 0x13d   :  { %994 = vst.msk [vmem:[%s4448_s8 + $0x80] sm:$0xff] %vm464_vm0, %v930_v43  ;;  %v931_v46 = vadd.f32 %v867_v42, %v663_v44 }
 0x13f   :  { %995 = vst.msk [vmem:[%s4448_s8 + $0x88] sm:$0xff] %vm464_vm0, %v931_v46  ;;  %v1050_v47 = vpack.c.bf16 %v931_v46, %v930_v43  ;;  %v878_v43 = vld [vmem:[%s4447_s1 + $0xe0] sm:$0xff] }
 0x140   :  { %v667_v48 = vpop.f32.mrb[36].mxu0 }
 0x141   :  { %v668_v50 = vadd.f32 %v3157_v2, %v667_v48  ;;  %v669_v51 = vpop.f32.mrb[37].mxu0  ;;  %2654 = vmatprep.mubr.msk.bf16.mxu1 %vm464_vm0, %v1050_v47  ;;  %v879_v47 = vld [vmem:[%s4447_s1 + $0xe8] sm:$0xff] }
 0x142   :  { %v670_v52 = vpop.f32.mrb[38].mxu0 }
 0x143   :  { %v932_v54 = vadd.f32 %v868_v49, %v668_v50  ;;  %v671_v55 = vadd.f32 %v3157_v2, %v670_v52  ;;  %v672_v56 = vpop.f32.mrb[39].mxu0 }
 0x145   :  { %996 = vst.msk [vmem:[%s4448_s8 + $0x90] sm:$0xff] %vm464_vm0, %v932_v54  ;;  %v933_v57 = vadd.f32 %v869_v53, %v671_v55 }
 0x147   :  { %997 = vst.msk [vmem:[%s4448_s8 + $0x98] sm:$0xff] %vm464_vm0, %v933_v57  ;;  %v1051_v58 = vpack.c.bf16 %v933_v57, %v932_v54  ;;  %v880_v54 = vld [vmem:[%s4447_s1 + $0xf0] sm:$0xff] }
 0x148   :  { %v675_v59 = vpop.f32.mrb[40].mxu0 }
 0x149   :  { %v676_v61 = vadd.f32 %v3157_v2, %v675_v59  ;;  %v677_v62 = vpop.f32.mrb[41].mxu0  ;;  %2655 = vmatmul.mubr.msk.bf16.gmra.mrb[16].mxu1 %vm464_vm0, %v1051_v58  ;;  %v881_v58 = vld [vmem:[%s4447_s1 + $0xf8] sm:$0xff] }
 0x14a   :  { %v678_v63 = vpop.f32.mrb[42].mxu0 }
 0x14b   :  { %v934_v1 = vadd.f32 %v870_v60, %v676_v61  ;;  %v679_v3 = vadd.f32 %v3157_v2, %v678_v63  ;;  %v680_v4 = vpop.f32.mrb[43].mxu0 }
 0x14d   :  { %998 = vst.msk [vmem:[%s4448_s8 + $0xa0] sm:$0xff] %vm464_vm0, %v934_v1  ;;  %v935_v5 = vadd.f32 %v871_v0, %v679_v3 }
 0x14f   :  { %999 = vst.msk [vmem:[%s4448_s8 + $0xa8] sm:$0xff] %vm464_vm0, %v935_v5  ;;  %v1052_v6 = vpack.c.bf16 %v935_v5, %v934_v1  ;;  %v882_v1 = vld [vmem:[%s4447_s1 + $0x100] sm:$0xff] }
 0x150   :  { %v683_v7 = vpop.f32.mrb[44].mxu0 }
 0x151   :  { %v684_v9 = vadd.f32 %v3157_v2, %v683_v7  ;;  %v685_v10 = vpop.f32.mrb[45].mxu0  ;;  %2658 = vmatprep.mubr.msk.bf16.mxu1 %vm464_vm0, %v1052_v6  ;;  %v883_v6 = vld [vmem:[%s4447_s1 + $0x108] sm:$0xff] }
 0x152   :  { %v686_v11 = vpop.f32.mrb[46].mxu0 }
 0x153   :  { %v936_v13 = vadd.f32 %v872_v8, %v684_v9  ;;  %v687_v14 = vadd.f32 %v3157_v2, %v686_v11  ;;  %v688_v15 = vpop.f32.mrb[47].mxu0 }
 0x155   :  { %1000 = vst.msk [vmem:[%s4448_s8 + $0xb0] sm:$0xff] %vm464_vm0, %v936_v13  ;;  %v937_v16 = vadd.f32 %v873_v12, %v687_v14 }
 0x157   :  { %1001 = vst.msk [vmem:[%s4448_s8 + $0xb8] sm:$0xff] %vm464_vm0, %v937_v16  ;;  %v1053_v17 = vpack.c.bf16 %v937_v16, %v936_v13  ;;  %v884_v13 = vld [vmem:[%s4447_s1 + $0x110] sm:$0xff] }
 0x158   :  { %v691_v18 = vpop.f32.mrb[48].mxu0 }
 0x159   :  { %v692_v20 = vadd.f32 %v3157_v2, %v691_v18  ;;  %v693_v21 = vpop.f32.mrb[49].mxu0  ;;  %2659 = vmatmul.mubr.msk.bf16.gmra.mrb[20].mxu1 %vm464_vm0, %v1053_v17  ;;  %v885_v17 = vld [vmem:[%s4447_s1 + $0x118] sm:$0xff] }
 0x15a   :  { %v694_v22 = vpop.f32.mrb[50].mxu0 }
 0x15b   :  { %v938_v24 = vadd.f32 %v874_v19, %v692_v20  ;;  %v695_v25 = vadd.f32 %v3157_v2, %v694_v22  ;;  %v696_v26 = vpop.f32.mrb[51].mxu0 }
 0x15d   :  { %1002 = vst.msk [vmem:[%s4448_s8 + $0xc0] sm:$0xff] %vm464_vm0, %v938_v24  ;;  %v939_v27 = vadd.f32 %v875_v23, %v695_v25 }
 0x15f   :  { %1003 = vst.msk [vmem:[%s4448_s8 + $0xc8] sm:$0xff] %vm464_vm0, %v939_v27  ;;  %v1054_v28 = vpack.c.bf16 %v939_v27, %v938_v24  ;;  %v886_v24 = vld [vmem:[%s4447_s1 + $0x120] sm:$0xff] }
 0x160   :  { %v699_v29 = vpop.f32.mrb[52].mxu0 }
 0x161   :  { %v700_v31 = vadd.f32 %v3157_v2, %v699_v29  ;;  %v701_v32 = vpop.f32.mrb[53].mxu0  ;;  %2662 = vmatprep.mubr.msk.bf16.mxu1 %vm464_vm0, %v1054_v28  ;;  %v887_v28 = vld [vmem:[%s4447_s1 + $0x128] sm:$0xff] }
 0x162   :  { %v702_v33 = vpop.f32.mrb[54].mxu0 }
 0x163   :  { %v940_v36 = vadd.f32 %v876_v30, %v700_v31  ;;  %v703_v37 = vadd.f32 %v3157_v2, %v702_v33  ;;  %v704_v38 = vpop.f32.mrb[55].mxu0 }
 0x165   :  { %1004 = vst.msk [vmem:[%s4448_s8 + $0xd0] sm:$0xff] %vm464_vm0, %v940_v36  ;;  %v941_v40 = vadd.f32 %v877_v34, %v703_v37 }
 0x167   :  { %1005 = vst.msk [vmem:[%s4448_s8 + $0xd8] sm:$0xff] %vm464_vm0, %v941_v40  ;;  %v1055_v41 = vpack.c.bf16 %v941_v40, %v940_v36 }
 0x168   :  { %v707_v42 = vpop.f32.mrb[56].mxu0 }
 0x169   :  { %v708_v44 = vadd.f32 %v3157_v2, %v707_v42  ;;  %v709_v45 = vpop.f32.mrb[57].mxu0  ;;  %2663 = vmatmul.mubr.msk.bf16.gmra.mrb[24].mxu1 %vm464_vm0, %v1055_v41 }
 0x16a   :  { %v710_v46 = vpop.f32.mrb[58].mxu0 }
 0x16b   :  { %v942_v48 = vadd.f32 %v878_v43, %v708_v44  ;;  %v711_v49 = vadd.f32 %v3157_v2, %v710_v46  ;;  %v712_v50 = vpop.f32.mrb[59].mxu0  ;;  %v890_v46 = vld [vmem:[%s4447_s1 + $0x140] sm:$0xff] }
 0x16c   :  { %v891_v50 = vld [vmem:[%s4447_s1 + $0x148] sm:$0xff] }
 0x16d   :  { %1006 = vst.msk [vmem:[%s4448_s8 + $0xe0] sm:$0xff] %vm464_vm0, %v942_v48  ;;  %v943_v51 = vadd.f32 %v879_v47, %v711_v49 }
 0x16f   :  { %1007 = vst.msk [vmem:[%s4448_s8 + $0xe8] sm:$0xff] %vm464_vm0, %v943_v51  ;;  %v1056_v52 = vpack.c.bf16 %v943_v51, %v942_v48 }
 0x170   :  { %v715_v53 = vpop.f32.mrb[60].mxu0 }
 0x171   :  { %v716_v55 = vadd.f32 %v3157_v2, %v715_v53  ;;  %v717_v56 = vpop.f32.mrb[61].mxu0  ;;  %2666 = vmatprep.mubr.msk.bf16.mxu1 %vm464_vm0, %v1056_v52 }
 0x172   :  { %v718_v57 = vpop.f32.mrb[62].mxu0 }
 0x173   :  { %v944_v59 = vadd.f32 %v880_v54, %v716_v55  ;;  %v719_v60 = vadd.f32 %v3157_v2, %v718_v57  ;;  %v720_v61 = vpop.f32.mrb[63].mxu0  ;;  %v892_v57 = vld [vmem:[%s4447_s1 + $0x150] sm:$0xff] }
 0x174   :  { %v893_v61 = vld [vmem:[%s4447_s1 + $0x158] sm:$0xff] }
 0x175   :  { %1008 = vst.msk [vmem:[%s4448_s8 + $0xf0] sm:$0xff] %vm464_vm0, %v944_v59  ;;  %v945_v62 = vadd.f32 %v881_v58, %v719_v60 }
 0x177   :  { %1009 = vst.msk [vmem:[%s4448_s8 + $0xf8] sm:$0xff] %vm464_vm0, %v945_v62  ;;  %v1057_v63 = vpack.c.bf16 %v945_v62, %v944_v59 }
 0x178   :  { %v723_v0 = vpop.f32.mrb[64].mxu0 }
 0x179   :  { %v724_v3 = vadd.f32 %v3157_v2, %v723_v0  ;;  %v725_v4 = vpop.f32.mrb[65].mxu0  ;;  %2667 = vmatmul.mubr.msk.bf16.gmra.mrb[28].mxu1 %vm464_vm0, %v1057_v63 }
 0x17a   :  { %v726_v5 = vpop.f32.mrb[66].mxu0 }
 0x17b   :  { %v946_v7 = vadd.f32 %v882_v1, %v724_v3  ;;  %v727_v8 = vadd.f32 %v3157_v2, %v726_v5  ;;  %v728_v9 = vpop.f32.mrb[67].mxu0  ;;  %v894_v5 = vld [vmem:[%s4447_s1 + $0x160] sm:$0xff] }
 0x17c   :  { %v895_v9 = vld [vmem:[%s4447_s1 + $0x168] sm:$0xff] }
 0x17d   :  { %1010 = vst.msk [vmem:[%s4448_s8 + $0x100] sm:$0xff] %vm464_vm0, %v946_v7  ;;  %v947_v10 = vadd.f32 %v883_v6, %v727_v8 }
 0x17f   :  { %1011 = vst.msk [vmem:[%s4448_s8 + $0x108] sm:$0xff] %vm464_vm0, %v947_v10  ;;  %v1058_v11 = vpack.c.bf16 %v947_v10, %v946_v7 }
 0x180   :  { %v731_v12 = vpop.f32.mrb[68].mxu0 }
 0x181   :  { %v732_v14 = vadd.f32 %v3157_v2, %v731_v12  ;;  %v733_v15 = vpop.f32.mrb[69].mxu0  ;;  %2670 = vmatprep.mubr.msk.bf16.mxu1 %vm464_vm0, %v1058_v11 }
 0x182   :  { %v734_v16 = vpop.f32.mrb[70].mxu0 }
 0x183   :  { %v948_v18 = vadd.f32 %v884_v13, %v732_v14  ;;  %v735_v19 = vadd.f32 %v3157_v2, %v734_v16  ;;  %v736_v20 = vpop.f32.mrb[71].mxu0  ;;  %v896_v16 = vld [vmem:[%s4447_s1 + $0x170] sm:$0xff] }
 0x184   :  { %v897_v20 = vld [vmem:[%s4447_s1 + $0x178] sm:$0xff] }
 0x185   :  { %1012 = vst.msk [vmem:[%s4448_s8 + $0x110] sm:$0xff] %vm464_vm0, %v948_v18  ;;  %v949_v21 = vadd.f32 %v885_v17, %v735_v19 }
 0x187   :  { %1013 = vst.msk [vmem:[%s4448_s8 + $0x118] sm:$0xff] %vm464_vm0, %v949_v21  ;;  %v1059_v22 = vpack.c.bf16 %v949_v21, %v948_v18 }
 0x188   :  { %v739_v23 = vpop.f32.mrb[72].mxu0 }
 0x189   :  { %v740_v25 = vadd.f32 %v3157_v2, %v739_v23  ;;  %v741_v26 = vpop.f32.mrb[73].mxu0  ;;  %2671 = vmatmul.mubr.msk.bf16.gmra.mrb[32].mxu1 %vm464_vm0, %v1059_v22 }
 0x18a   :  { %v742_v27 = vpop.f32.mrb[74].mxu0 }
 0x18b   :  { %v950_v29 = vadd.f32 %v886_v24, %v740_v25  ;;  %v743_v30 = vadd.f32 %v3157_v2, %v742_v27  ;;  %v744_v31 = vpop.f32.mrb[75].mxu0  ;;  %v898_v27 = vld [vmem:[%s4447_s1 + $0x180] sm:$0xff] }
 0x18c   :  { %v899_v31 = vld [vmem:[%s4447_s1 + $0x188] sm:$0xff] }
 0x18d   :  { %1014 = vst.msk [vmem:[%s4448_s8 + $0x120] sm:$0xff] %vm464_vm0, %v950_v29  ;;  %v951_v32 = vadd.f32 %v887_v28, %v743_v30 }
 0x18f   :  { %1015 = vst.msk [vmem:[%s4448_s8 + $0x128] sm:$0xff] %vm464_vm0, %v951_v32  ;;  %v1060_v33 = vpack.c.bf16 %v951_v32, %v950_v29 }
 0x190   :  { %v747_v34 = vpop.f32.mrb[76].mxu0 }
 0x191   :  { %v748_v36 = vadd.f32 %v3157_v2, %v747_v34  ;;  %v749_v37 = vpop.f32.mrb[77].mxu0  ;;  %2674 = vmatprep.mubr.msk.bf16.mxu1 %vm464_vm0, %v1060_v33 }
 0x192   :  { %v750_v38 = vpop.f32.mrb[78].mxu0 }
 0x193   :  { %v952_v40 = vadd.f32 %v888_v35, %v748_v36  ;;  %v751_v41 = vadd.f32 %v3157_v2, %v750_v38  ;;  %v752_v42 = vpop.f32.mrb[79].mxu0  ;;  %v900_v38 = vld [vmem:[%s4447_s1 + $0x190] sm:$0xff] }
 0x194   :  { %v901_v42 = vld [vmem:[%s4447_s1 + $0x198] sm:$0xff] }
 0x195   :  { %1016 = vst.msk [vmem:[%s4448_s8 + $0x130] sm:$0xff] %vm464_vm0, %v952_v40  ;;  %v953_v43 = vadd.f32 %v889_v39, %v751_v41 }
 0x197   :  { %1017 = vst.msk [vmem:[%s4448_s8 + $0x138] sm:$0xff] %vm464_vm0, %v953_v43  ;;  %v1061_v44 = vpack.c.bf16 %v953_v43, %v952_v40 }
 0x198   :  { %v755_v45 = vpop.f32.mrb[80].mxu0 }
 0x199   :  { %v756_v47 = vadd.f32 %v3157_v2, %v755_v45  ;;  %v757_v48 = vpop.f32.mrb[81].mxu0  ;;  %2675 = vmatmul.mubr.msk.bf16.gmra.mrb[36].mxu1 %vm464_vm0, %v1061_v44 }
 0x19a   :  { %v758_v49 = vpop.f32.mrb[82].mxu0 }
 0x19b   :  { %v954_v51 = vadd.f32 %v890_v46, %v756_v47  ;;  %v759_v52 = vadd.f32 %v3157_v2, %v758_v49  ;;  %v760_v53 = vpop.f32.mrb[83].mxu0  ;;  %v902_v49 = vld [vmem:[%s4447_s1 + $0x1a0] sm:$0xff] }
 0x19c   :  { %v903_v53 = vld [vmem:[%s4447_s1 + $0x1a8] sm:$0xff] }
 0x19d   :  { %1018 = vst.msk [vmem:[%s4448_s8 + $0x140] sm:$0xff] %vm464_vm0, %v954_v51  ;;  %v955_v54 = vadd.f32 %v891_v50, %v759_v52 }
 0x19f   :  { %1019 = vst.msk [vmem:[%s4448_s8 + $0x148] sm:$0xff] %vm464_vm0, %v955_v54  ;;  %v1062_v55 = vpack.c.bf16 %v955_v54, %v954_v51 }
 0x1a0   :  { %v763_v56 = vpop.f32.mrb[84].mxu0 }
 0x1a1   :  { %v764_v58 = vadd.f32 %v3157_v2, %v763_v56  ;;  %v765_v59 = vpop.f32.mrb[85].mxu0  ;;  %2678 = vmatprep.mubr.msk.bf16.mxu1 %vm464_vm0, %v1062_v55 }
 0x1a2   :  { %v766_v60 = vpop.f32.mrb[86].mxu0 }
 0x1a3   :  { %v956_v62 = vadd.f32 %v892_v57, %v764_v58  ;;  %v767_v63 = vadd.f32 %v3157_v2, %v766_v60  ;;  %v768_v0 = vpop.f32.mrb[87].mxu0  ;;  %v904_v60 = vld [vmem:[%s4447_s1 + $0x1b0] sm:$0xff] }
 0x1a4   :  { %v905_v0 = vld [vmem:[%s4447_s1 + $0x1b8] sm:$0xff] }
 0x1a5   :  { %1020 = vst.msk [vmem:[%s4448_s8 + $0x150] sm:$0xff] %vm464_vm0, %v956_v62  ;;  %v957_v1 = vadd.f32 %v893_v61, %v767_v63 }
 0x1a7   :  { %1021 = vst.msk [vmem:[%s4448_s8 + $0x158] sm:$0xff] %vm464_vm0, %v957_v1  ;;  %v1063_v3 = vpack.c.bf16 %v957_v1, %v956_v62 }
 0x1a8   :  { %v771_v4 = vpop.f32.mrb[88].mxu0 }
 0x1a9   :  { %v772_v6 = vadd.f32 %v3157_v2, %v771_v4  ;;  %v773_v7 = vpop.f32.mrb[89].mxu0  ;;  %2679 = vmatmul.mubr.msk.bf16.gmra.mrb[40].mxu1 %vm464_vm0, %v1063_v3 }
 0x1aa   :  { %v774_v8 = vpop.f32.mrb[90].mxu0 }
 0x1ab   :  { %v958_v10 = vadd.f32 %v894_v5, %v772_v6  ;;  %v775_v11 = vadd.f32 %v3157_v2, %v774_v8  ;;  %v776_v12 = vpop.f32.mrb[91].mxu0  ;;  %v906_v8 = vld [vmem:[%s4447_s1 + $0x1c0] sm:$0xff] }
 0x1ac   :  { %v907_v12 = vld [vmem:[%s4447_s1 + $0x1c8] sm:$0xff] }
 0x1ad   :  { %1022 = vst.msk [vmem:[%s4448_s8 + $0x160] sm:$0xff] %vm464_vm0, %v958_v10  ;;  %v959_v13 = vadd.f32 %v895_v9, %v775_v11 }
 0x1af   :  { %1023 = vst.msk [vmem:[%s4448_s8 + $0x168] sm:$0xff] %vm464_vm0, %v959_v13  ;;  %v1064_v14 = vpack.c.bf16 %v959_v13, %v958_v10  ;;  %v3680_v13 = vld [vmem:[%s4450_s5] ss:$0 sm:$0xff] }
 0x1b0   :  { %v779_v15 = vpop.f32.mrb[92].mxu0 }
 0x1b1   :  { %v780_v17 = vadd.f32 %v3157_v2, %v779_v15  ;;  %v781_v18 = vpop.f32.mrb[93].mxu0  ;;  %2682 = vmatprep.mubr.msk.bf16.mxu1 %vm464_vm0, %v1064_v14 }
 0x1b2   :  { %v782_v19 = vpop.f32.mrb[94].mxu0 }
 0x1b3   :  { %v960_v21 = vadd.f32 %v896_v16, %v780_v17  ;;  %v783_v22 = vadd.f32 %v3157_v2, %v782_v19  ;;  %v784_v23 = vpop.f32.mrb[95].mxu0 }
 0x1b5   :  { %1024 = vst.msk [vmem:[%s4448_s8 + $0x170] sm:$0xff] %vm464_vm0, %v960_v21  ;;  %v961_v24 = vadd.f32 %v897_v20, %v783_v22 }
 0x1b7   :  { %1025 = vst.msk [vmem:[%s4448_s8 + $0x178] sm:$0xff] %vm464_vm0, %v961_v24  ;;  %v1065_v25 = vpack.c.bf16 %v961_v24, %v960_v21 }
 0x1b8   :  { %v787_v26 = vpop.f32.mrb[96].mxu0 }
 0x1b9   :  { %v788_v28 = vadd.f32 %v3157_v2, %v787_v26  ;;  %v789_v29 = vpop.f32.mrb[97].mxu0  ;;  %2683 = vmatmul.mubr.msk.bf16.gmra.mrb[44].mxu1 %vm464_vm0, %v1065_v25 }
 0x1ba   :  { %v790_v30 = vpop.f32.mrb[98].mxu0 }
 0x1bb   :  { %v962_v32 = vadd.f32 %v898_v27, %v788_v28  ;;  %v791_v33 = vadd.f32 %v3157_v2, %v790_v30  ;;  %v792_v34 = vpop.f32.mrb[99].mxu0  ;;  %v908_v30 = vld [vmem:[%s4447_s1 + $0x1d0] sm:$0xff] }
 0x1bd   :  { %1026 = vst.msk [vmem:[%s4448_s8 + $0x180] sm:$0xff] %vm464_vm0, %v962_v32  ;;  %v963_v35 = vadd.f32 %v899_v31, %v791_v33 }
 0x1bf   :  { %1027 = vst.msk [vmem:[%s4448_s8 + $0x188] sm:$0xff] %vm464_vm0, %v963_v35  ;;  %v1066_v36 = vpack.c.bf16 %v963_v35, %v962_v32 }
 0x1c0   :  { %v795_v37 = vpop.f32.mrb[100].mxu0 }
 0x1c1   :  { %v796_v39 = vadd.f32 %v3157_v2, %v795_v37  ;;  %v797_v40 = vpop.f32.mrb[101].mxu0  ;;  %2686 = vmatprep.mubr.msk.bf16.mxu1 %vm464_vm0, %v1066_v36 }
 0x1c2   :  { %v798_v41 = vpop.f32.mrb[102].mxu0 }
 0x1c3   :  { %v964_v43 = vadd.f32 %v900_v38, %v796_v39  ;;  %v799_v44 = vadd.f32 %v3157_v2, %v798_v41  ;;  %v800_v45 = vpop.f32.mrb[103].mxu0  ;;  %v909_v38 = vld [vmem:[%s4447_s1 + $0x1d8] sm:$0xff] }
 0x1c4   :  { %v910_v45 = vld [vmem:[%s4447_s1 + $0x1e0] sm:$0xff] }
 0x1c5   :  { %1028 = vst.msk [vmem:[%s4448_s8 + $0x190] sm:$0xff] %vm464_vm0, %v964_v43  ;;  %v965_v46 = vadd.f32 %v901_v42, %v799_v44 }
 0x1c7   :  { %1029 = vst.msk [vmem:[%s4448_s8 + $0x198] sm:$0xff] %vm464_vm0, %v965_v46  ;;  %v1067_v47 = vpack.c.bf16 %v965_v46, %v964_v43 }
 0x1c8   :  { %v803_v48 = vpop.f32.mrb[104].mxu0 }
 0x1c9   :  { %v804_v50 = vadd.f32 %v3157_v2, %v803_v48  ;;  %v805_v51 = vpop.f32.mrb[105].mxu0  ;;  %2687 = vmatmul.mubr.msk.bf16.gmra.mrb[48].mxu1 %vm464_vm0, %v1067_v47 }
 0x1ca   :  { %v806_v52 = vpop.f32.mrb[106].mxu0 }
 0x1cb   :  { %v966_v54 = vadd.f32 %v902_v49, %v804_v50  ;;  %v807_v55 = vadd.f32 %v3157_v2, %v806_v52  ;;  %v808_v56 = vpop.f32.mrb[107].mxu0  ;;  %v911_v49 = vld [vmem:[%s4447_s1 + $0x1e8] sm:$0xff] }
 0x1cd   :  { %1030 = vst.msk [vmem:[%s4448_s8 + $0x1a0] sm:$0xff] %vm464_vm0, %v966_v54  ;;  %v967_v57 = vadd.f32 %v903_v53, %v807_v55 }
 0x1cf   :  { %1031 = vst.msk [vmem:[%s4448_s8 + $0x1a8] sm:$0xff] %vm464_vm0, %v967_v57  ;;  %v1068_v58 = vpack.c.bf16 %v967_v57, %v966_v54 }
 0x1d0   :  { %v811_v59 = vpop.f32.mrb[108].mxu0 }
 0x1d1   :  { %v812_v61 = vadd.f32 %v3157_v2, %v811_v59  ;;  %v813_v62 = vpop.f32.mrb[109].mxu0  ;;  %2690 = vmatprep.mubr.msk.bf16.mxu1 %vm464_vm0, %v1068_v58 }
 0x1d2   :  { %v814_v63 = vpop.f32.mrb[110].mxu0 }
 0x1d3   :  { %v968_v1 = vadd.f32 %v904_v60, %v812_v61  ;;  %v815_v3 = vadd.f32 %v3157_v2, %v814_v63  ;;  %v816_v4 = vpop.f32.mrb[111].mxu0 }
 0x1d5   :  { %1032 = vst.msk [vmem:[%s4448_s8 + $0x1b0] sm:$0xff] %vm464_vm0, %v968_v1  ;;  %v969_v5 = vadd.f32 %v905_v0, %v815_v3  ;;  %v912_v3 = vld [vmem:[%s4447_s1 + $0x1f0] sm:$0xff] }
 0x1d7   :  { %1033 = vst.msk [vmem:[%s4448_s8 + $0x1b8] sm:$0xff] %vm464_vm0, %v969_v5  ;;  %v1069_v6 = vpack.c.bf16 %v969_v5, %v968_v1 }
 0x1d8   :  { %v819_v7 = vpop.f32.mrb[112].mxu0 }
 0x1d9   :  { %v820_v9 = vadd.f32 %v3157_v2, %v819_v7  ;;  %v821_v10 = vpop.f32.mrb[113].mxu0  ;;  %2691 = vmatmul.mubr.msk.bf16.gmra.mrb[52].mxu1 %vm464_vm0, %v1069_v6 }
 0x1da   :  { %v822_v11 = vpop.f32.mrb[114].mxu0 }
 0x1db   :  { %v970_v14 = vadd.f32 %v906_v8, %v820_v9  ;;  %v823_v15 = vadd.f32 %v3157_v2, %v822_v11  ;;  %v824_v16 = vpop.f32.mrb[115].mxu0  ;;  %v913_v11 = vld [vmem:[%s4447_s1 + $0x1f8] sm:$0xff] }
 0x1dc   :  { %v2640_v17 = vpop.f32.mrb[0].mxu1 }
 0x1dd   :  { %1034 = vst.msk [vmem:[%s4448_s8 + $0x1c0] sm:$0xff] %vm464_vm0, %v970_v14  ;;  %v971_v18 = vadd.f32 %v907_v12, %v823_v15  ;;  %v3688_v19 = vadd.f32 %v2640_v17, %v3680_v13  ;;  %v1219_v20 = vpop.f32.mrb[1].mxu1 }
 0x1de   :  { %v3691_v21 = vadd.f32 %v3680_v13, %v1219_v20  ;;  %v2641_v22 = vpop.f32.mrb[2].mxu1 }
 0x1df   :  { %1035 = vst.msk [vmem:[%s4448_s8 + $0x1c8] sm:$0xff] %vm464_vm0, %v971_v18  ;;  %v1070_v23 = vpack.c.bf16 %v971_v18, %v970_v14  ;;  %v2508_v24 = vpack.c.bf16 %v3688_v19, %v3688_v19  ;;  %v3700_v25 = vadd.f32 %v2641_v22, %v3680_v13  ;;  %v1222_v26 = vpop.f32.mrb[3].mxu1 }
 0x1e0   :  { %v2506_v27 = vpack.c.bf16 %v3691_v21, %v3691_v21  ;;  %v3705_v28 = vadd.f32 %v3680_v13, %v1222_v26  ;;  %v827_v29 = vpop.f32.mrb[116].mxu0 }
 0x1e1   :  { %1733 = vst.msk [vmem:[%s4451_s9 + $0x8] sm:$0xf] %vm1730_vm2, %v2508_v24  ;;  %v1475_v31 = vpack.c.bf16 %v3700_v25, %v3688_v19  ;;  %v2509_v32 = vpack.c.bf16 %v3700_v25, %v3700_v25  ;;  %v828_v33 = vadd.f32 %v3157_v2, %v827_v29  ;;  %v829_v34 = vpop.f32.mrb[117].mxu0  ;;  %2694 = vmatprep.mubr.msk.bf16.mxu1 %vm464_vm0, %v1070_v23 }
 0x1e2   :  { %1731 = vst.msk [vmem:[%s4451_s9] sm:$0xf] %vm1730_vm2, %v2506_v27  ;;  %v1474_v35 = vpack.c.bf16 %v3705_v28, %v3691_v21  ;;  %v2507_v36 = vpack.c.bf16 %v3705_v28, %v3705_v28  ;;  %v830_v37 = vpop.f32.mrb[118].mxu0 }
 0x1e3   :  { %1734 = vst.msk [vmem:[%s4451_s9 + $0xc] sm:$0xf] %vm1730_vm2, %v2509_v32  ;;  %v972_v39 = vadd.f32 %v908_v30, %v828_v33  ;;  %v831_v40 = vadd.f32 %v3157_v2, %v830_v37  ;;  %v832_v41 = vpop.f32.mrb[119].mxu0 }
 0x1e4   :  { %1732 = vst.msk [vmem:[%s4451_s9 + $0x4] sm:$0xf] %vm1730_vm2, %v2507_v36 }
 0x1e5   :  { %1036 = vst.msk [vmem:[%s4448_s8 + $0x1d0] sm:$0xff] %vm464_vm0, %v972_v39  ;;  %v973_v42 = vadd.f32 %v909_v38, %v831_v40 }
 0x1e7   :  { %1037 = vst.msk [vmem:[%s4448_s8 + $0x1d8] sm:$0xff] %vm464_vm0, %v973_v42  ;;  %v1071_v43 = vpack.c.bf16 %v973_v42, %v972_v39 }
 0x1e8   :  { %v835_v44 = vpop.f32.mrb[120].mxu0 }
 0x1e9   :  { %v836_v46 = vadd.f32 %v3157_v2, %v835_v44  ;;  %v837_v47 = vpop.f32.mrb[121].mxu0  ;;  %2695 = vmatmul.mubr.msk.bf16.gmra.mrb[56].mxu1 %vm464_vm0, %v1071_v43 }
 0x1ea   :  { %v838_v48 = vpop.f32.mrb[122].mxu0 }
 0x1eb   :  { %v974_v50 = vadd.f32 %v910_v45, %v836_v46  ;;  %v839_v51 = vadd.f32 %v3157_v2, %v838_v48  ;;  %v840_v52 = vpop.f32.mrb[123].mxu0 }
 0x1ec   :  { %v2644_v53 = vpop.f32.mrb[4].mxu1 }
 0x1ed   :  { %1038 = vst.msk [vmem:[%s4448_s8 + $0x1e0] sm:$0xff] %vm464_vm0, %v974_v50  ;;  %v975_v54 = vadd.f32 %v911_v49, %v839_v51  ;;  %v1244_v55 = vadd.f32 %v2644_v53, %v3680_v13  ;;  %v1235_v56 = vpop.f32.mrb[5].mxu1 }
 0x1ee   :  { %v1236_v57 = vadd.f32 %v3680_v13, %v1235_v56  ;;  %v2645_v58 = vpop.f32.mrb[6].mxu1 }
 0x1ef   :  { %1039 = vst.msk [vmem:[%s4448_s8 + $0x1e8] sm:$0xff] %vm464_vm0, %v975_v54  ;;  %v1072_v59 = vpack.c.bf16 %v975_v54, %v974_v50  ;;  %v2512_v60 = vpack.c.bf16 %v1244_v55, %v1244_v55  ;;  %v1247_v61 = vadd.f32 %v2645_v58, %v3680_v13  ;;  %v1238_v62 = vpop.f32.mrb[7].mxu1 }
 0x1f0   :  { %v2510_v63 = vpack.c.bf16 %v1236_v57, %v1236_v57  ;;  %v1239_v0 = vadd.f32 %v3680_v13, %v1238_v62  ;;  %v843_v1 = vpop.f32.mrb[124].mxu0 }
 0x1f1   :  { %1737 = vst.msk [vmem:[%s4451_s9 + $0x18] sm:$0xf] %vm1730_vm2, %v2512_v60  ;;  %v1477_v4 = vpack.c.bf16 %v1247_v61, %v1244_v55  ;;  %v2513_v5 = vpack.c.bf16 %v1247_v61, %v1247_v61  ;;  %v844_v6 = vadd.f32 %v3157_v2, %v843_v1  ;;  %v845_v7 = vpop.f32.mrb[125].mxu0  ;;  %2698 = vmatprep.mubr.msk.bf16.mxu1 %vm464_vm0, %v1072_v59 }
 0x1f2   :  { %1735 = vst.msk [vmem:[%s4451_s9 + $0x10] sm:$0xf] %vm1730_vm2, %v2510_v63  ;;  %v1476_v8 = vpack.c.bf16 %v1239_v0, %v1236_v57  ;;  %v2511_v9 = vpack.c.bf16 %v1239_v0, %v1239_v0  ;;  %v846_v10 = vpop.f32.mrb[126].mxu0 }
 0x1f3   :  { %1738 = vst.msk [vmem:[%s4451_s9 + $0x1c] sm:$0xf] %vm1730_vm2, %v2513_v5  ;;  %v976_v12 = vadd.f32 %v912_v3, %v844_v6  ;;  %v847_v14 = vadd.f32 %v3157_v2, %v846_v10  ;;  %v848_v15 = vpop.f32.mrb[127].mxu0 }
 0x1f4   :  { %1736 = vst.msk [vmem:[%s4451_s9 + $0x14] sm:$0xf] %vm1730_vm2, %v2511_v9 }
 0x1f5   :  { %1040 = vst.msk [vmem:[%s4448_s8 + $0x1f0] sm:$0xff] %vm464_vm0, %v976_v12  ;;  %v977_v16 = vadd.f32 %v913_v11, %v847_v14 }
 0x1f7   :  { %1041 = vst.msk [vmem:[%s4448_s8 + $0x1f8] sm:$0xff] %vm464_vm0, %v977_v16  ;;  %v1073_v17 = vpack.c.bf16 %v977_v16, %v976_v12 }
 0x1f9   :  { %2699 = vmatmul.mubr.msk.bf16.gmra.mrb[60].mxu1 %vm464_vm0, %v1073_v17 }
 0x1fa   :  { %2704 = vmatprep.mubr.msk.bf16.mxu1 %vm1803_vm3, %v1474_v35 }
 0x1fc   :  { %v2648_v2 = vpop.f32.mrb[8].mxu1 }
 0x1fd   :  { %v1260_v18 = vadd.f32 %v2648_v2, %v3680_v13  ;;  %v1251_v20 = vpop.f32.mrb[9].mxu1 }
 0x1fe   :  { %v1252_v21 = vadd.f32 %v3680_v13, %v1251_v20  ;;  %v2649_v22 = vpop.f32.mrb[10].mxu1 }
 0x1ff   :  { %v2516_v23 = vpack.c.bf16 %v1260_v18, %v1260_v18  ;;  %v1263_v24 = vadd.f32 %v2649_v22, %v3680_v13  ;;  %v1254_v26 = vpop.f32.mrb[11].mxu1 }
 0x200   :  { %v2514_v27 = vpack.c.bf16 %v1252_v21, %v1252_v21  ;;  %v1255_v28 = vadd.f32 %v3680_v13, %v1254_v26 }
 0x201   :  { %1741 = vst.msk [vmem:[%s4451_s9 + $0x28] sm:$0xf] %vm1730_vm2, %v2516_v23  ;;  %v1479_v29 = vpack.c.bf16 %v1263_v24, %v1260_v18  ;;  %v2517_v30 = vpack.c.bf16 %v1263_v24, %v1263_v24  ;;  %2705 = vmatmul.mubr.msk.bf16.vlgmr.msra.gmra.mrb[64].mxu1 %vm1803_vm3, %v1475_v31 }
 0x202   :  { %1739 = vst.msk [vmem:[%s4451_s9 + $0x20] sm:$0xf] %vm1730_vm2, %v2514_v27  ;;  %v1478_v32 = vpack.c.bf16 %v1255_v28, %v1252_v21  ;;  %v2515_v33 = vpack.c.bf16 %v1255_v28, %v1255_v28  ;;  %2708 = vmatprep.mubr.msk.bf16.mxu1 %vm1803_vm3, %v1476_v8 }
 0x203   :  { %1742 = vst.msk [vmem:[%s4451_s9 + $0x2c] sm:$0xf] %vm1730_vm2, %v2517_v30 }
 0x204   :  { %1740 = vst.msk [vmem:[%s4451_s9 + $0x24] sm:$0xf] %vm1730_vm2, %v2515_v33 }
 0x209   :  { %2709 = vmatmul.mubr.msk.bf16.gmra.mrb[68].mxu1 %vm1803_vm3, %v1477_v4 }
 0x20a   :  { %2712 = vmatprep.mubr.msk.bf16.mxu1 %vm1803_vm3, %v1478_v32 }
 0x20c   :  { %v2652_v19 = vpop.f32.mrb[12].mxu1 }
 0x20d   :  { %v1276_v25 = vadd.f32 %v2652_v19, %v3680_v13  ;;  %v1267_v31 = vpop.f32.mrb[13].mxu1 }
 0x20e   :  { %v1268_v34 = vadd.f32 %v3680_v13, %v1267_v31  ;;  %v2653_v35 = vpop.f32.mrb[14].mxu1 }
 0x20f   :  { %v2520_v36 = vpack.c.bf16 %v1276_v25, %v1276_v25  ;;  %v1279_v37 = vadd.f32 %v2653_v35, %v3680_v13  ;;  %v1270_v38 = vpop.f32.mrb[15].mxu1 }
 0x210   :  { %v2518_v39 = vpack.c.bf16 %v1268_v34, %v1268_v34  ;;  %v1271_v40 = vadd.f32 %v3680_v13, %v1270_v38 }
 0x211   :  { %1745 = vst.msk [vmem:[%s4451_s9 + $0x38] sm:$0xf] %vm1730_vm2, %v2520_v36  ;;  %v1481_v41 = vpack.c.bf16 %v1279_v37, %v1276_v25  ;;  %v2521_v42 = vpack.c.bf16 %v1279_v37, %v1279_v37  ;;  %2713 = vmatmul.mubr.msk.bf16.gmra.mrb[72].mxu1 %vm1803_vm3, %v1479_v29 }
 0x212   :  { %1743 = vst.msk [vmem:[%s4451_s9 + $0x30] sm:$0xf] %vm1730_vm2, %v2518_v39  ;;  %v1480_v43 = vpack.c.bf16 %v1271_v40, %v1268_v34  ;;  %v2519_v44 = vpack.c.bf16 %v1271_v40, %v1271_v40 }
 0x213   :  { %1746 = vst.msk [vmem:[%s4451_s9 + $0x3c] sm:$0xf] %vm1730_vm2, %v2521_v42 }
 0x214   :  { %1744 = vst.msk [vmem:[%s4451_s9 + $0x34] sm:$0xf] %vm1730_vm2, %v2519_v44  ;;  %2716 = vmatprep.mubr.msk.bf16.mxu1 %vm1803_vm3, %v1480_v43 }
 0x219   :  { %2717 = vmatmul.mubr.msk.bf16.gmra.mrb[76].mxu1 %vm1803_vm3, %v1481_v41 }
 0x21c   :  { %v2656_v45 = vpop.f32.mrb[16].mxu1 }
 0x21d   :  { %v1292_v46 = vadd.f32 %v2656_v45, %v3680_v13  ;;  %v1283_v47 = vpop.f32.mrb[17].mxu1 }
 0x21e   :  { %v1284_v48 = vadd.f32 %v3680_v13, %v1283_v47  ;;  %v2657_v49 = vpop.f32.mrb[18].mxu1 }
 0x21f   :  { %v2524_v50 = vpack.c.bf16 %v1292_v46, %v1292_v46  ;;  %v1295_v51 = vadd.f32 %v2657_v49, %v3680_v13  ;;  %v1286_v52 = vpop.f32.mrb[19].mxu1 }
 0x220   :  { %v2522_v53 = vpack.c.bf16 %v1284_v48, %v1284_v48  ;;  %v1287_v54 = vadd.f32 %v3680_v13, %v1286_v52 }
 0x221   :  { %1749 = vst.msk [vmem:[%s4451_s9 + $0x48] sm:$0xf] %vm1730_vm2, %v2524_v50  ;;  %v1483_v55 = vpack.c.bf16 %v1295_v51, %v1292_v46  ;;  %v2525_v56 = vpack.c.bf16 %v1295_v51, %v1295_v51 }
 0x222   :  { %1747 = vst.msk [vmem:[%s4451_s9 + $0x40] sm:$0xf] %vm1730_vm2, %v2522_v53  ;;  %v1482_v57 = vpack.c.bf16 %v1287_v54, %v1284_v48  ;;  %v2523_v58 = vpack.c.bf16 %v1287_v54, %v1287_v54 }
 0x223   :  { %1750 = vst.msk [vmem:[%s4451_s9 + $0x4c] sm:$0xf] %vm1730_vm2, %v2525_v56 }
 0x224   :  { %1748 = vst.msk [vmem:[%s4451_s9 + $0x44] sm:$0xf] %vm1730_vm2, %v2523_v58  ;;  %2720 = vmatprep.mubr.msk.bf16.mxu1 %vm1803_vm3, %v1482_v57 }
 0x225   :  { %2721 = vmatmul.mubr.msk.bf16.gmra.mrb[80].mxu1 %vm1803_vm3, %v1483_v55 }
 0x22c   :  { %v2660_v59 = vpop.f32.mrb[20].mxu1 }
 0x22d   :  { %v1308_v60 = vadd.f32 %v2660_v59, %v3680_v13  ;;  %v1299_v61 = vpop.f32.mrb[21].mxu1 }
 0x22e   :  { %v1300_v62 = vadd.f32 %v3680_v13, %v1299_v61  ;;  %v2661_v63 = vpop.f32.mrb[22].mxu1 }
 0x22f   :  { %v2528_v0 = vpack.c.bf16 %v1308_v60, %v1308_v60  ;;  %v1311_v1 = vadd.f32 %v2661_v63, %v3680_v13  ;;  %v1302_v3 = vpop.f32.mrb[23].mxu1 }
 0x230   :  { %v2526_v4 = vpack.c.bf16 %v1300_v62, %v1300_v62  ;;  %v1303_v5 = vadd.f32 %v3680_v13, %v1302_v3 }
 0x231   :  { %1753 = vst.msk [vmem:[%s4451_s9 + $0x58] sm:$0xf] %vm1730_vm2, %v2528_v0  ;;  %v1485_v6 = vpack.c.bf16 %v1311_v1, %v1308_v60  ;;  %v2529_v7 = vpack.c.bf16 %v1311_v1, %v1311_v1 }
 0x232   :  { %1751 = vst.msk [vmem:[%s4451_s9 + $0x50] sm:$0xf] %vm1730_vm2, %v2526_v4  ;;  %v1484_v8 = vpack.c.bf16 %v1303_v5, %v1300_v62  ;;  %v2527_v9 = vpack.c.bf16 %v1303_v5, %v1303_v5 }
 0x233   :  { %1754 = vst.msk [vmem:[%s4451_s9 + $0x5c] sm:$0xf] %vm1730_vm2, %v2529_v7 }
 0x234   :  { %1752 = vst.msk [vmem:[%s4451_s9 + $0x54] sm:$0xf] %vm1730_vm2, %v2527_v9  ;;  %2724 = vmatprep.mubr.msk.bf16.mxu1 %vm1803_vm3, %v1484_v8 }
 0x235   :  { %2725 = vmatmul.mubr.msk.bf16.gmra.mrb[84].mxu1 %vm1803_vm3, %v1485_v6 }
 0x23c   :  { %v2664_v10 = vpop.f32.mrb[24].mxu1 }
 0x23d   :  { %v1324_v11 = vadd.f32 %v2664_v10, %v3680_v13  ;;  %v1315_v12 = vpop.f32.mrb[25].mxu1 }
 0x23e   :  { %v1316_v14 = vadd.f32 %v3680_v13, %v1315_v12  ;;  %v2665_v15 = vpop.f32.mrb[26].mxu1 }
 0x23f   :  { %v2532_v16 = vpack.c.bf16 %v1324_v11, %v1324_v11  ;;  %v1327_v17 = vadd.f32 %v2665_v15, %v3680_v13  ;;  %v1318_v2 = vpop.f32.mrb[27].mxu1 }
 0x240   :  { %v2530_v18 = vpack.c.bf16 %v1316_v14, %v1316_v14  ;;  %v1319_v20 = vadd.f32 %v3680_v13, %v1318_v2 }
 0x241   :  { %1757 = vst.msk [vmem:[%s4451_s9 + $0x68] sm:$0xf] %vm1730_vm2, %v2532_v16  ;;  %v1487_v21 = vpack.c.bf16 %v1327_v17, %v1324_v11  ;;  %v2533_v22 = vpack.c.bf16 %v1327_v17, %v1327_v17 }
 0x242   :  { %1755 = vst.msk [vmem:[%s4451_s9 + $0x60] sm:$0xf] %vm1730_vm2, %v2530_v18  ;;  %v1486_v23 = vpack.c.bf16 %v1319_v20, %v1316_v14  ;;  %v2531_v24 = vpack.c.bf16 %v1319_v20, %v1319_v20 }
 0x243   :  { %1758 = vst.msk [vmem:[%s4451_s9 + $0x6c] sm:$0xf] %vm1730_vm2, %v2533_v22 }
 0x244   :  { %1756 = vst.msk [vmem:[%s4451_s9 + $0x64] sm:$0xf] %vm1730_vm2, %v2531_v24  ;;  %2728 = vmatprep.mubr.msk.bf16.mxu1 %vm1803_vm3, %v1486_v23 }
 0x245   :  { %2729 = vmatmul.mubr.msk.bf16.gmra.mrb[88].mxu1 %vm1803_vm3, %v1487_v21 }
 0x24c   :  { %v2668_v26 = vpop.f32.mrb[28].mxu1 }
 0x24d   :  { %v1340_v27 = vadd.f32 %v2668_v26, %v3680_v13  ;;  %v1331_v28 = vpop.f32.mrb[29].mxu1 }
 0x24e   :  { %v1332_v29 = vadd.f32 %v3680_v13, %v1331_v28  ;;  %v2669_v30 = vpop.f32.mrb[30].mxu1 }
 0x24f   :  { %v2536_v32 = vpack.c.bf16 %v1340_v27, %v1340_v27  ;;  %v1343_v33 = vadd.f32 %v2669_v30, %v3680_v13  ;;  %v1334_v19 = vpop.f32.mrb[31].mxu1 }
 0x250   :  { %v2534_v25 = vpack.c.bf16 %v1332_v29, %v1332_v29  ;;  %v1335_v31 = vadd.f32 %v3680_v13, %v1334_v19 }
 0x251   :  { %1761 = vst.msk [vmem:[%s4451_s9 + $0x78] sm:$0xf] %vm1730_vm2, %v2536_v32  ;;  %v1489_v34 = vpack.c.bf16 %v1343_v33, %v1340_v27  ;;  %v2537_v35 = vpack.c.bf16 %v1343_v33, %v1343_v33 }
 0x252   :  { %1759 = vst.msk [vmem:[%s4451_s9 + $0x70] sm:$0xf] %vm1730_vm2, %v2534_v25  ;;  %v1488_v36 = vpack.c.bf16 %v1335_v31, %v1332_v29  ;;  %v2535_v37 = vpack.c.bf16 %v1335_v31, %v1335_v31 }
 0x253   :  { %1762 = vst.msk [vmem:[%s4451_s9 + $0x7c] sm:$0xf] %vm1730_vm2, %v2537_v35 }
 0x254   :  { %1760 = vst.msk [vmem:[%s4451_s9 + $0x74] sm:$0xf] %vm1730_vm2, %v2535_v37  ;;  %2732 = vmatprep.mubr.msk.bf16.mxu1 %vm1803_vm3, %v1488_v36 }
 0x255   :  { %2733 = vmatmul.mubr.msk.bf16.gmra.mrb[92].mxu1 %vm1803_vm3, %v1489_v34 }
 0x25c   :  { %v2672_v38 = vpop.f32.mrb[32].mxu1 }
 0x25d   :  { %v1356_v39 = vadd.f32 %v2672_v38, %v3680_v13  ;;  %v1347_v40 = vpop.f32.mrb[33].mxu1 }
 0x25e   :  { %v1348_v41 = vadd.f32 %v3680_v13, %v1347_v40  ;;  %v2673_v42 = vpop.f32.mrb[34].mxu1 }
 0x25f   :  { %v2540_v43 = vpack.c.bf16 %v1356_v39, %v1356_v39  ;;  %v1359_v44 = vadd.f32 %v2673_v42, %v3680_v13  ;;  %v1350_v45 = vpop.f32.mrb[35].mxu1 }
 0x260   :  { %v2538_v46 = vpack.c.bf16 %v1348_v41, %v1348_v41  ;;  %v1351_v47 = vadd.f32 %v3680_v13, %v1350_v45 }
 0x261   :  { %1765 = vst.msk [vmem:[%s4451_s9 + $0x88] sm:$0xf] %vm1730_vm2, %v2540_v43  ;;  %v1491_v48 = vpack.c.bf16 %v1359_v44, %v1356_v39  ;;  %v2541_v49 = vpack.c.bf16 %v1359_v44, %v1359_v44 }
 0x262   :  { %1763 = vst.msk [vmem:[%s4451_s9 + $0x80] sm:$0xf] %vm1730_vm2, %v2538_v46  ;;  %v1490_v50 = vpack.c.bf16 %v1351_v47, %v1348_v41  ;;  %v2539_v51 = vpack.c.bf16 %v1351_v47, %v1351_v47 }
 0x263   :  { %1766 = vst.msk [vmem:[%s4451_s9 + $0x8c] sm:$0xf] %vm1730_vm2, %v2541_v49 }
 0x264   :  { %1764 = vst.msk [vmem:[%s4451_s9 + $0x84] sm:$0xf] %vm1730_vm2, %v2539_v51  ;;  %2736 = vmatprep.mubr.msk.bf16.mxu1 %vm1803_vm3, %v1490_v50 }
 0x265   :  { %2737 = vmatmul.mubr.msk.bf16.gmra.mrb[96].mxu1 %vm1803_vm3, %v1491_v48 }
 0x26c   :  { %v2676_v52 = vpop.f32.mrb[36].mxu1 }
 0x26d   :  { %v1372_v53 = vadd.f32 %v2676_v52, %v3680_v13  ;;  %v1363_v54 = vpop.f32.mrb[37].mxu1 }
 0x26e   :  { %v1364_v55 = vadd.f32 %v3680_v13, %v1363_v54  ;;  %v2677_v56 = vpop.f32.mrb[38].mxu1 }
 0x26f   :  { %v2544_v57 = vpack.c.bf16 %v1372_v53, %v1372_v53  ;;  %v1375_v58 = vadd.f32 %v2677_v56, %v3680_v13  ;;  %v1366_v59 = vpop.f32.mrb[39].mxu1 }
 0x270   :  { %v2542_v60 = vpack.c.bf16 %v1364_v55, %v1364_v55  ;;  %v1367_v61 = vadd.f32 %v3680_v13, %v1366_v59 }
 0x271   :  { %1769 = vst.msk [vmem:[%s4451_s9 + $0x98] sm:$0xf] %vm1730_vm2, %v2544_v57  ;;  %v1493_v62 = vpack.c.bf16 %v1375_v58, %v1372_v53  ;;  %v2545_v63 = vpack.c.bf16 %v1375_v58, %v1375_v58 }
 0x272   :  { %1767 = vst.msk [vmem:[%s4451_s9 + $0x90] sm:$0xf] %vm1730_vm2, %v2542_v60  ;;  %v1492_v0 = vpack.c.bf16 %v1367_v61, %v1364_v55  ;;  %v2543_v1 = vpack.c.bf16 %v1367_v61, %v1367_v61 }
 0x273   :  { %1770 = vst.msk [vmem:[%s4451_s9 + $0x9c] sm:$0xf] %vm1730_vm2, %v2545_v63 }
 0x274   :  { %1768 = vst.msk [vmem:[%s4451_s9 + $0x94] sm:$0xf] %vm1730_vm2, %v2543_v1  ;;  %2740 = vmatprep.mubr.msk.bf16.mxu1 %vm1803_vm3, %v1492_v0 }
 0x275   :  { %2741 = vmatmul.mubr.msk.bf16.gmra.mrb[100].mxu1 %vm1803_vm3, %v1493_v62 }
 0x27c   :  { %v2680_v3 = vpop.f32.mrb[40].mxu1 }
 0x27d   :  { %v1388_v4 = vadd.f32 %v2680_v3, %v3680_v13  ;;  %v1379_v5 = vpop.f32.mrb[41].mxu1 }
 0x27e   :  { %v1380_v6 = vadd.f32 %v3680_v13, %v1379_v5  ;;  %v2681_v7 = vpop.f32.mrb[42].mxu1 }
 0x27f   :  { %v2548_v8 = vpack.c.bf16 %v1388_v4, %v1388_v4  ;;  %v1391_v9 = vadd.f32 %v2681_v7, %v3680_v13  ;;  %v1382_v10 = vpop.f32.mrb[43].mxu1 }
 0x280   :  { %v2546_v11 = vpack.c.bf16 %v1380_v6, %v1380_v6  ;;  %v1383_v12 = vadd.f32 %v3680_v13, %v1382_v10 }
 0x281   :  { %1773 = vst.msk [vmem:[%s4451_s9 + $0xa8] sm:$0xf] %vm1730_vm2, %v2548_v8  ;;  %v1495_v14 = vpack.c.bf16 %v1391_v9, %v1388_v4  ;;  %v2549_v15 = vpack.c.bf16 %v1391_v9, %v1391_v9 }
 0x282   :  { %1771 = vst.msk [vmem:[%s4451_s9 + $0xa0] sm:$0xf] %vm1730_vm2, %v2546_v11  ;;  %v1494_v16 = vpack.c.bf16 %v1383_v12, %v1380_v6  ;;  %v2547_v17 = vpack.c.bf16 %v1383_v12, %v1383_v12 }
 0x283   :  { %1774 = vst.msk [vmem:[%s4451_s9 + $0xac] sm:$0xf] %vm1730_vm2, %v2549_v15 }
 0x284   :  { %1772 = vst.msk [vmem:[%s4451_s9 + $0xa4] sm:$0xf] %vm1730_vm2, %v2547_v17  ;;  %2744 = vmatprep.mubr.msk.bf16.mxu1 %vm1803_vm3, %v1494_v16 }
 0x285   :  { %2745 = vmatmul.mubr.msk.bf16.gmra.mrb[104].mxu1 %vm1803_vm3, %v1495_v14 }
 0x28c   :  { %v2684_v2 = vpop.f32.mrb[44].mxu1 }
 0x28d   :  { %v1404_v18 = vadd.f32 %v2684_v2, %v3680_v13  ;;  %v1395_v20 = vpop.f32.mrb[45].mxu1 }
 0x28e   :  { %v1396_v21 = vadd.f32 %v3680_v13, %v1395_v20  ;;  %v2685_v22 = vpop.f32.mrb[46].mxu1 }
 0x28f   :  { %v2552_v23 = vpack.c.bf16 %v1404_v18, %v1404_v18  ;;  %v1407_v24 = vadd.f32 %v2685_v22, %v3680_v13  ;;  %v1398_v26 = vpop.f32.mrb[47].mxu1 }
 0x290   :  { %v2550_v27 = vpack.c.bf16 %v1396_v21, %v1396_v21  ;;  %v1399_v28 = vadd.f32 %v3680_v13, %v1398_v26  ;;  %v4111_v26 = vld [vmem:[%s4452_s7] ss:$0 sm:$0xff] }
 0x291   :  { %1777 = vst.msk [vmem:[%s4451_s9 + $0xb8] sm:$0xf] %vm1730_vm2, %v2552_v23  ;;  %v1497_v29 = vpack.c.bf16 %v1407_v24, %v1404_v18  ;;  %v2553_v30 = vpack.c.bf16 %v1407_v24, %v1407_v24 }
 0x292   :  { %1775 = vst.msk [vmem:[%s4451_s9 + $0xb0] sm:$0xf] %vm1730_vm2, %v2550_v27  ;;  %v1496_v32 = vpack.c.bf16 %v1399_v28, %v1396_v21  ;;  %v2551_v33 = vpack.c.bf16 %v1399_v28, %v1399_v28 }
 0x293   :  { %1778 = vst.msk [vmem:[%s4451_s9 + $0xbc] sm:$0xf] %vm1730_vm2, %v2553_v30 }
 0x294   :  { %1776 = vst.msk [vmem:[%s4451_s9 + $0xb4] sm:$0xf] %vm1730_vm2, %v2551_v33  ;;  %2748 = vmatprep.mubr.msk.bf16.mxu1 %vm1803_vm3, %v1496_v32 }
 0x295   :  { %2749 = vmatmul.mubr.msk.bf16.gmra.mrb[108].mxu1 %vm1803_vm3, %v1497_v29 }
 0x29c   :  { %v2688_v19 = vpop.f32.mrb[48].mxu1 }
 0x29d   :  { %v1420_v25 = vadd.f32 %v2688_v19, %v3680_v13  ;;  %v1411_v31 = vpop.f32.mrb[49].mxu1 }
 0x29e   :  { %v1412_v34 = vadd.f32 %v3680_v13, %v1411_v31  ;;  %v2689_v35 = vpop.f32.mrb[50].mxu1 }
 0x29f   :  { %v2556_v36 = vpack.c.bf16 %v1420_v25, %v1420_v25  ;;  %v1423_v37 = vadd.f32 %v2689_v35, %v3680_v13  ;;  %v1414_v38 = vpop.f32.mrb[51].mxu1 }
 0x2a0   :  { %v2554_v39 = vpack.c.bf16 %v1412_v34, %v1412_v34  ;;  %v1415_v40 = vadd.f32 %v3680_v13, %v1414_v38 }
 0x2a1   :  { %1781 = vst.msk [vmem:[%s4451_s9 + $0xc8] sm:$0xf] %vm1730_vm2, %v2556_v36  ;;  %v1499_v41 = vpack.c.bf16 %v1423_v37, %v1420_v25  ;;  %v2557_v42 = vpack.c.bf16 %v1423_v37, %v1423_v37 }
 0x2a2   :  { %1779 = vst.msk [vmem:[%s4451_s9 + $0xc0] sm:$0xf] %vm1730_vm2, %v2554_v39  ;;  %v1498_v43 = vpack.c.bf16 %v1415_v40, %v1412_v34  ;;  %v2555_v44 = vpack.c.bf16 %v1415_v40, %v1415_v40 }
 0x2a3   :  { %1782 = vst.msk [vmem:[%s4451_s9 + $0xcc] sm:$0xf] %vm1730_vm2, %v2557_v42 }
 0x2a4   :  { %1780 = vst.msk [vmem:[%s4451_s9 + $0xc4] sm:$0xf] %vm1730_vm2, %v2555_v44  ;;  %2752 = vmatprep.mubr.msk.bf16.mxu1 %vm1803_vm3, %v1498_v43 }
 0x2a5   :  { %2753 = vmatmul.mubr.msk.bf16.gmra.mrb[112].mxu1 %vm1803_vm3, %v1499_v41 }
 0x2ac   :  { %v2692_v45 = vpop.f32.mrb[52].mxu1 }
 0x2ad   :  { %v1436_v46 = vadd.f32 %v2692_v45, %v3680_v13  ;;  %v1427_v47 = vpop.f32.mrb[53].mxu1 }
 0x2ae   :  { %v1428_v48 = vadd.f32 %v3680_v13, %v1427_v47  ;;  %v2693_v49 = vpop.f32.mrb[54].mxu1 }
 0x2af   :  { %v2560_v50 = vpack.c.bf16 %v1436_v46, %v1436_v46  ;;  %v1439_v51 = vadd.f32 %v2693_v49, %v3680_v13  ;;  %v1430_v52 = vpop.f32.mrb[55].mxu1 }
 0x2b0   :  { %v2558_v53 = vpack.c.bf16 %v1428_v48, %v1428_v48  ;;  %v1431_v54 = vadd.f32 %v3680_v13, %v1430_v52 }
 0x2b1   :  { %1785 = vst.msk [vmem:[%s4451_s9 + $0xd8] sm:$0xf] %vm1730_vm2, %v2560_v50  ;;  %v1501_v55 = vpack.c.bf16 %v1439_v51, %v1436_v46  ;;  %v2561_v56 = vpack.c.bf16 %v1439_v51, %v1439_v51 }
 0x2b2   :  { %1783 = vst.msk [vmem:[%s4451_s9 + $0xd0] sm:$0xf] %vm1730_vm2, %v2558_v53  ;;  %v1500_v57 = vpack.c.bf16 %v1431_v54, %v1428_v48  ;;  %v2559_v58 = vpack.c.bf16 %v1431_v54, %v1431_v54 }
 0x2b3   :  { %1786 = vst.msk [vmem:[%s4451_s9 + $0xdc] sm:$0xf] %vm1730_vm2, %v2561_v56 }
 0x2b4   :  { %1784 = vst.msk [vmem:[%s4451_s9 + $0xd4] sm:$0xf] %vm1730_vm2, %v2559_v58  ;;  %2756 = vmatprep.mubr.msk.bf16.mxu1 %vm1803_vm3, %v1500_v57 }
 0x2b5   :  { %2757 = vmatmul.mubr.msk.bf16.gmra.mrb[116].mxu1 %vm1803_vm3, %v1501_v55 }
 0x2bc   :  { %v2696_v59 = vpop.f32.mrb[56].mxu1 }
 0x2bd   :  { %v1452_v60 = vadd.f32 %v2696_v59, %v3680_v13  ;;  %v1443_v61 = vpop.f32.mrb[57].mxu1 }
 0x2be   :  { %v1444_v62 = vadd.f32 %v3680_v13, %v1443_v61  ;;  %v2697_v63 = vpop.f32.mrb[58].mxu1 }
 0x2bf   :  { %v2564_v0 = vpack.c.bf16 %v1452_v60, %v1452_v60  ;;  %v1455_v1 = vadd.f32 %v2697_v63, %v3680_v13  ;;  %v1446_v3 = vpop.f32.mrb[59].mxu1 }
 0x2c0   :  { %v2562_v4 = vpack.c.bf16 %v1444_v62, %v1444_v62  ;;  %v1447_v5 = vadd.f32 %v3680_v13, %v1446_v3 }
 0x2c1   :  { %1789 = vst.msk [vmem:[%s4451_s9 + $0xe8] sm:$0xf] %vm1730_vm2, %v2564_v0  ;;  %v1503_v6 = vpack.c.bf16 %v1455_v1, %v1452_v60  ;;  %v2565_v7 = vpack.c.bf16 %v1455_v1, %v1455_v1 }
 0x2c2   :  { %1787 = vst.msk [vmem:[%s4451_s9 + $0xe0] sm:$0xf] %vm1730_vm2, %v2562_v4  ;;  %v1502_v8 = vpack.c.bf16 %v1447_v5, %v1444_v62  ;;  %v2563_v9 = vpack.c.bf16 %v1447_v5, %v1447_v5 }
 0x2c3   :  { %1790 = vst.msk [vmem:[%s4451_s9 + $0xec] sm:$0xf] %vm1730_vm2, %v2565_v7 }
 0x2c4   :  { %1788 = vst.msk [vmem:[%s4451_s9 + $0xe4] sm:$0xf] %vm1730_vm2, %v2563_v9  ;;  %2760 = vmatprep.mubr.msk.bf16.mxu1 %vm1803_vm3, %v1502_v8 }
 0x2c5   :  { %2761 = vmatmul.mubr.msk.bf16.gmra.mrb[120].mxu1 %vm1803_vm3, %v1503_v6 }
 0x2cc   :  { %v2700_v10 = vpop.f32.mrb[60].mxu1 }
 0x2cd   :  { %v1468_v11 = vadd.f32 %v2700_v10, %v3680_v13  ;;  %v1459_v12 = vpop.f32.mrb[61].mxu1 }
 0x2ce   :  { %v1460_v14 = vadd.f32 %v3680_v13, %v1459_v12  ;;  %v2701_v15 = vpop.f32.mrb[62].mxu1 }
 0x2cf   :  { %v2568_v16 = vpack.c.bf16 %v1468_v11, %v1468_v11  ;;  %v1471_v17 = vadd.f32 %v2701_v15, %v3680_v13  ;;  %v1462_v2 = vpop.f32.mrb[63].mxu1 }
 0x2d0   :  { %v2566_v18 = vpack.c.bf16 %v1460_v14, %v1460_v14  ;;  %v1463_v20 = vadd.f32 %v3680_v13, %v1462_v2 }
 0x2d1   :  { %1793 = vst.msk [vmem:[%s4451_s9 + $0xf8] sm:$0xf] %vm1730_vm2, %v2568_v16  ;;  %v1505_v21 = vpack.c.bf16 %v1471_v17, %v1468_v11  ;;  %v2569_v22 = vpack.c.bf16 %v1471_v17, %v1471_v17 }
 0x2d2   :  { %1791 = vst.msk [vmem:[%s4451_s9 + $0xf0] sm:$0xf] %vm1730_vm2, %v2566_v18  ;;  %v1504_v23 = vpack.c.bf16 %v1463_v20, %v1460_v14  ;;  %v2567_v24 = vpack.c.bf16 %v1463_v20, %v1463_v20 }
 0x2d3   :  { %1794 = vst.msk [vmem:[%s4451_s9 + $0xfc] sm:$0xf] %vm1730_vm2, %v2569_v22 }
 0x2d4   :  { %1792 = vst.msk [vmem:[%s4451_s9 + $0xf4] sm:$0xf] %vm1730_vm2, %v2567_v24  ;;  %v2706_v13 = vpop.f32.mrb[64].mxu1  ;;  %2764 = vmatprep.mubr.msk.bf16.mxu1 %vm1803_vm3, %v1504_v23 }
 0x2d5   :  { %v1947_v27 = vadd.f32 %v2706_v13, %v4111_v26  ;;  %v1938_v28 = vpop.f32.mrb[65].mxu1  ;;  %2765 = vmatmul.mubr.msk.bf16.gmra.mrb[124].mxu1 %vm1803_vm3, %v1505_v21 }
 0x2d6   :  { %v1939_v29 = vadd.f32 %v4111_v26, %v1938_v28  ;;  %v2707_v30 = vpop.f32.mrb[66].mxu1 }
 0x2d7   :  { %2195 = vst.msk [vmem:[%s4453_s10 + $0x10] sm:$0xff] %vm464_vm0, %v1947_v27  ;;  %v1950_v32 = vadd.f32 %v2707_v30, %v4111_v26  ;;  %v1941_v33 = vpop.f32.mrb[67].mxu1 }
 0x2d8   :  { %2193 = vst.msk [vmem:[%s4453_s10] sm:$0xff] %vm464_vm0, %v1939_v29  ;;  %v1942_v19 = vadd.f32 %v4111_v26, %v1941_v33 }
 0x2d9   :  { %2196 = vst.msk [vmem:[%s4453_s10 + $0x18] sm:$0xff] %vm464_vm0, %v1950_v32 }
 0x2da   :  { %2194 = vst.msk [vmem:[%s4453_s10 + $0x8] sm:$0xff] %vm464_vm0, %v1942_v19 }
 0x2dc   :  { %v2710_v25 = vpop.f32.mrb[68].mxu1 }
 0x2dd   :  { %v1963_v31 = vadd.f32 %v2710_v25, %v4111_v26  ;;  %v1954_v34 = vpop.f32.mrb[69].mxu1 }
 0x2de   :  { %v1955_v35 = vadd.f32 %v4111_v26, %v1954_v34  ;;  %v2711_v36 = vpop.f32.mrb[70].mxu1 }
 0x2df   :  { %2199 = vst.msk [vmem:[%s4453_s10 + $0x30] sm:$0xff] %vm464_vm0, %v1963_v31  ;;  %v1966_v37 = vadd.f32 %v2711_v36, %v4111_v26  ;;  %v1957_v38 = vpop.f32.mrb[71].mxu1 }
 0x2e0   :  { %2197 = vst.msk [vmem:[%s4453_s10 + $0x20] sm:$0xff] %vm464_vm0, %v1955_v35  ;;  %v1958_v39 = vadd.f32 %v4111_v26, %v1957_v38 }
 0x2e1   :  { %2200 = vst.msk [vmem:[%s4453_s10 + $0x38] sm:$0xff] %vm464_vm0, %v1966_v37 }
 0x2e2   :  { %2198 = vst.msk [vmem:[%s4453_s10 + $0x28] sm:$0xff] %vm464_vm0, %v1958_v39 }
 0x2e4   :  { %v2714_v40 = vpop.f32.mrb[72].mxu1 }
 0x2e5   :  { %v1979_v41 = vadd.f32 %v2714_v40, %v4111_v26  ;;  %v1970_v42 = vpop.f32.mrb[73].mxu1 }
 0x2e6   :  { %v1971_v43 = vadd.f32 %v4111_v26, %v1970_v42  ;;  %v2715_v44 = vpop.f32.mrb[74].mxu1 }
 0x2e7   :  { %2203 = vst.msk [vmem:[%s4453_s10 + $0x50] sm:$0xff] %vm464_vm0, %v1979_v41  ;;  %v1982_v45 = vadd.f32 %v2715_v44, %v4111_v26  ;;  %v1973_v46 = vpop.f32.mrb[75].mxu1 }
 0x2e8   :  { %2201 = vst.msk [vmem:[%s4453_s10 + $0x40] sm:$0xff] %vm464_vm0, %v1971_v43  ;;  %v1974_v47 = vadd.f32 %v4111_v26, %v1973_v46 }
 0x2e9   :  { %2204 = vst.msk [vmem:[%s4453_s10 + $0x58] sm:$0xff] %vm464_vm0, %v1982_v45 }
 0x2ea   :  { %2202 = vst.msk [vmem:[%s4453_s10 + $0x48] sm:$0xff] %vm464_vm0, %v1974_v47 }
 0x2ec   :  { %v2718_v48 = vpop.f32.mrb[76].mxu1 }
 0x2ed   :  { %v1995_v49 = vadd.f32 %v2718_v48, %v4111_v26  ;;  %v1986_v50 = vpop.f32.mrb[77].mxu1 }
 0x2ee   :  { %v1987_v51 = vadd.f32 %v4111_v26, %v1986_v50  ;;  %v2719_v52 = vpop.f32.mrb[78].mxu1 }
 0x2ef   :  { %2207 = vst.msk [vmem:[%s4453_s10 + $0x70] sm:$0xff] %vm464_vm0, %v1995_v49  ;;  %v1998_v53 = vadd.f32 %v2719_v52, %v4111_v26  ;;  %v1989_v54 = vpop.f32.mrb[79].mxu1 }
 0x2f0   :  { %2205 = vst.msk [vmem:[%s4453_s10 + $0x60] sm:$0xff] %vm464_vm0, %v1987_v51  ;;  %v1990_v55 = vadd.f32 %v4111_v26, %v1989_v54 }
 0x2f1   :  { %2208 = vst.msk [vmem:[%s4453_s10 + $0x78] sm:$0xff] %vm464_vm0, %v1998_v53 }
 0x2f2   :  { %2206 = vst.msk [vmem:[%s4453_s10 + $0x68] sm:$0xff] %vm464_vm0, %v1990_v55 }
 0x2f8   :  { %v2722_v56 = vpop.f32.mrb[80].mxu1 }
 0x2f9   :  { %v2011_v57 = vadd.f32 %v2722_v56, %v4111_v26  ;;  %v2002_v58 = vpop.f32.mrb[81].mxu1 }
 0x2fa   :  { %v2003_v59 = vadd.f32 %v4111_v26, %v2002_v58  ;;  %v2723_v60 = vpop.f32.mrb[82].mxu1 }
 0x2fb   :  { %2211 = vst.msk [vmem:[%s4453_s10 + $0x90] sm:$0xff] %vm464_vm0, %v2011_v57  ;;  %v2014_v61 = vadd.f32 %v2723_v60, %v4111_v26  ;;  %v2005_v62 = vpop.f32.mrb[83].mxu1 }
 0x2fc   :  { %2209 = vst.msk [vmem:[%s4453_s10 + $0x80] sm:$0xff] %vm464_vm0, %v2003_v59  ;;  %v2006_v63 = vadd.f32 %v4111_v26, %v2005_v62 }
 0x2fd   :  { %2212 = vst.msk [vmem:[%s4453_s10 + $0x98] sm:$0xff] %vm464_vm0, %v2014_v61 }
 0x2fe   :  { %2210 = vst.msk [vmem:[%s4453_s10 + $0x88] sm:$0xff] %vm464_vm0, %v2006_v63 }
 0x308   :  { %v2726_v0 = vpop.f32.mrb[84].mxu1 }
 0x309   :  { %v2027_v1 = vadd.f32 %v2726_v0, %v4111_v26  ;;  %v2018_v3 = vpop.f32.mrb[85].mxu1 }
 0x30a   :  { %v2019_v4 = vadd.f32 %v4111_v26, %v2018_v3  ;;  %v2727_v5 = vpop.f32.mrb[86].mxu1 }
 0x30b   :  { %2215 = vst.msk [vmem:[%s4453_s10 + $0xb0] sm:$0xff] %vm464_vm0, %v2027_v1  ;;  %v2030_v6 = vadd.f32 %v2727_v5, %v4111_v26  ;;  %v2021_v7 = vpop.f32.mrb[87].mxu1 }
 0x30c   :  { %2213 = vst.msk [vmem:[%s4453_s10 + $0xa0] sm:$0xff] %vm464_vm0, %v2019_v4  ;;  %v2022_v8 = vadd.f32 %v4111_v26, %v2021_v7 }
 0x30d   :  { %2216 = vst.msk [vmem:[%s4453_s10 + $0xb8] sm:$0xff] %vm464_vm0, %v2030_v6 }
 0x30e   :  { %2214 = vst.msk [vmem:[%s4453_s10 + $0xa8] sm:$0xff] %vm464_vm0, %v2022_v8 }
 0x318   :  { %v2730_v9 = vpop.f32.mrb[88].mxu1 }
 0x319   :  { %v2043_v10 = vadd.f32 %v2730_v9, %v4111_v26  ;;  %v2034_v11 = vpop.f32.mrb[89].mxu1 }
 0x31a   :  { %v2035_v12 = vadd.f32 %v4111_v26, %v2034_v11  ;;  %v2731_v14 = vpop.f32.mrb[90].mxu1 }
 0x31b   :  { %2219 = vst.msk [vmem:[%s4453_s10 + $0xd0] sm:$0xff] %vm464_vm0, %v2043_v10  ;;  %v2046_v15 = vadd.f32 %v2731_v14, %v4111_v26  ;;  %v2037_v16 = vpop.f32.mrb[91].mxu1 }
 0x31c   :  { %2217 = vst.msk [vmem:[%s4453_s10 + $0xc0] sm:$0xff] %vm464_vm0, %v2035_v12  ;;  %v2038_v17 = vadd.f32 %v4111_v26, %v2037_v16 }
 0x31d   :  { %2220 = vst.msk [vmem:[%s4453_s10 + $0xd8] sm:$0xff] %vm464_vm0, %v2046_v15 }
 0x31e   :  { %2218 = vst.msk [vmem:[%s4453_s10 + $0xc8] sm:$0xff] %vm464_vm0, %v2038_v17 }
 0x328   :  { %v2734_v2 = vpop.f32.mrb[92].mxu1 }
 0x329   :  { %v2059_v18 = vadd.f32 %v2734_v2, %v4111_v26  ;;  %v2050_v20 = vpop.f32.mrb[93].mxu1 }
 0x32a   :  { %v2051_v21 = vadd.f32 %v4111_v26, %v2050_v20  ;;  %v2735_v22 = vpop.f32.mrb[94].mxu1 }
 0x32b   :  { %2223 = vst.msk [vmem:[%s4453_s10 + $0xf0] sm:$0xff] %vm464_vm0, %v2059_v18  ;;  %v2062_v23 = vadd.f32 %v2735_v22, %v4111_v26  ;;  %v2053_v24 = vpop.f32.mrb[95].mxu1 }
 0x32c   :  { %2221 = vst.msk [vmem:[%s4453_s10 + $0xe0] sm:$0xff] %vm464_vm0, %v2051_v21  ;;  %v2054_v13 = vadd.f32 %v4111_v26, %v2053_v24 }
 0x32d   :  { %2224 = vst.msk [vmem:[%s4453_s10 + $0xf8] sm:$0xff] %vm464_vm0, %v2062_v23 }
 0x32e   :  { %2222 = vst.msk [vmem:[%s4453_s10 + $0xe8] sm:$0xff] %vm464_vm0, %v2054_v13 }
 0x338   :  { %v2738_v27 = vpop.f32.mrb[96].mxu1 }
 0x339   :  { %v2075_v28 = vadd.f32 %v2738_v27, %v4111_v26  ;;  %v2066_v29 = vpop.f32.mrb[97].mxu1 }
 0x33a   :  { %v2067_v30 = vadd.f32 %v4111_v26, %v2066_v29  ;;  %v2739_v32 = vpop.f32.mrb[98].mxu1 }
 0x33b   :  { %2227 = vst.msk [vmem:[%s4453_s10 + $0x110] sm:$0xff] %vm464_vm0, %v2075_v28  ;;  %v2078_v33 = vadd.f32 %v2739_v32, %v4111_v26  ;;  %v2069_v19 = vpop.f32.mrb[99].mxu1 }
 0x33c   :  { %2225 = vst.msk [vmem:[%s4453_s10 + $0x100] sm:$0xff] %vm464_vm0, %v2067_v30  ;;  %v2070_v25 = vadd.f32 %v4111_v26, %v2069_v19 }
 0x33d   :  { %2228 = vst.msk [vmem:[%s4453_s10 + $0x118] sm:$0xff] %vm464_vm0, %v2078_v33 }
 0x33e   :  { %2226 = vst.msk [vmem:[%s4453_s10 + $0x108] sm:$0xff] %vm464_vm0, %v2070_v25 }
 0x348   :  { %v2742_v31 = vpop.f32.mrb[100].mxu1 }
 0x349   :  { %v2091_v34 = vadd.f32 %v2742_v31, %v4111_v26  ;;  %v2082_v35 = vpop.f32.mrb[101].mxu1 }
 0x34a   :  { %v2083_v36 = vadd.f32 %v4111_v26, %v2082_v35  ;;  %v2743_v37 = vpop.f32.mrb[102].mxu1 }
 0x34b   :  { %2231 = vst.msk [vmem:[%s4453_s10 + $0x130] sm:$0xff] %vm464_vm0, %v2091_v34  ;;  %v2094_v38 = vadd.f32 %v2743_v37, %v4111_v26  ;;  %v2085_v39 = vpop.f32.mrb[103].mxu1 }
 0x34c   :  { %2229 = vst.msk [vmem:[%s4453_s10 + $0x120] sm:$0xff] %vm464_vm0, %v2083_v36  ;;  %v2086_v40 = vadd.f32 %v4111_v26, %v2085_v39 }
 0x34d   :  { %2232 = vst.msk [vmem:[%s4453_s10 + $0x138] sm:$0xff] %vm464_vm0, %v2094_v38 }
 0x34e   :  { %2230 = vst.msk [vmem:[%s4453_s10 + $0x128] sm:$0xff] %vm464_vm0, %v2086_v40 }
 0x358   :  { %v2746_v41 = vpop.f32.mrb[104].mxu1 }
 0x359   :  { %v2107_v42 = vadd.f32 %v2746_v41, %v4111_v26  ;;  %v2098_v43 = vpop.f32.mrb[105].mxu1 }
 0x35a   :  { %v2099_v44 = vadd.f32 %v4111_v26, %v2098_v43  ;;  %v2747_v45 = vpop.f32.mrb[106].mxu1 }
 0x35b   :  { %2235 = vst.msk [vmem:[%s4453_s10 + $0x150] sm:$0xff] %vm464_vm0, %v2107_v42  ;;  %v2110_v46 = vadd.f32 %v2747_v45, %v4111_v26  ;;  %v2101_v47 = vpop.f32.mrb[107].mxu1 }
 0x35c   :  { %2233 = vst.msk [vmem:[%s4453_s10 + $0x140] sm:$0xff] %vm464_vm0, %v2099_v44  ;;  %v2102_v48 = vadd.f32 %v4111_v26, %v2101_v47 }
 0x35d   :  { %2236 = vst.msk [vmem:[%s4453_s10 + $0x158] sm:$0xff] %vm464_vm0, %v2110_v46 }
 0x35e   :  { %2234 = vst.msk [vmem:[%s4453_s10 + $0x148] sm:$0xff] %vm464_vm0, %v2102_v48 }
 0x368   :  { %v2750_v49 = vpop.f32.mrb[108].mxu1 }
 0x369   :  { %v2123_v50 = vadd.f32 %v2750_v49, %v4111_v26  ;;  %v2114_v51 = vpop.f32.mrb[109].mxu1 }
 0x36a   :  { %v2115_v52 = vadd.f32 %v4111_v26, %v2114_v51  ;;  %v2751_v53 = vpop.f32.mrb[110].mxu1 }
 0x36b   :  { %2239 = vst.msk [vmem:[%s4453_s10 + $0x170] sm:$0xff] %vm464_vm0, %v2123_v50  ;;  %v2126_v54 = vadd.f32 %v2751_v53, %v4111_v26  ;;  %v2117_v55 = vpop.f32.mrb[111].mxu1 }
 0x36c   :  { %2237 = vst.msk [vmem:[%s4453_s10 + $0x160] sm:$0xff] %vm464_vm0, %v2115_v52  ;;  %v2118_v56 = vadd.f32 %v4111_v26, %v2117_v55 }
 0x36d   :  { %2240 = vst.msk [vmem:[%s4453_s10 + $0x178] sm:$0xff] %vm464_vm0, %v2126_v54 }
 0x36e   :  { %2238 = vst.msk [vmem:[%s4453_s10 + $0x168] sm:$0xff] %vm464_vm0, %v2118_v56 }
 0x378   :  { %v2754_v57 = vpop.f32.mrb[112].mxu1 }
 0x379   :  { %v2139_v58 = vadd.f32 %v2754_v57, %v4111_v26  ;;  %v2130_v59 = vpop.f32.mrb[113].mxu1 }
 0x37a   :  { %v2131_v60 = vadd.f32 %v4111_v26, %v2130_v59  ;;  %v2755_v61 = vpop.f32.mrb[114].mxu1 }
 0x37b   :  { %2243 = vst.msk [vmem:[%s4453_s10 + $0x190] sm:$0xff] %vm464_vm0, %v2139_v58  ;;  %v2142_v62 = vadd.f32 %v2755_v61, %v4111_v26  ;;  %v2133_v63 = vpop.f32.mrb[115].mxu1 }
 0x37c   :  { %2241 = vst.msk [vmem:[%s4453_s10 + $0x180] sm:$0xff] %vm464_vm0, %v2131_v60  ;;  %v2134_v0 = vadd.f32 %v4111_v26, %v2133_v63 }
 0x37d   :  { %2244 = vst.msk [vmem:[%s4453_s10 + $0x198] sm:$0xff] %vm464_vm0, %v2142_v62 }
 0x37e   :  { %2242 = vst.msk [vmem:[%s4453_s10 + $0x188] sm:$0xff] %vm464_vm0, %v2134_v0 }
 0x388   :  { %v2758_v1 = vpop.f32.mrb[116].mxu1 }
 0x389   :  { %v2155_v3 = vadd.f32 %v2758_v1, %v4111_v26  ;;  %v2146_v4 = vpop.f32.mrb[117].mxu1 }
 0x38a   :  { %v2147_v5 = vadd.f32 %v4111_v26, %v2146_v4  ;;  %v2759_v6 = vpop.f32.mrb[118].mxu1 }
 0x38b   :  { %2247 = vst.msk [vmem:[%s4453_s10 + $0x1b0] sm:$0xff] %vm464_vm0, %v2155_v3  ;;  %v2158_v7 = vadd.f32 %v2759_v6, %v4111_v26  ;;  %v2149_v8 = vpop.f32.mrb[119].mxu1 }
 0x38c   :  { %2245 = vst.msk [vmem:[%s4453_s10 + $0x1a0] sm:$0xff] %vm464_vm0, %v2147_v5  ;;  %v2150_v9 = vadd.f32 %v4111_v26, %v2149_v8 }
 0x38d   :  { %2248 = vst.msk [vmem:[%s4453_s10 + $0x1b8] sm:$0xff] %vm464_vm0, %v2158_v7 }
 0x38e   :  { %2246 = vst.msk [vmem:[%s4453_s10 + $0x1a8] sm:$0xff] %vm464_vm0, %v2150_v9 }
 0x398   :  { %v2762_v10 = vpop.f32.mrb[120].mxu1 }
 0x399   :  { %v2171_v11 = vadd.f32 %v2762_v10, %v4111_v26  ;;  %v2162_v12 = vpop.f32.mrb[121].mxu1 }
 0x39a   :  { %v2163_v14 = vadd.f32 %v4111_v26, %v2162_v12  ;;  %v2763_v15 = vpop.f32.mrb[122].mxu1 }
 0x39b   :  { %2251 = vst.msk [vmem:[%s4453_s10 + $0x1d0] sm:$0xff] %vm464_vm0, %v2171_v11  ;;  %v2174_v16 = vadd.f32 %v2763_v15, %v4111_v26  ;;  %v2165_v17 = vpop.f32.mrb[123].mxu1 }
 0x39c   :  { %2249 = vst.msk [vmem:[%s4453_s10 + $0x1c0] sm:$0xff] %vm464_vm0, %v2163_v14  ;;  %v2166_v2 = vadd.f32 %v4111_v26, %v2165_v17 }
 0x39d   :  { %2252 = vst.msk [vmem:[%s4453_s10 + $0x1d8] sm:$0xff] %vm464_vm0, %v2174_v16 }
 0x39e   :  { %2250 = vst.msk [vmem:[%s4453_s10 + $0x1c8] sm:$0xff] %vm464_vm0, %v2166_v2 }
 0x3a8   :  { %v2766_v18 = vpop.f32.mrb[124].mxu1 }
 0x3a9   :  { %v2187_v20 = vadd.f32 %v2766_v18, %v4111_v26  ;;  %v2178_v21 = vpop.f32.mrb[125].mxu1 }
 0x3aa   :  { %v2179_v22 = vadd.f32 %v4111_v26, %v2178_v21  ;;  %v2767_v23 = vpop.f32.mrb[126].mxu1 }
 0x3ab   :  { %2255 = vst.msk [vmem:[%s4453_s10 + $0x1f0] sm:$0xff] %vm464_vm0, %v2187_v20  ;;  %v2190_v24 = vadd.f32 %v2767_v23, %v4111_v26  ;;  %v2181_v13 = vpop.f32.mrb[127].mxu1 }
 0x3ac   :  { %2253 = vst.msk [vmem:[%s4453_s10 + $0x1e0] sm:$0xff] %vm464_vm0, %v2179_v22  ;;  %v2182_v27 = vadd.f32 %v4111_v26, %v2181_v13 }
 0x3ad   :  { %2256 = vst.msk [vmem:[%s4453_s10 + $0x1f8] sm:$0xff] %vm464_vm0, %v2190_v24 }
 0x3ae   :  { %2254 = vst.msk [vmem:[%s4453_s10 + $0x1e8] sm:$0xff] %vm464_vm0, %v2182_v27 }

// kernel: compressed_residual_attention_block.4
= control target key start
LH: loop header
LB: loop body
LE: loop exit
PB: predicated region body
PF: predicated region fallthrough
CT: control target
= control target key end

     0   :  { %v305_v0 = vmov 0.0   ;;  %vm306_vm0 = vmmov 0   ;;  %vm113_vm1 = vcmask 1041408   ;;  %vm91_vm2 = vcmask 293888   ;;  %s430_s1 = inlined_call_operand.vmem [shape: bf16[36,4], index: 1, kind: input, shape index: {}]   ;;  %s431_s0 = inlined_call_operand.vmem [shape: bf16[112,36], index: 0, kind: input, shape index: {}]   ;;  %s432_s2 = inlined_call_operand.vmem [shape: f32[1,4], index: 2, kind: input, shape index: {}]   ;;  %s433_s3 = inlined_call_operand.vmem [shape: f32[112,4], index: 3, kind: output, shape index: {}]  }
   0x1   :  { %253 = vmatprep.subr.bf16.mxu0 %v305_v0  ;;  %v295_v1 = vld [vmem:[%s430_s1] sm:$0xff]   ;;  %287 = vmatprep.subr.bf16.mxu1 %v305_v0  ;;  %v296_v2 = vld [vmem:[%s430_s1 + $0x8] sm:$0xff]   ;;  %v297_v3 = vld [vmem:[%s430_s1 + $0x10] ss:$0 sps:$4 sm:$0x33]   ;;  %vm206_vm3 = vcmask 31744  }
   0x2   :  { %259 = vmatprep.mubr.msk.bf16.mxu0 %vm306_vm0, %v305_v0  ;;  %275 = vmatprep.mubr.msk.bf16.mxu1 %vm306_vm0, %v305_v0  ;;  %v115_v4 = vsel %vm113_vm1, %v297_v3, 0  ;;  %v298_v5 = vld [vmem:[%s431_s0] sm:$0xff]   ;;  %v300_v7 = vld [vmem:[%s431_s0 + $0x8] sm:$0xff]   ;;  %v302_v9 = vld [vmem:[%s431_s0 + $0x10] sm:$0xff]  }
   0x3   :  { %254 = vmatpush3.bf16.msra.mxu0 %v295_v1  ;;  %290 = vmatpush3.bf16.msra.mxu1 %v295_v1  ;;  %v299_v6 = vld [vmem:[%s431_s0 + $0x20] sm:$0xff]   ;;  %v301_v8 = vld [vmem:[%s431_s0 + $0x28] sm:$0xff]   ;;  %v303_v10 = vld [vmem:[%s431_s0 + $0x30] sm:$0xff]  }
   0x4   :  { %255 = vmatprep.subr.bf16.mxu0 %v305_v0  ;;  %288 = vmatprep.subr.bf16.mxu1 %v305_v0  ;;  %v304_v11 = vld [vmem:[%s431_s0 + $0x18] sm:$0xff]   ;;  %v225_v12 = vld [vmem:[%s432_s2] ss:$0 sm:$0xff] }
   0x7   :  { %256 = vmatpush3.bf16.msra.mxu0 %v296_v2  ;;  %291 = vmatpush3.bf16.msra.mxu1 %v296_v2 }
   0x8   :  { %257 = vmatprep.subr.bf16.mxu0 %v305_v0  ;;  %289 = vmatprep.subr.bf16.mxu1 %v305_v0 }
   0xb   :  { %258 = vmatpush3.bf16.msra.mxu0 %v115_v4  ;;  %292 = vmatpush3.bf16.msra.mxu1 %v115_v4 }
   0xe   :  { %260 = vmatmul.mubr.msk.bf16.vlgmr.msra.gmra.mrb[0].mxu0 %vm91_vm2, %v298_v5  ;;  %276 = vmatmul.mubr.msk.bf16.vlgmr.msra.gmra.mrb[0].mxu1 %vm91_vm2, %v299_v6 }
   0xf   :  { %263 = vmatprep.mubr.msk.bf16.mxu0 %vm306_vm0, %v305_v0  ;;  %279 = vmatprep.mubr.msk.bf16.mxu1 %vm306_vm0, %v305_v0 }
  0x16   :  { %264 = vmatmul.mubr.msk.bf16.gmra.mrb[4].mxu0 %vm91_vm2, %v300_v7  ;;  %280 = vmatmul.mubr.msk.bf16.gmra.mrb[4].mxu1 %vm91_vm2, %v301_v8 }
  0x17   :  { %267 = vmatprep.mubr.msk.bf16.mxu0 %vm306_vm0, %v305_v0  ;;  %283 = vmatprep.mubr.msk.bf16.mxu1 %vm306_vm0, %v305_v0 }
  0x1e   :  { %268 = vmatmul.mubr.msk.bf16.gmra.mrb[8].mxu0 %vm91_vm2, %v302_v9  ;;  %284 = vmatmul.mubr.msk.bf16.gmra.mrb[8].mxu1 %vm91_vm2, %v303_v10 }
  0x1f   :  { %271 = vmatprep.mubr.msk.bf16.mxu0 %vm306_vm0, %v305_v0 }
  0x26   :  { %272 = vmatmul.mubr.msk.bf16.gmra.mrb[12].mxu0 %vm91_vm2, %v304_v11 }
  0xe1   :  { %v151_v13 = vpop.f32.mrb[0].mxu0  ;;  %v183_v14 = vpop.f32.mrb[0].mxu1 }
  0xe2   :  { %v152_v15 = vadd.f32 %v225_v12, %v151_v13  ;;  %v261_v16 = vpop.f32.mrb[1].mxu0  ;;  %v184_v17 = vadd.f32 %v225_v12, %v183_v14  ;;  %v277_v18 = vpop.f32.mrb[1].mxu1 }
  0xe3   :  { %v154_v19 = vpop.f32.mrb[2].mxu0  ;;  %v186_v20 = vpop.f32.mrb[2].mxu1 }
  0xe4   :  { %207 = vst.msk [vmem:[%s433_s3] sm:$0xff] %vm206_vm3, %v152_v15  ;;  %v155_v21 = vadd.f32 %v225_v12, %v154_v19  ;;  %v262_v22 = vpop.f32.mrb[3].mxu0  ;;  %215 = vst.msk [vmem:[%s433_s3 + $0x40] sm:$0xff] %vm206_vm3, %v184_v17  ;;  %v187_v23 = vadd.f32 %v225_v12, %v186_v20  ;;  %v278_v24 = vpop.f32.mrb[3].mxu1 }
  0xe6   :  { %208 = vst.msk [vmem:[%s433_s3 + $0x8] sm:$0xff] %vm206_vm3, %v155_v21  ;;  %216 = vst.msk [vmem:[%s433_s3 + $0x48] sm:$0xff] %vm206_vm3, %v187_v23 }
  0xe9   :  { %v159_v25 = vpop.f32.mrb[4].mxu0  ;;  %v191_v26 = vpop.f32.mrb[4].mxu1 }
  0xea   :  { %v160_v27 = vadd.f32 %v225_v12, %v159_v25  ;;  %v265_v28 = vpop.f32.mrb[5].mxu0  ;;  %v192_v29 = vadd.f32 %v225_v12, %v191_v26  ;;  %v281_v30 = vpop.f32.mrb[5].mxu1 }
  0xeb   :  { %v162_v31 = vpop.f32.mrb[6].mxu0  ;;  %v194_v32 = vpop.f32.mrb[6].mxu1 }
  0xec   :  { %209 = vst.msk [vmem:[%s433_s3 + $0x10] sm:$0xff] %vm206_vm3, %v160_v27  ;;  %v163_v33 = vadd.f32 %v225_v12, %v162_v31  ;;  %v266_v34 = vpop.f32.mrb[7].mxu0  ;;  %217 = vst.msk [vmem:[%s433_s3 + $0x50] sm:$0xff] %vm206_vm3, %v192_v29  ;;  %v195_v35 = vadd.f32 %v225_v12, %v194_v32  ;;  %v282_v36 = vpop.f32.mrb[7].mxu1 }
  0xee   :  { %210 = vst.msk [vmem:[%s433_s3 + $0x18] sm:$0xff] %vm206_vm3, %v163_v33  ;;  %218 = vst.msk [vmem:[%s433_s3 + $0x58] sm:$0xff] %vm206_vm3, %v195_v35 }
  0xf1   :  { %v167_v37 = vpop.f32.mrb[8].mxu0  ;;  %v199_v38 = vpop.f32.mrb[8].mxu1 }
  0xf2   :  { %v168_v39 = vadd.f32 %v225_v12, %v167_v37  ;;  %v269_v40 = vpop.f32.mrb[9].mxu0  ;;  %v200_v41 = vadd.f32 %v225_v12, %v199_v38  ;;  %v285_v42 = vpop.f32.mrb[9].mxu1 }
  0xf3   :  { %v170_v43 = vpop.f32.mrb[10].mxu0  ;;  %v202_v44 = vpop.f32.mrb[10].mxu1 }
  0xf4   :  { %211 = vst.msk [vmem:[%s433_s3 + $0x20] sm:$0xff] %vm206_vm3, %v168_v39  ;;  %v171_v45 = vadd.f32 %v225_v12, %v170_v43  ;;  %v270_v46 = vpop.f32.mrb[11].mxu0  ;;  %219 = vst.msk [vmem:[%s433_s3 + $0x60] sm:$0xff] %vm206_vm3, %v200_v41  ;;  %v203_v47 = vadd.f32 %v225_v12, %v202_v44  ;;  %v286_v48 = vpop.f32.mrb[11].mxu1 }
  0xf6   :  { %212 = vst.msk [vmem:[%s433_s3 + $0x28] sm:$0xff] %vm206_vm3, %v171_v45  ;;  %220 = vst.msk [vmem:[%s433_s3 + $0x68] sm:$0xff] %vm206_vm3, %v203_v47 }
  0xf9   :  { %v175_v49 = vpop.f32.mrb[12].mxu0 }
  0xfa   :  { %v176_v50 = vadd.f32 %v225_v12, %v175_v49  ;;  %v273_v51 = vpop.f32.mrb[13].mxu0 }
  0xfb   :  { %v178_v52 = vpop.f32.mrb[14].mxu0 }
  0xfc   :  { %213 = vst.msk [vmem:[%s433_s3 + $0x30] sm:$0xff] %vm206_vm3, %v176_v50  ;;  %v179_v53 = vadd.f32 %v225_v12, %v178_v52  ;;  %v274_v54 = vpop.f32.mrb[15].mxu0 }
  0xfe   :  { %214 = vst.msk [vmem:[%s433_s3 + $0x38] sm:$0xff] %vm206_vm3, %v179_v53 }

// kernel: compressed_residual_attention_block.5
= control target key start
LH: loop header
LB: loop body
LE: loop exit
PB: predicated region body
PF: predicated region fallthrough
CT: control target
= control target key end

     0   :  { %s3735_s27 = smov 0   ;;  %s4332_s0 = inlined_call_operand.vmem [shape: f32[2,49,4], index: 0, kind: input, shape index: {}]   ;;  %s4333_s1 = inlined_call_operand.vmem [shape: f32[2,16,256], index: 1, kind: input, shape index: {}]   ;;  %s4334_s2 = inlined_call_operand.vmem [shape: f32[2,16,256], index: 2, kind: input, shape index: {}]   ;;  %s4335_s3 = inlined_call_operand.vmem [shape: bf16[9,4,4], index: 3, kind: input, shape index: {}]   ;;  %s4336_s4 = inlined_call_operand.vmem [shape: f32[1,4], index: 4, kind: input, shape index: {}]   ;;  %s4337_s5 = inlined_call_operand.vmem [shape: bf16[9,4,4], index: 5, kind: input, shape index: {}]   ;;  %s4338_s6 = inlined_call_operand.vmem [shape: f32[1,4], index: 6, kind: input, shape index: {}]   ;;  %s4339_s7 = inlined_call_operand.vmem [shape: bf16[9,4,4], index: 7, kind: input, shape index: {}]   ;;  %s4340_s8 = inlined_call_operand.vmem [shape: f32[1,4], index: 8, kind: input, shape index: {}]   ;;  %s4341_s9 = inlined_call_operand.vmem [shape: bf16[4,16], index: 9, kind: input, shape index: {}]   ;;  %s4342_s10 = inlined_call_operand.vmem [shape: f32[16,1], index: 10, kind: input, shape index: {}]   ;;  %s4343_s11 = inlined_call_operand.vmem [shape: bf16[16,256], index: 11, kind: input, shape index: {}]   ;;  %s4344_s12 = inlined_call_operand.vmem [shape: f32[256,16], index: 12, kind: input, shape index: {}]   ;;  %s4345_s13 = inlined_call_operand.vmem [shape: f32[16,256], index: 13, kind: input, shape index: {}]   ;;  %s4346_s14 = inlined_call_operand.vmem [shape: f32[16,4], index: 14, kind: input, shape index: {}]   ;;  %s4347_s15 = inlined_call_operand.vmem [shape: f32[1,4], index: 15, kind: input, shape index: {}]   ;;  %s4348_s16 = inlined_call_operand.vmem [shape: f32[4,16], index: 16, kind: input, shape index: {}]   ;;  %s4349_s17 = inlined_call_operand.vmem [shape: f32[1,16], index: 17, kind: input, shape index: {}]   ;;  %s4350_s18 = inlined_call_operand.vmem [shape: f32[2,16,256], index: 18, kind: output, shape index: {}]  }
   0x1   :  { %4351 = sst [smem:[#allocation3_spill]] %s4332_s0 }
   0x2   :  { %4352 = sst [smem:[#allocation4_spill]] %s4333_s1 }
   0x3   :  { %4353 = sst [smem:[#allocation5_spill]] %s4334_s2 }
   0x4 LB: > { %s3011_s28 = sadd.s32 4294967295, %s3631_s27   ;;  %p3015_p0 = scmp.ge.s32.totalorder %s3631_s27, 1  ;;  %s3631_s27 = sphi %s3735_s27, %s28_s27  }
   0x5   : > { %p532_p1 = scmp.lt.s32.totalorder %s3631_s27, 3 }
   0x7   : > { %p533_p2 = pnand %p3015_p0, %p532_p1 }
   0x8   : > { %p596_p3 = scmp.lt.s32.totalorder (!%p533_p2), %s3011_s28, 1  ;;  %vm714_vm0 = vcmask (!%p533_p2), 92160   ;;  %v726_v0 = vld [vmem:[%s4335_s3] sm:$0x3] (!%p533_p2)  ;;  %v3633_v1 = vmov (!%p533_p2), 0.0   ;;  %vm731_vm1 = vcmask (!%p533_p2), 1041408  }
   0x9   : > { %536 = sbr.rel (%p533_p2) target bundleno = 3622 (0xe26), region = 92  ;;  %715 = vst.msk [vmem:[#allocation2] sm:$0x7] (!%p533_p2), %vm714_vm0, %v3633_v1  ;;  %3225 = vmatprep.subr.bf16.mxu0 (!%p533_p2), %v3633_v1  ;;  %3279 = vmatprep.subr.bf16.mxu1 (!%p533_p2), %v3633_v1  ;;  %v733_v2 = vsel (!%p533_p2), %vm731_vm1, %v726_v0, 0  ;;  %vm3634_vm2 = vmmov (!%p533_p2), 0   ;;  %s4354_s20 = sld [smem:[#allocation3_spill]] (!%p533_p2) }
   0xa   : > { %3227 = vmatprep.mubr.msk.bf16.mxu0 (!%p533_p2), %vm3634_vm2, %v3633_v1  ;;  %3281 = vmatprep.mubr.msk.bf16.mxu1 (!%p533_p2), %vm3634_vm2, %v3633_v1  ;;  %vm727_vm3 = vcmask (!%p533_p2), 31744   ;;  %s3635_s23 = smov (!%p533_p2), 120   ;;  %s3636_s24 = smov (!%p533_p2), 4   ;;  %vm720_vm4 = vcmask (!%p533_p2), 57376   ;;  %vm2185_vm5 = vcmask (!%p533_p2), 7168   ;;  %vm2192_vm6 = vcmask (!%p533_p2), 1040384  }
   0xb   : > { %3226 = vmatpush3.bf16.msra.mxu0 (!%p533_p2), %v733_v2  ;;  %s3637_s25 = smov (!%p533_p2), 124   ;;  %vm2288_vm7 = vcmask (!%p533_p2), 130048   ;;  %s4355_s30 = sld [smem:[#allocation5_spill]] (!%p533_p2)  ;;  %vm2754_vm10 = vcmask (!%p533_p2), 1043456  }
   0xc   : > { %3231 = vmatprep.subr.bf16.mxu0 (!%p533_p2), %v3633_v1  ;;  %s4356_s19 = sld [smem:[#allocation4_spill]] (!%p533_p2) }
  0x10   : > { %s4358_s28 = smov (!%p596_p3, %s3011_s28), 1 }
  0x11   : > { %s3584_s0 = smul.u32 56, %s4358_s28  ;;  %s4227_s2 = sshll.u32 %s4358_s28, 5 }
  0x12   : > { %s605_s1 = scalar_lea.vmem %s4356_s19, %s4227_s2 }
  0x13   : > { %s3762_s21 = scalar_lea.vmem %s4354_s20, %s3584_s0  ;;  %s610_s0 = scalar_lea.vmem %s4355_s30, %s4227_s2 }
  0x14   : > { %v617_v3 = vld [vmem:[%s3762_s21] sm:$0x1]  ;;  %v618_v4 = vld [vmem:[%s3762_s21 + $0x1] sm:$0x1]  ;;  %v619_v5 = vld [vmem:[%s3762_s21 + $0x2] sm:$0x1]  ;;  %s615_s30 = scalar_lea.vmem %s4350_s18, %s4227_s2 }
  0x15   : > { %v620_v6 = vld [vmem:[%s3762_s21 + $0x3] sm:$0x1]  ;;  %v621_v7 = vld [vmem:[%s3762_s21 + $0x4] sm:$0x1]  ;;  %v622_v8 = vld [vmem:[%s3762_s21 + $0x5] sm:$0x1]  ;;  %v666_v18 = vmax.f32 %v617_v3, %v618_v4 }
  0x16   : > { %v623_v9 = vld [vmem:[%s3762_s21 + $0x6] sm:$0x1]  ;;  %v624_v10 = vld [vmem:[%s3762_s21 + $0x7] sm:$0x1]  ;;  %v625_v11 = vld [vmem:[%s3762_s21 + $0x8] sm:$0x1]  ;;  %v667_v19 = vmax.f32 %v619_v5, %v620_v6  ;;  %v668_v20 = vmax.f32 %v621_v7, %v622_v8 }
  0x17   : > { %v626_v12 = vld [vmem:[%s3762_s21 + $0x9] sm:$0x1]  ;;  %v627_v13 = vld [vmem:[%s3762_s21 + $0xa] sm:$0x1]  ;;  %v628_v14 = vld [vmem:[%s3762_s21 + $0xb] sm:$0x1]  ;;  %v669_v24 = vmax.f32 %v623_v9, %v624_v10 }
  0x18   : > { %v629_v15 = vld [vmem:[%s3762_s21 + $0xc] sm:$0x1]  ;;  %v630_v16 = vld [vmem:[%s3762_s21 + $0xd] sm:$0x1]  ;;  %v631_v17 = vld [vmem:[%s3762_s21 + $0xe] sm:$0x1]  ;;  %v670_v25 = vmax.f32 %v625_v11, %v626_v12  ;;  %v671_v26 = vmax.f32 %v627_v13, %v628_v14  ;;  %v690_v42 = vmax.f32 %v666_v18, %v667_v19 }
  0x19   : > { %v632_v21 = vld [vmem:[%s3762_s21 + $0xf] sm:$0x1]  ;;  %v633_v22 = vld [vmem:[%s3762_s21 + $0x10] sm:$0x1]  ;;  %v634_v23 = vld [vmem:[%s3762_s21 + $0x11] sm:$0x1]  ;;  %v672_v27 = vmax.f32 %v629_v15, %v630_v16  ;;  %v691_v47 = vmax.f32 %v668_v20, %v669_v24 }
  0x1a   : > { %v635_v28 = vld [vmem:[%s3762_s21 + $0x12] sm:$0x1]  ;;  %v636_v29 = vld [vmem:[%s3762_s21 + $0x13] sm:$0x1]  ;;  %v637_v30 = vld [vmem:[%s3762_s21 + $0x14] sm:$0x1]  ;;  %v673_v31 = vmax.f32 %v631_v17, %v632_v21  ;;  %v674_v32 = vmax.f32 %v633_v22, %v634_v23  ;;  %v692_v48 = vmax.f32 %v670_v25, %v671_v26 }
  0x1b   : > { %v638_v33 = vld [vmem:[%s3762_s21 + $0x15] sm:$0x1]  ;;  %v639_v34 = vld [vmem:[%s3762_s21 + $0x16] sm:$0x1]  ;;  %v640_v35 = vld [vmem:[%s3762_s21 + $0x17] sm:$0x1]  ;;  %v675_v36 = vmax.f32 %v635_v28, %v636_v29  ;;  %v702_v9 = vmax.f32 %v690_v42, %v691_v47 }
  0x1c   : > { %v641_v37 = vld [vmem:[%s3762_s21 + $0x18] sm:$0x1]  ;;  %v642_v38 = vld [vmem:[%s3762_s21 + $0x19] sm:$0x1]  ;;  %v643_v39 = vld [vmem:[%s3762_s21 + $0x1a] sm:$0x1]  ;;  %v676_v40 = vmax.f32 %v637_v30, %v638_v33  ;;  %v677_v41 = vmax.f32 %v639_v34, %v640_v35  ;;  %v693_v49 = vmax.f32 %v672_v27, %v673_v31 }
  0x1d   : > { %v644_v43 = vld [vmem:[%s3762_s21 + $0x1b] sm:$0x1]  ;;  %v645_v44 = vld [vmem:[%s3762_s21 + $0x1c] sm:$0x1]  ;;  %v646_v45 = vld [vmem:[%s3762_s21 + $0x1d] sm:$0x1]  ;;  %v678_v46 = vmax.f32 %v641_v37, %v642_v38  ;;  %v694_v55 = vmax.f32 %v674_v32, %v675_v36 }
  0x1e   : > { %v647_v50 = vld [vmem:[%s3762_s21 + $0x1e] sm:$0x1]  ;;  %v648_v51 = vld [vmem:[%s3762_s21 + $0x1f] sm:$0x1]  ;;  %v649_v52 = vld [vmem:[%s3762_s21 + $0x20] sm:$0x1]  ;;  %v679_v53 = vmax.f32 %v643_v39, %v644_v43  ;;  %v680_v54 = vmax.f32 %v645_v44, %v646_v45  ;;  %v695_v56 = vmax.f32 %v676_v40, %v677_v41  ;;  %v703_v10 = vmax.f32 %v692_v48, %v693_v49 }
  0x1f   : > { %v650_v57 = vld [vmem:[%s3762_s21 + $0x21] sm:$0x1]  ;;  %v651_v58 = vld [vmem:[%s3762_s21 + $0x22] sm:$0x1]  ;;  %v652_v59 = vld [vmem:[%s3762_s21 + $0x23] sm:$0x1]  ;;  %v681_v60 = vmax.f32 %v647_v50, %v648_v51 }
  0x20   : > { %v653_v61 = vld [vmem:[%s3762_s21 + $0x24] sm:$0x1]  ;;  %v654_v62 = vld [vmem:[%s3762_s21 + $0x25] sm:$0x1]  ;;  %v655_v63 = vld [vmem:[%s3762_s21 + $0x26] sm:$0x1]  ;;  %v682_v0 = vmax.f32 %v649_v52, %v650_v57  ;;  %v683_v2 = vmax.f32 %v651_v58, %v652_v59  ;;  %v696_v3 = vmax.f32 %v678_v46, %v679_v53  ;;  %v704_v17 = vmax.f32 %v694_v55, %v695_v56 }
  0x21   : > { %v656_v4 = vld [vmem:[%s3762_s21 + $0x27] sm:$0x1]  ;;  %v657_v5 = vld [vmem:[%s3762_s21 + $0x28] sm:$0x1]  ;;  %v658_v6 = vld [vmem:[%s3762_s21 + $0x29] sm:$0x1]  ;;  %v684_v7 = vmax.f32 %v653_v61, %v654_v62  ;;  %v697_v8 = vmax.f32 %v680_v54, %v681_v60  ;;  %v708_v33 = vmax.f32 %v702_v9, %v703_v10  ;;  %v1190_v10 = vlaneseq }
  0x22   : > { %v659_v11 = vld [vmem:[%s3762_s21 + $0x2a] sm:$0x1]  ;;  %v660_v12 = vld [vmem:[%s3762_s21 + $0x2b] sm:$0x1]  ;;  %v661_v13 = vld [vmem:[%s3762_s21 + $0x2c] sm:$0x1]  ;;  %v685_v14 = vmax.f32 %v655_v63, %v656_v4  ;;  %v686_v15 = vmax.f32 %v657_v5, %v658_v6  ;;  %v698_v16 = vmax.f32 %v682_v0, %v683_v2 }
  0x23   : > { %v662_v18 = vld [vmem:[%s3762_s21 + $0x2d] sm:$0x1]  ;;  %v663_v19 = vld [vmem:[%s3762_s21 + $0x2e] sm:$0x1]  ;;  %v664_v20 = vld [vmem:[%s3762_s21 + $0x2f] sm:$0x1]  ;;  %v687_v21 = vmax.f32 %v659_v11, %v660_v12  ;;  %v705_v22 = vmax.f32 %v696_v3, %v697_v8 }
  0x24   : > { %v688_v23 = vmax.f32 %v661_v13, %v662_v18  ;;  %v689_v24 = vmax.f32 %v663_v19, %v664_v20  ;;  %v699_v25 = vmax.f32 %v684_v7, %v685_v14  ;;  %v724_v26 = vld [vmem:[#allocation2] sm:$0x1]  ;;  %v3024_v27 = vld [vmem:[%s4335_s3 + $0x2] sm:$0x3]  ;;  %v3026_v42 = vld [vmem:[%s4335_s3 + $0x4] sm:$0x3] }
  0x25   : > { %v700_v28 = vmax.f32 %v686_v15, %v687_v21  ;;  %v725_v29 = vpack.c.bf16 %v724_v26, %v724_v26  ;;  %v785_v30 = vsel %vm731_vm1, %v3024_v27, 0  ;;  %v709_v34 = vmax.f32 %v704_v17, %v705_v22  ;;  %v665_v36 = vld [vmem:[%s3762_s21 + $0x30] sm:$0x1]  ;;  %v1033_v46 = vld [vmem:[#allocation2 + $0x2] sm:$0x1] }
  0x26   : > { %v701_v31 = vmax.f32 %v688_v23, %v689_v24  ;;  %v706_v32 = vmax.f32 %v698_v16, %v699_v25  ;;  %v836_v43 = vsel %vm731_vm1, %v3026_v42, 0  ;;  %v1034_v48 = vpack.c.bf16 %v1033_v46, %v1033_v46  ;;  %v3028_v49 = vld [vmem:[%s4335_s3 + $0x6] sm:$0x3]  ;;  %v3030_v52 = vld [vmem:[%s4335_s3 + $0x8] sm:$0x3] }
  0x27   : > { %830 = vrot.lane.b32.xlu1 %v725_v29, %s3635_s23  ;;  %3228 = vmatmul.mubr.msk.bf16.vlgmr.msra.gmra.mrb[0].mxu0 %vm727_vm3, %v725_v29  ;;  %v711_v38 = vmax.f32 %v708_v33, %v709_v34  ;;  %v887_v51 = vsel %vm731_vm1, %v3028_v49, 0  ;;  %v939_v53 = vsel %vm731_vm1, %v3030_v52, 0  ;;  %v3032_v56 = vld [vmem:[%s4335_s3 + $0xa] sm:$0x3]  ;;  %v3034_v59 = vld [vmem:[%s4335_s3 + $0xc] sm:$0x3] }
  0x28   : > { %v707_v35 = vmax.f32 %v700_v28, %v701_v31  ;;  %3232 = vmatpush3.bf16.msra.mxu0 %v785_v30  ;;  %3233 = vmatprep.mubr.msk.bf16.mxu0 %vm3634_vm2, %v3633_v1  ;;  %v990_v57 = vsel %vm731_vm1, %v3032_v56, 0  ;;  %v1041_v60 = vsel %vm731_vm1, %v3034_v59, 0  ;;  %v3036_v62 = vld [vmem:[%s4335_s3 + $0xe] sm:$0x3]  ;;  %v3038_v0 = vld [vmem:[%s4335_s3 + $0x10] sm:$0x3] }
  0x29   : > { %3237 = vmatprep.subr.bf16.mxu0 %v3633_v1  ;;  %v1093_v63 = vsel %vm731_vm1, %v3036_v62, 0  ;;  %v1144_v3 = vsel %vm731_vm1, %v3038_v0, 0  ;;  %v1202_v5 = vld [vmem:[%s4337_s5] sm:$0x3]  ;;  %v3041_v6 = vld [vmem:[%s4337_s5 + $0x2] sm:$0x3] }
  0x2a   : > { %v710_v37 = vmax.f32 %v706_v32, %v707_v35  ;;  %v1207_v7 = vsel %vm731_vm1, %v1202_v5, 0  ;;  %v1259_v8 = vsel %vm731_vm1, %v3041_v6, 0  ;;  %v3043_v11 = vld [vmem:[%s4337_s5 + $0x4] sm:$0x3]  ;;  %v1191_v13 = vshrl.u32 %v1190_v10, 7 }
  0x2b   : > { %3280 = vmatpush3.bf16.msra.mxu1 %v1207_v7  ;;  %v1310_v12 = vsel %vm731_vm1, %v3043_v11, 0  ;;  %v722_v14 = vld [vmem:[%s4336_s4] sm:$0x1]  ;;  %v3045_v24 = vld [vmem:[%s4337_s5 + $0x6] sm:$0x3] }
  0x2c   : > { %v712_v39 = vmax.f32 %v710_v37, %v665_v36  ;;  %3285 = vmatprep.subr.bf16.mxu1 %v3633_v1  ;;  %v3915_v17 = vsub.s32 0, %v1191_v13  ;;  %v1361_v25 = vsel %vm731_vm1, %v3045_v24, 0  ;;  %v3047_v31 = vld [vmem:[%s4337_s5 + $0x8] sm:$0x3]  ;;  %v3049_v35 = vld [vmem:[%s4337_s5 + $0xa] sm:$0x3] }
  0x2d   : > { %v1413_v32 = vsel %vm731_vm1, %v3047_v31, 0  ;;  %v1464_v36 = vsel %vm731_vm1, %v3049_v35, 0  ;;  %v3060_v52 = vld [vmem:[%s4339_s7 + $0x4] sm:$0x3]  ;;  %v3064_v7 = vld [vmem:[%s4339_s7 + $0x8] sm:$0x3] }
  0x2e   : > { %v713_v40 = vmax.f32 %v711_v38, %v712_v39  ;;  %v3051_v38 = vld [vmem:[%s4337_s5 + $0xc] sm:$0x3]  ;;  %v1672_v24 = vld [vmem:[%s4340_s8] sm:$0x1] }
  0x2f   : > { %v1515_v39 = vsel %vm731_vm1, %v3051_v38, 0  ;;  %v2183_v31 = vld [vmem:[%s4342_s10] sm:$0xff] }
  0x30   : > { %717 = vrot.lane.b32.xlu0 %v713_v40, %s3636_s24  ;;  %v3600_v38 = vld [vmem:[%s4343_s11] ss:$8 sps:$4 sm:$0xff]  }
  0x34   : > { %779 = vrot.lane.b32.xlu0 %v725_v29, %s3637_s25 }
  0x99   : > { %v831_v50 = vpop.permute.xlu1 %830 }
  0xa2   : > { %v718_v41 = vpop.permute.xlu0 %717 }
  0xa3   : > { %721 = vst.msk [vmem:[#allocation2 + $0x1] sm:$0x1] %vm720_vm4, %v718_v41  ;;  %v3053_v41 = vld [vmem:[%s4337_s5 + $0xe] sm:$0x3] }
  0xa4   : > { %v1567_v42 = vsel %vm731_vm1, %v3053_v41, 0 }
  0xa6   : > { %v780_v44 = vpop.permute.xlu0 %779 }
  0xa7   : > { %3234 = vmatmul.mubr.msk.bf16.vlgmr.msra.gmra.mrb[0].mxu0 %vm727_vm3, %v780_v44 }
  0xa8   : > { %3238 = vmatpush3.bf16.msra.mxu0 %v836_v43  ;;  %3239 = vmatprep.mubr.msk.bf16.mxu0 %vm3634_vm2, %v3633_v1  ;;  %v3055_v43 = vld [vmem:[%s4337_s5 + $0x10] sm:$0x3] }
  0xa9   : > { %3243 = vmatprep.subr.bf16.mxu0 %v3633_v1 }
  0xaa   : > { %v879_v45 = vld [vmem:[#allocation2 + $0x1] sm:$0x1] }
  0xab   : > { %v880_v47 = vpack.c.bf16 %v879_v45, %v879_v45  ;;  %1188 = vst.msk [vmem:[#allocation2] sm:$0x7] %vm714_vm0, %v3633_v1  ;;  %v1618_v45 = vsel %vm731_vm1, %v3055_v43, 0  ;;  %v2397_v43 = vld [vmem:[%s4344_s12 + $0x80] sm:$0xff] }
  0xad   : > { %984 = vrot.lane.b32.xlu0 %v880_v47, %s3635_s23  ;;  %933 = vrot.lane.b32.xlu1 %v880_v47, %s3637_s25 }
  0xb1   : > { %1087 = vrot.lane.b32.xlu1 %v1034_v48, %s3637_s25  ;;  %1138 = vrot.lane.b32.xlu0 %v1034_v48, %s3635_s23 }
  0xb2   : > { %v1200_v54 = vld [vmem:[#allocation2] sm:$0x1]  ;;  %v1507_v28 = vld [vmem:[#allocation2 + $0x2] sm:$0x1] }
  0xb3   : > { %3240 = vmatmul.mubr.msk.bf16.vlgmr.msra.gmra.mrb[0].mxu0 %vm727_vm3, %v831_v50  ;;  %v1201_v55 = vpack.c.bf16 %v1200_v54, %v1200_v54  ;;  %v1508_v30 = vpack.c.bf16 %v1507_v28, %v1507_v28  ;;  %v1198_v54 = vld [vmem:[%s4338_s6] sm:$0x1] }
  0xb4   : > { %3244 = vmatpush3.bf16.msra.mxu0 %v887_v51  ;;  %3245 = vmatprep.mubr.msk.bf16.mxu0 %vm3634_vm2, %v3633_v1 }
  0xb5   : > { %3249 = vmatprep.subr.bf16.mxu0 %v3633_v1  ;;  %1253 = vrot.lane.b32.xlu0 %v1201_v55, %s3637_s25 }
  0xb6   : > { %3282 = vmatmul.mubr.msk.bf16.vlgmr.msra.gmra.mrb[0].mxu1 %vm727_vm3, %v1201_v55 }
  0xb7   : > { %3286 = vmatpush3.bf16.msra.mxu1 %v1259_v8  ;;  %3287 = vmatprep.mubr.msk.bf16.mxu1 %vm3634_vm2, %v3633_v1  ;;  %v1887_v8 = vsel %vm731_vm1, %v3064_v7, 0  ;;  %v2389_v7 = vld [vmem:[%s4344_s12 + $0x40] sm:$0xff] }
  0xb8   : > { %3291 = vmatprep.subr.bf16.mxu1 %v3633_v1 }
  0xbf   : > { %3246 = vmatmul.mubr.msk.bf16.vlgmr.msra.gmra.mrb[0].mxu0 %vm727_vm3, %v880_v47  ;;  %v1676_v47 = vld [vmem:[%s4339_s7] sm:$0x3] }
  0xc0   : > { %3250 = vmatpush3.bf16.msra.mxu0 %v939_v53  ;;  %3251 = vmatprep.mubr.msk.bf16.mxu0 %vm3634_vm2, %v3633_v1  ;;  %v1681_v49 = vsel %vm731_vm1, %v1676_v47, 0  ;;  %v1784_v53 = vsel %vm731_vm1, %v3060_v52, 0  ;;  %v2382_v47 = vld [vmem:[%s4344_s12 + $0x8] sm:$0xff]  ;;  %v2383_v52 = vld [vmem:[%s4344_s12 + $0x10] sm:$0xff] }
  0xc1   : > { %3255 = vmatprep.subr.bf16.mxu0 %v3633_v1 }
 0x11f   : > { %v934_v58 = vpop.permute.xlu1 %933  ;;  %v985_v61 = vpop.permute.xlu0 %984 }
 0x120   : > { %3252 = vmatmul.mubr.msk.bf16.vlgmr.msra.gmra.mrb[0].mxu0 %vm727_vm3, %v934_v58 }
 0x121   : > { %3256 = vmatpush3.bf16.msra.mxu0 %v990_v57  ;;  %3257 = vmatprep.mubr.msk.bf16.mxu0 %vm3634_vm2, %v3633_v1 }
 0x122   : > { %3261 = vmatprep.subr.bf16.mxu0 %v3633_v1 }
 0x123   : > { %v1088_v2 = vpop.permute.xlu1 %1087  ;;  %v1139_v4 = vpop.permute.xlu0 %1138 }
 0x127   : > { %v1254_v9 = vpop.permute.xlu0 %1253 }
 0x128   : > { %3288 = vmatmul.mubr.msk.bf16.vlgmr.msra.gmra.mrb[0].mxu1 %vm727_vm3, %v1254_v9  ;;  %v3066_v9 = vld [vmem:[%s4339_s7 + $0xa] sm:$0x3] }
 0x129   : > { %3293 = vmatprep.mubr.msk.bf16.mxu1 %vm3634_vm2, %v3633_v1  ;;  %3292 = vmatpush3.bf16.msra.mxu1 %v1310_v12  ;;  %v1938_v10 = vsel %vm731_vm1, %v3066_v9, 0  ;;  %v3068_v12 = vld [vmem:[%s4339_s7 + $0xc] sm:$0x3]  ;;  %v2407_v9 = vld [vmem:[%s4344_s12 + $0xd0] sm:$0xff] }
 0x12a   : > { %3297 = vmatprep.subr.bf16.mxu1 %v3633_v1  ;;  %v1989_v13 = vsel %vm731_vm1, %v3068_v12, 0  ;;  %v2391_v12 = vld [vmem:[%s4344_s12 + $0x50] sm:$0xff] }
 0x12c   : > { %3258 = vmatmul.mubr.msk.bf16.vlgmr.msra.gmra.mrb[0].mxu0 %vm727_vm3, %v985_v61 }
 0x12d   : > { %3262 = vmatpush3.bf16.msra.mxu0 %v1041_v60  ;;  %3263 = vmatprep.mubr.msk.bf16.mxu0 %vm3634_vm2, %v3633_v1 }
 0x12e   : > { %3267 = vmatprep.subr.bf16.mxu0 %v3633_v1 }
 0x138   : > { %3264 = vmatmul.mubr.msk.bf16.vlgmr.msra.gmra.mrb[0].mxu0 %vm727_vm3, %v1034_v48  ;;  %v3058_v48 = vld [vmem:[%s4339_s7 + $0x2] sm:$0x3] }
 0x139   : > { %3268 = vmatpush3.bf16.msra.mxu0 %v1093_v63  ;;  %3269 = vmatprep.mubr.msk.bf16.mxu0 %vm3634_vm2, %v3633_v1  ;;  %v1733_v50 = vsel %vm731_vm1, %v3058_v48, 0  ;;  %v3062_v63 = vld [vmem:[%s4339_s7 + $0x6] sm:$0x3] }
 0x13a   : > { %3273 = vmatprep.subr.bf16.mxu0 %v3633_v1  ;;  %v1835_v0 = vsel %vm731_vm1, %v3062_v63, 0 }
 0x144   : > { %3270 = vmatmul.mubr.msk.bf16.vlgmr.msra.gmra.mrb[0].mxu0 %vm727_vm3, %v1088_v2 }
 0x145   : > { %3274 = vmatpush3.bf16.msra.mxu0 %v1144_v3  ;;  %3275 = vmatprep.mubr.msk.bf16.mxu0 %vm3634_vm2, %v3633_v1 }
 0x146   : > { %3333 = vmatprep.subr.bf16.mxu0 %v3633_v1 }
 0x150   : > { %3276 = vmatmul.mubr.msk.bf16.vlgmr.msra.gmra.mrb[0].mxu0 %vm727_vm3, %v1139_v4 }
 0x151   : > { %3335 = vmatprep.mubr.msk.bf16.mxu0 %vm3634_vm2, %v3633_v1  ;;  %3334 = vmatpush3.bf16.msra.mxu0 %v1681_v49  ;;  %v2399_v49 = vld [vmem:[%s4344_s12 + $0x90] sm:$0xff] }
 0x152   : > { %3339 = vmatprep.subr.bf16.mxu0 %v3633_v1 }
 0x223   : > { %v1180_v15 = vpop.f32.mrb[0].mxu0 }
 0x224   : > { %v3485_v16 = vadd.f32 %v1180_v15, %v722_v14  ;;  %v3277_v18 = vpop.f32.mrb[1].mxu0  ;;  %v3070_v15 = vld [vmem:[%s4339_s7 + $0xe] sm:$0x3] }
 0x225   : > { %v1183_v19 = vpop.f32.mrb[2].mxu0  ;;  %v3072_v18 = vld [vmem:[%s4339_s7 + $0x10] sm:$0x3] }
 0x226   : > { %v1187_v20 = vmax.f32 %v3485_v16, 0.0  ;;  %v3278_v21 = vpop.f32.mrb[3].mxu0  ;;  %v2041_v16 = vsel %vm731_vm1, %v3070_v15, 0  ;;  %v2409_v15 = vld [vmem:[%s4344_s12 + $0xe0] sm:$0xff] }
 0x228   : > { %v1193_v22 = vrot.slane %v1187_v20, %v3915_v17  ;;  %v2092_v20 = vsel %vm731_vm1, %v3072_v18, 0 }
 0x22a   : > { %1194 = vrot.lane.b32.xlu1 %v1193_v22, %s3636_s24  ;;  %v2136_v22 = vld [vmem:[%s4341_s9] sm:$0x3] }
 0x22e   : > { %1304 = vrot.lane.b32.xlu1 %v1201_v55, %s3635_s23 }
 0x29c   : > { %v1195_v23 = vpop.permute.xlu1 %1194 }
 0x29d   : > { %1197 = vst.msk [vmem:[#allocation2 + $0x1] sm:$0x1] %vm720_vm4, %v1195_v23  ;;  %v2141_v23 = vsel %vm731_vm1, %v2136_v22, 0  ;;  %v2411_v22 = vld [vmem:[%s4344_s12 + $0xf0] sm:$0xff] }
 0x2a0   : > { %v1305_v26 = vpop.permute.xlu1 %1304 }
 0x2a1   : > { %3294 = vmatmul.mubr.msk.bf16.vlgmr.msra.gmra.mrb[0].mxu1 %vm727_vm3, %v1305_v26 }
 0x2a2   : > { %3298 = vmatpush3.bf16.msra.mxu1 %v1361_v25  ;;  %3299 = vmatprep.mubr.msk.bf16.mxu1 %vm3634_vm2, %v3633_v1 }
 0x2a3   : > { %3303 = vmatprep.subr.bf16.mxu1 %v3633_v1 }
 0x2a4   : > { %v1353_v27 = vld [vmem:[#allocation2 + $0x1] sm:$0x1] }
 0x2a5   : > { %v1354_v29 = vpack.c.bf16 %v1353_v27, %v1353_v27  ;;  %1662 = vst.msk [vmem:[#allocation2] sm:$0x7] %vm714_vm0, %v3633_v1 }
 0x2a7   : > { %1458 = vrot.lane.b32.xlu1 %v1354_v29, %s3635_s23  ;;  %1407 = vrot.lane.b32.xlu0 %v1354_v29, %s3637_s25 }
 0x2ab   : > { %1561 = vrot.lane.b32.xlu0 %v1508_v30, %s3637_s25  ;;  %1612 = vrot.lane.b32.xlu1 %v1508_v30, %s3635_s23 }
 0x2ac   : > { %v1674_v33 = vld [vmem:[#allocation2] sm:$0x1]  ;;  %v1981_v4 = vld [vmem:[#allocation2 + $0x2] sm:$0x1] }
 0x2ad   : > { %3300 = vmatmul.mubr.msk.bf16.vlgmr.msra.gmra.mrb[0].mxu1 %vm727_vm3, %v1354_v29  ;;  %v1675_v34 = vpack.c.bf16 %v1674_v33, %v1674_v33  ;;  %v1982_v6 = vpack.c.bf16 %v1981_v4, %v1981_v4  ;;  %v2184_v33 = vld [vmem:[%s4342_s10 + $0x8] sm:$0xff]  ;;  %v2405_v4 = vld [vmem:[%s4344_s12 + $0xc0] sm:$0xff] }
 0x2ae   : > { %3304 = vmatpush3.bf16.msra.mxu1 %v1413_v32  ;;  %3305 = vmatprep.mubr.msk.bf16.mxu1 %vm3634_vm2, %v3633_v1 }
 0x2af   : > { %3309 = vmatprep.subr.bf16.mxu1 %v3633_v1  ;;  %1727 = vrot.lane.b32.xlu1 %v1675_v34, %s3637_s25 }
 0x2b0   : > { %3336 = vmatmul.mubr.msk.bf16.vlgmr.msra.gmra.mrb[4].mxu0 %vm727_vm3, %v1675_v34 }
 0x2b1   : > { %3340 = vmatpush3.bf16.msra.mxu0 %v1733_v50  ;;  %3341 = vmatprep.mubr.msk.bf16.mxu0 %vm3634_vm2, %v3633_v1  ;;  %v2400_v50 = vld [vmem:[%s4344_s12 + $0x98] sm:$0xff] }
 0x2b2   : > { %3345 = vmatprep.subr.bf16.mxu0 %v3633_v1 }
 0x319   : > { %v1408_v37 = vpop.permute.xlu0 %1407  ;;  %v1459_v40 = vpop.permute.xlu1 %1458 }
 0x31a   : > { %3306 = vmatmul.mubr.msk.bf16.vlgmr.msra.gmra.mrb[0].mxu1 %vm727_vm3, %v1408_v37  ;;  %v3602_v37 = vld [vmem:[%s4343_s11 + $0x4] ss:$8 sps:$4 sm:$0xff]  }
 0x31b   : > { %3310 = vmatpush3.bf16.msra.mxu1 %v1464_v36  ;;  %3311 = vmatprep.mubr.msk.bf16.mxu1 %vm3634_vm2, %v3633_v1 }
 0x31c   : > { %3315 = vmatprep.subr.bf16.mxu1 %v3633_v1 }
 0x31d   : > { %v1562_v44 = vpop.permute.xlu0 %1561  ;;  %v1613_v46 = vpop.permute.xlu1 %1612 }
 0x321   : > { %v1728_v51 = vpop.permute.xlu1 %1727 }
 0x322   : > { %3342 = vmatmul.mubr.msk.bf16.vlgmr.msra.gmra.mrb[4].mxu0 %vm727_vm3, %v1728_v51  ;;  %v4106_v51 = vpack.c.bf16 %v2400_v50, %v2399_v49 }
 0x323   : > { %3347 = vmatprep.mubr.msk.bf16.mxu0 %vm3634_vm2, %v3633_v1  ;;  %3346 = vmatpush3.bf16.msra.mxu0 %v1784_v53  ;;  %v2384_v53 = vld [vmem:[%s4344_s12 + $0x18] sm:$0xff] }
 0x324   : > { %3351 = vmatprep.subr.bf16.mxu0 %v3633_v1 }
 0x326   : > { %3312 = vmatmul.mubr.msk.bf16.vlgmr.msra.gmra.mrb[0].mxu1 %vm727_vm3, %v1459_v40 }
 0x327   : > { %3316 = vmatpush3.bf16.msra.mxu1 %v1515_v39  ;;  %3317 = vmatprep.mubr.msk.bf16.mxu1 %vm3634_vm2, %v3633_v1  ;;  %v3638_v39 = vmov 0  }
 0x328   : > { %3321 = vmatprep.subr.bf16.mxu1 %v3633_v1 }
 0x332   : > { %3318 = vmatmul.mubr.msk.bf16.vlgmr.msra.gmra.mrb[0].mxu1 %vm727_vm3, %v1508_v30 }
 0x333   : > { %3322 = vmatpush3.bf16.msra.mxu1 %v1567_v42  ;;  %3323 = vmatprep.mubr.msk.bf16.mxu1 %vm3634_vm2, %v3633_v1 }
 0x334   : > { %3327 = vmatprep.subr.bf16.mxu1 %v3633_v1 }
 0x33e   : > { %3324 = vmatmul.mubr.msk.bf16.vlgmr.msra.gmra.mrb[0].mxu1 %vm727_vm3, %v1562_v44  ;;  %v2398_v44 = vld [vmem:[%s4344_s12 + $0x88] sm:$0xff] }
 0x33f   : > { %3328 = vmatpush3.bf16.msra.mxu1 %v1618_v45  ;;  %3329 = vmatprep.mubr.msk.bf16.mxu1 %vm3634_vm2, %v3633_v1  ;;  %v4088_v45 = vpack.c.bf16 %v2398_v44, %v2397_v43 }
 0x340   : > { %3387 = vmatprep.subr.bf16.mxu1 %v3633_v1 }
 0x34a   : > { %3330 = vmatmul.mubr.msk.bf16.vlgmr.msra.gmra.mrb[0].mxu1 %vm727_vm3, %v1613_v46  ;;  %v2381_v46 = vld [vmem:[%s4344_s12] sm:$0xff] }
 0x34b   : > { %3389 = vmatprep.mubr.msk.bf16.mxu1 %vm3634_vm2, %v3633_v1  ;;  %3388 = vmatpush3.bf16.msra.mxu1 %v2141_v23  ;;  %v4096_v48 = vpack.c.bf16 %v2382_v47, %v2381_v46  ;;  %v2412_v23 = vld [vmem:[%s4344_s12 + $0xf8] sm:$0xff] }
 0x41d   : > { %v1654_v55 = vpop.f32.mrb[0].mxu1 }
 0x41e   : > { %v3486_v56 = vadd.f32 %v1654_v55, %v1198_v54  ;;  %v3331_v57 = vpop.f32.mrb[1].mxu1  ;;  %v4114_v54 = vpack.c.bf16 %v2384_v53, %v2383_v52  ;;  %v2401_v55 = vld [vmem:[%s4344_s12 + $0xa0] sm:$0xff] }
 0x41f   : > { %v1657_v58 = vpop.f32.mrb[2].mxu1 }
 0x420   : > { %v1661_v59 = vmax.f32 %v3486_v56, 0.0  ;;  %v3332_v60 = vpop.f32.mrb[3].mxu1  ;;  %v2402_v56 = vld [vmem:[%s4344_s12 + $0xa8] sm:$0xff]  ;;  %v2385_v58 = vld [vmem:[%s4344_s12 + $0x20] sm:$0xff] }
 0x421   : > { %v4124_v57 = vpack.c.bf16 %v2402_v56, %v2401_v55 }
 0x422   : > { %v1667_v61 = vrot.slane %v1661_v59, %v3915_v17  ;;  %v2386_v59 = vld [vmem:[%s4344_s12 + $0x28] sm:$0xff] }
 0x423   : > { %v4132_v60 = vpack.c.bf16 %v2386_v59, %v2385_v58 }
 0x424   : > { %1668 = vrot.lane.b32.xlu0 %v1667_v61, %s3636_s24  ;;  %v2403_v61 = vld [vmem:[%s4344_s12 + $0xb0] sm:$0xff] }
 0x428   : > { %1778 = vrot.lane.b32.xlu0 %v1675_v34, %s3635_s23 }
 0x496   : > { %v1669_v62 = vpop.permute.xlu0 %1668 }
 0x497   : > { %1671 = vst.msk [vmem:[#allocation2 + $0x1] sm:$0x1] %vm720_vm4, %v1669_v62  ;;  %v2404_v62 = vld [vmem:[%s4344_s12 + $0xb8] sm:$0xff] }
 0x498   : > { %v4142_v63 = vpack.c.bf16 %v2404_v62, %v2403_v61 }
 0x49a   : > { %v1779_v2 = vpop.permute.xlu0 %1778 }
 0x49b   : > { %3348 = vmatmul.mubr.msk.bf16.vlgmr.msra.gmra.mrb[4].mxu0 %vm727_vm3, %v1779_v2  ;;  %v2388_v2 = vld [vmem:[%s4344_s12 + $0x38] sm:$0xff] }
 0x49c   : > { %3352 = vmatpush3.bf16.msra.mxu0 %v1835_v0  ;;  %3353 = vmatprep.mubr.msk.bf16.mxu0 %vm3634_vm2, %v3633_v1  ;;  %v2387_v0 = vld [vmem:[%s4344_s12 + $0x30] sm:$0xff] }
 0x49d   : > { %3357 = vmatprep.subr.bf16.mxu0 %v3633_v1 }
 0x49e   : > { %v1827_v3 = vld [vmem:[#allocation2 + $0x1] sm:$0x1] }
 0x49f   : > { %v1828_v5 = vpack.c.bf16 %v1827_v3, %v1827_v3  ;;  %v4150_v3 = vpack.c.bf16 %v2388_v2, %v2387_v0  ;;  %v2359_v2 = vld [vmem:[%s605_s1] sm:$0xff] }
 0x4a1   : > { %1932 = vrot.lane.b32.xlu0 %v1828_v5, %s3635_s23  ;;  %1881 = vrot.lane.b32.xlu1 %v1828_v5, %s3637_s25 }
 0x4a5   : > { %2035 = vrot.lane.b32.xlu1 %v1982_v6, %s3637_s25  ;;  %2086 = vrot.lane.b32.xlu0 %v1982_v6, %s3635_s23 }
 0x4a7   : > { %3354 = vmatmul.mubr.msk.bf16.vlgmr.msra.gmra.mrb[4].mxu0 %vm727_vm3, %v1828_v5  ;;  %v2406_v5 = vld [vmem:[%s4344_s12 + $0xc8] sm:$0xff] }
 0x4a8   : > { %3358 = vmatpush3.bf16.msra.mxu0 %v1887_v8  ;;  %3359 = vmatprep.mubr.msk.bf16.mxu0 %vm3634_vm2, %v3633_v1  ;;  %v2390_v8 = vld [vmem:[%s4344_s12 + $0x48] sm:$0xff] }
 0x4a9   : > { %3363 = vmatprep.subr.bf16.mxu0 %v3633_v1 }
 0x513   : > { %v1882_v11 = vpop.permute.xlu1 %1881  ;;  %v1933_v14 = vpop.permute.xlu0 %1932 }
 0x514   : > { %3360 = vmatmul.mubr.msk.bf16.vlgmr.msra.gmra.mrb[4].mxu0 %vm727_vm3, %v1882_v11  ;;  %v2408_v11 = vld [vmem:[%s4344_s12 + $0xd8] sm:$0xff] }
 0x515   : > { %3364 = vmatpush3.bf16.msra.mxu0 %v1938_v10  ;;  %3365 = vmatprep.mubr.msk.bf16.mxu0 %vm3634_vm2, %v3633_v1  ;;  %v4171_v10 = vpack.c.bf16 %v2390_v8, %v2389_v7  ;;  %v2360_v7 = vld [vmem:[%s605_s1 + $0x8] sm:$0xff]  ;;  %v2362_v8 = vld [vmem:[%s605_s1 + $0x18] sm:$0xff] }
 0x516   : > { %3369 = vmatprep.subr.bf16.mxu0 %v3633_v1 }
 0x517   : > { %v2036_v19 = vpop.permute.xlu1 %2035  ;;  %v2087_v21 = vpop.permute.xlu0 %2086 }
 0x520   : > { %3366 = vmatmul.mubr.msk.bf16.vlgmr.msra.gmra.mrb[4].mxu0 %vm727_vm3, %v1933_v14  ;;  %v4183_v14 = vpack.c.bf16 %v2408_v11, %v2407_v9 }
 0x521   : > { %3370 = vmatpush3.bf16.msra.mxu0 %v1989_v13  ;;  %3371 = vmatprep.mubr.msk.bf16.mxu0 %vm3634_vm2, %v3633_v1  ;;  %v2392_v13 = vld [vmem:[%s4344_s12 + $0x58] sm:$0xff] }
 0x522   : > { %3375 = vmatprep.subr.bf16.mxu0 %v3633_v1  ;;  %v4192_v18 = vpack.c.bf16 %v2392_v13, %v2391_v12 }
 0x52c   : > { %3372 = vmatmul.mubr.msk.bf16.vlgmr.msra.gmra.mrb[4].mxu0 %vm727_vm3, %v1982_v6  ;;  %v4160_v6 = vpack.c.bf16 %v2406_v5, %v2405_v4  ;;  %v2361_v4 = vld [vmem:[%s605_s1 + $0x10] sm:$0xff] }
 0x52d   : > { %3376 = vmatpush3.bf16.msra.mxu0 %v2041_v16  ;;  %3377 = vmatprep.mubr.msk.bf16.mxu0 %vm3634_vm2, %v3633_v1  ;;  %v2410_v16 = vld [vmem:[%s4344_s12 + $0xe8] sm:$0xff] }
 0x52e   : > { %3381 = vmatprep.subr.bf16.mxu0 %v3633_v1 }
 0x538   : > { %3378 = vmatmul.mubr.msk.bf16.vlgmr.msra.gmra.mrb[4].mxu0 %vm727_vm3, %v2036_v19  ;;  %v4195_v19 = vpack.c.bf16 %v2410_v16, %v2409_v15 }
 0x539   : > { %3382 = vmatpush3.bf16.msra.mxu0 %v2092_v20  ;;  %3383 = vmatprep.mubr.msk.bf16.mxu0 %vm3634_vm2, %v3633_v1  ;;  %v2393_v20 = vld [vmem:[%s4344_s12 + $0x60] sm:$0xff] }
 0x544   : > { %3384 = vmatmul.mubr.msk.bf16.vlgmr.msra.gmra.mrb[4].mxu0 %vm727_vm3, %v2087_v21  ;;  %v2394_v21 = vld [vmem:[%s4344_s12 + $0x68] sm:$0xff] }
 0x545   : > { %3402 = vmatprep.mubr.msk.f32.mxu0 %vm3634_vm2, %v3633_v1 }
 0x617   : > { %v2128_v25 = vpop.f32.mrb[4].mxu0 }
 0x618   : > { %v3487_v26 = vadd.f32 %v2128_v25, %v1672_v24  ;;  %v3385_v27 = vpop.f32.mrb[5].mxu0  ;;  %v4210_v24 = vpack.c.bf16 %v2394_v21, %v2393_v20  ;;  %v4213_v25 = vpack.c.bf16 %v2412_v23, %v2411_v22 }
 0x619   : > { %v2131_v28 = vpop.f32.mrb[6].mxu0  ;;  %v2396_v27 = vld [vmem:[%s4344_s12 + $0x78] sm:$0xff] }
 0x61a   : > { %v2135_v29 = vpack.c.bf16 %v3487_v26, %v3487_v26  ;;  %v3386_v30 = vpop.f32.mrb[7].mxu0  ;;  %v2395_v26 = vld [vmem:[%s4344_s12 + $0x70] sm:$0xff] }
 0x61b   : > { %v4222_v28 = vpack.c.bf16 %v2396_v27, %v2395_v26  ;;  %v2275_v30 = vld [vmem:[%s610_s0 + $0x8] sm:$0xff] }
 0x61c   : > { %3390 = vmatmul.mubr.msk.bf16.vlgmr.msra.gmra.mrb[4].mxu1 %vm727_vm3, %v2135_v29  ;;  %v2274_v29 = vld [vmem:[%s610_s0] sm:$0xff] }
 0x61d   : > { %3395 = vmatprep.mubr.msk.f32.mxu1 %vm2185_vm5, %v2183_v31 }
 0x6ef   : > { %v2177_v32 = vpop.f32.mrb[4].mxu1 }
 0x6f0   : > { %v3391_v34 = vpop.f32.mrb[5].mxu1  ;;  %3393 = vmatprep.subr.msk.mxu1 %vm2192_vm6, %v2177_v32 }
 0x6f1   : > { %v2180_v35 = vpop.f32.mrb[6].mxu1  ;;  %3394 = vmatpush3.msk.msra.mxu1 %vm2192_vm6, %v2177_v32  ;;  %v2276_v32 = vld [vmem:[%s610_s0 + $0x10] sm:$0xff] }
 0x6f2   : > { %v3392_v36 = vpop.f32.mrb[7].mxu1  ;;  %3396 = vmatmul.mubr.msk.f32.vlgmr.msra.gmra.mrb[8].mxu1 %vm2185_vm5, %v2184_v33  ;;  %2292 = vmatprep.subr.bf16.mxu1 %v3602_v37  ;;  %v2277_v35 = vld [vmem:[%s610_s0 + $0x18] sm:$0xff] }
 0x6f3   : > { %2293 = vmatpush1.bf16.msra.mxu1 %v3600_v38  ;;  %2324 = vmatprep.mubr.bf16.mxu1 %v3638_v39 }
 0x6f4   : > { %3411 = vmatprep.subr.bf16.mxu1 %v4088_v45 }
 0x7c5   : > { %v3397_v40 = vpop.f32.mrb[8].mxu1 }
 0x7c6   : > { %v2262_v41 = vpop.f32.mrb[9].mxu1 }
 0x7c7   : > { %v2271_v42 = vpack.c.bf16 %v3397_v40, %v2262_v41 }
 0x7c9   : > { %3080 = vmatmul.mubr.msk.bf16.vlgmr.msra.gmra.mrb[12].mxu1 %vm2288_vm7, %v2271_v42 }
 0x7ca   : > { %3413 = vmatpush3.bf16.msra.mxu1 %v4096_v48 }
 0x7cb   : > { %3415 = vmatprep.subr.bf16.mxu1 %v4106_v51 }
 0x7ce   : > { %3417 = vmatpush3.bf16.msra.mxu1 %v4114_v54 }
 0x7cf   : > { %3419 = vmatprep.subr.bf16.mxu1 %v4124_v57 }
 0x7d2   : > { %3421 = vmatpush3.bf16.msra.mxu1 %v4132_v60 }
 0x7d3   : > { %3423 = vmatprep.subr.bf16.mxu1 %v4142_v63 }
 0x7d6   : > { %3425 = vmatpush3.bf16.msra.mxu1 %v4150_v3 }
 0x7d7   : > { %3427 = vmatprep.subr.bf16.mxu1 %v4160_v6 }
 0x7da   : > { %3429 = vmatpush3.bf16.msra.mxu1 %v4171_v10 }
 0x7db   : > { %3431 = vmatprep.subr.bf16.mxu1 %v4183_v14 }
 0x7de   : > { %3433 = vmatpush3.bf16.msra.mxu1 %v4192_v18 }
 0x7df   : > { %3435 = vmatprep.subr.bf16.mxu1 %v4195_v19 }
 0x7e2   : > { %3437 = vmatpush3.bf16.msra.mxu1 %v4210_v24 }
 0x7e3   : > { %3439 = vmatprep.subr.bf16.mxu1 %v4213_v25 }
 0x7e6   : > { %3441 = vmatpush3.bf16.msra.mxu1 %v4222_v28 }
 0x89c   : > { %v2326_v31 = vpop.f32.mrb[12].mxu1 }
 0x89d   : > { %v2327_v33 = vadd.f32 %v2326_v31, %v2274_v29  ;;  %v2328_v34 = vpop.f32.mrb[13].mxu1 }
 0x89e   : > { %v2329_v36 = vadd.f32 %v2328_v34, %v2275_v30  ;;  %v2330_v37 = vpop.f32.mrb[14].mxu1 }
 0x89f   : > { %v2335_v38 = vsub.f32 0.0, %v2327_v33  ;;  %v2331_v39 = vadd.f32 %v2330_v37, %v2276_v32  ;;  %v2332_v40 = vpop.f32.mrb[15].mxu1  ;;  %v2485_v37 = vld [vmem:[%s4345_s13 + $0x8] sm:$0xff] }
 0x8a0   : > { %v2336_v41 = vsub.f32 0.0, %v2329_v36  ;;  %v2333_v42 = vadd.f32 %v2332_v40, %v2277_v35  ;;  %v2484_v40 = vld [vmem:[%s4345_s13] sm:$0xff] }
 0x8a1   : > { %v2339_v43 = vmul.f32 1.442695, %v2335_v38  ;;  %v2337_v44 = vsub.f32 0.0, %v2331_v39  ;;  %v2487_v38 = vld [vmem:[%s4345_s13 + $0x18] sm:$0xff] }
 0x8a2   : > { %v2341_v46 = vmul.f32 1.442695, %v2336_v41  ;;  %v2338_v47 = vsub.f32 0.0, %v2333_v42  ;;  %v4256_v39 = vpack.c.bf16 %v2487_v38, %v2485_v37  ;;  %v2486_v41 = vld [vmem:[%s4345_s13 + $0x10] sm:$0xff] }
 0x8a3   : > { %3603 = vpow2.f32 %v2339_v43  ;;  %v2343_v49 = vmul.f32 1.442695, %v2337_v44  ;;  %v4264_v42 = vpack.c.bf16 %v2486_v41, %v2484_v40 }
 0x8a4   : > { %3605 = vpow2.f32 %v2341_v46  ;;  %v2345_v50 = vmul.f32 1.442695, %v2338_v47  ;;  %3443 = vmatprep.subr.bf16.mxu1 %v4256_v39 }
 0x8a5   : > { %3607 = vpow2.f32 %v2343_v49 }
 0x8a6   : > { %3609 = vpow2.f32 %v2345_v50 }
 0x8ad   : > { %v3604_v52 = vpop.eup %3603 }
 0x8ae   : > { %v3606_v53 = vpop.eup %3605  ;;  %v2347_v55 = vadd.f32 1.0, %v3604_v52 }
 0x8af   : > { %v3608_v56 = vpop.eup %3607  ;;  %v2348_v58 = vadd.f32 1.0, %v3606_v53 }
 0x8b0   : > { %v3610_v59 = vpop.eup %3609  ;;  %3611 = vrcp.f32 %v2347_v55  ;;  %v2349_v61 = vadd.f32 1.0, %v3608_v56 }
 0x8b1   : > { %3613 = vrcp.f32 %v2348_v58  ;;  %v2350_v62 = vadd.f32 1.0, %v3610_v59 }
 0x8b2   : > { %3615 = vrcp.f32 %v2349_v61 }
 0x8b3   : > { %3617 = vrcp.f32 %v2350_v62 }
 0x8ba   : > { %v3612_v0 = vpop.eup %3611 }
 0x8bb   : > { %v3614_v5 = vpop.eup %3613  ;;  %v4237_v12 = vmul.f32 %v3612_v0, %v2359_v2  ;;  %v2672_v0 = vld [vmem:[%s4346_s14] sm:$0xff]  ;;  %v2673_v2 = vld [vmem:[%s4346_s14 + $0x8] sm:$0xff] }
 0x8bc   : > { %v3616_v9 = vpop.eup %3615  ;;  %v4241_v15 = vmul.f32 %v3614_v5, %v2360_v7  ;;  %v3479_v5 = vpack.c.bf16 %v2673_v2, %v2672_v0 }
 0x8bd   : > { %v3618_v11 = vpop.eup %3617  ;;  %v4239_v13 = vmul.f32 %v3616_v9, %v2361_v4  ;;  %v3639_v4 = vmov 0.0|0.0  }
 0x8be   : > { %v4243_v16 = vmul.f32 %v3618_v11, %v2362_v8  ;;  %3478 = vmatprep.subr.bf16.mxu0 %v3639_v4 }
 0x8bf   : > { %v2367_v20 = vadd.f32 %v4239_v13, %v4237_v12  ;;  %3480 = vmatpush3.bf16.msra.mxu0 %v3479_v5 }
 0x8c0   : > { %v2374_v21 = vadd.f32 %v4243_v16, %v4241_v15  ;;  %3405 = vmatprep.subr.mxu0 %v3633_v1 }
 0x8c1   : > { %v2368_v22 = vrot.slane %v2367_v20, 4 }
 0x8c2   : > { %v2375_v23 = vrot.slane %v2374_v21, 4 }
 0x8c3   : > { %v2369_v26 = vadd.f32 %v2368_v22, %v2367_v20 }
 0x8c4   : > { %v2376_v27 = vadd.f32 %v2375_v23, %v2374_v21 }
 0x8c5   : > { %v2370_v29 = vrot.slane %v2369_v26, 2 }
 0x8c6   : > { %v2377_v30 = vrot.slane %v2376_v27, 2 }
 0x8c7   : > { %v2371_v31 = vadd.f32 %v2370_v29, %v2369_v26 }
 0x8c8   : > { %v2378_v32 = vadd.f32 %v2377_v30, %v2376_v27  ;;  %v2749_v30 = vld [vmem:[%s4348_s16] sm:$0xf] }
 0x8c9   : > { %v2372_v33 = vrot.slane %v2371_v31, 1 }
 0x8ca   : > { %v2379_v34 = vrot.slane %v2378_v32, 1 }
 0x8cb   : > { %v2373_v36 = vadd.f32 %v2372_v33, %v2371_v31  ;;  %v2674_v31 = vld [vmem:[%s4347_s15] sm:$0x1] }
 0x8cc   : > { %v2380_v35 = vadd.f32 %v2379_v34, %v2378_v32 }
 0x8ce   : > { %2477 = vmatprep.mubr.f32.mxu1 %v2380_v35 }
 0x8cf   : > { %2478 = vmatmul.mubr.f32.vlgmr.msra.gmra.mrb[10].mxu1 %v2373_v36  ;;  %v2750_v36 = vld [vmem:[%s4349_s17] sm:$0x1] }
 0x8d0   : > { %2555 = vmatprep.mubr.f32.mxu1 %v3633_v1  ;;  %3445 = vmatpush1.bf16.msra.mxu1 %v4264_v42 }
 0x8d1   : > { %3447 = vmatprep.subr.bf16.mxu1 %v4088_v45 }
 0x9a2   : > { %v3182_v43 = vpop.f32.mrb[10].mxu1 }
 0x9a3   : > { %v3183_v44 = vpop.f32.mrb[11].mxu1 }
 0x9a4   : > { %v3184_v46 = vadd.f32 %v3183_v44, %v3182_v43 }
 0x9a6   : > { %v4269_v47 = vmul.f32 0.00390625, %v3184_v46 }
 0x9a8   : > { %3081 = vmatmul.mubr.msk.f32.vlgmr.msra.gmra.mrb[16].mxu1 %vm2288_vm7, %v4269_v47 }
 0x9a9   : > { %3449 = vmatpush3.bf16.msra.mxu1 %v4096_v48 }
 0x9aa   : > { %3451 = vmatprep.subr.bf16.mxu1 %v4106_v51 }
 0x9ad   : > { %3453 = vmatpush3.bf16.msra.mxu1 %v4114_v54 }
 0x9ae   : > { %3455 = vmatprep.subr.bf16.mxu1 %v4124_v57 }
 0x9b1   : > { %3457 = vmatpush3.bf16.msra.mxu1 %v4132_v60 }
 0x9b2   : > { %3459 = vmatprep.subr.bf16.mxu1 %v4142_v63 }
 0x9b5   : > { %3461 = vmatpush3.bf16.msra.mxu1 %v4150_v3 }
 0x9b6   : > { %3463 = vmatprep.subr.bf16.mxu1 %v4160_v6 }
 0x9b9   : > { %3465 = vmatpush3.bf16.msra.mxu1 %v4171_v10 }
 0x9ba   : > { %3467 = vmatprep.subr.bf16.mxu1 %v4183_v14 }
 0x9bd   : > { %3469 = vmatpush3.bf16.msra.mxu1 %v4192_v18 }
 0x9be   : > { %3471 = vmatprep.subr.bf16.mxu1 %v4195_v19 }
 0x9c1   : > { %3473 = vmatpush3.bf16.msra.mxu1 %v4210_v24 }
 0x9c2   : > { %3475 = vmatprep.subr.bf16.mxu1 %v4213_v25 }
 0x9c5   : > { %3477 = vmatpush3.bf16.msra.mxu1 %v4222_v28 }
 0xa7b   : > { %v2557_v45 = vpop.f32.mrb[16].mxu1 }
 0xa7c   : > { %v2565_v48 = vrot.slane %v2557_v45, %v3915_v17  ;;  %v2559_v51 = vpop.f32.mrb[17].mxu1 }
 0xa7d   : > { %v2569_v54 = vrot.slane %v2559_v51, %v3915_v17 }
 0xa7e   : > { %v2570_v57 = vsub.f32 %v4237_v12, %v2565_v48  ;;  %v2572_v60 = vsub.f32 %v4239_v13, %v2565_v48 }
 0xa7f   : > { %v2571_v63 = vsub.f32 %v4241_v15, %v2569_v54  ;;  %v2573_v3 = vsub.f32 %v4243_v16, %v2569_v54 }
 0xa80   : > { %v2574_v6 = vmul.f32 %v2570_v57, %v2570_v57  ;;  %v2576_v10 = vmul.f32 %v2572_v60, %v2572_v60 }
 0xa81   : > { %v2575_v14 = vmul.f32 %v2571_v63, %v2571_v63  ;;  %v2577_v18 = vmul.f32 %v2573_v3, %v2573_v3 }
 0xa82   : > { %v2578_v19 = vadd.f32 %v2576_v10, %v2574_v6 }
 0xa83   : > { %v2585_v24 = vadd.f32 %v2577_v18, %v2575_v14 }
 0xa84   : > { %v2579_v25 = vrot.slane %v2578_v19, 4 }
 0xa85   : > { %v2586_v28 = vrot.slane %v2585_v24, 4 }
 0xa86   : > { %v2580_v49 = vadd.f32 %v2579_v25, %v2578_v19 }
 0xa87   : > { %v2587_v50 = vadd.f32 %v2586_v28, %v2585_v24 }
 0xa88   : > { %v2581_v52 = vrot.slane %v2580_v49, 2 }
 0xa89   : > { %v2588_v53 = vrot.slane %v2587_v50, 2 }
 0xa8a   : > { %v2582_v55 = vadd.f32 %v2581_v52, %v2580_v49 }
 0xa8b   : > { %v2589_v56 = vadd.f32 %v2588_v53, %v2587_v50 }
 0xa8c   : > { %v2583_v58 = vrot.slane %v2582_v55, 1 }
 0xa8d   : > { %v2590_v59 = vrot.slane %v2589_v56, 1 }
 0xa8e   : > { %v2584_v62 = vadd.f32 %v2583_v58, %v2582_v55 }
 0xa8f   : > { %v2591_v61 = vadd.f32 %v2590_v59, %v2589_v56 }
 0xa91   : > { %2656 = vmatprep.mubr.f32.mxu1 %v2591_v61 }
 0xa92   : > { %2657 = vmatmul.mubr.f32.vlgmr.msra.gmra.mrb[18].mxu1 %v2584_v62 }
 0xb65   : > { %v3217_v7 = vpop.f32.mrb[18].mxu1 }
 0xb66   : > { %v3218_v8 = vpop.f32.mrb[19].mxu1 }
 0xb67   : > { %v3219_v9 = vadd.f32 %v3218_v8, %v3217_v7 }
 0xb69   : > { %v2662_v11 = vmul.f32 0.00390625, %v3219_v9 }
 0xb6b   : > { %v2663_v20 = vmax.f32 %v2662_v11, 0.0 }
 0xb6d   : > { %3619 = vrsqrt.f32 %v2663_v20  ;;  %vm2666_vm8 = vcmp.eq.f32.partialorder %v2663_v20, inf  ;;  %v2669_v23 = vand.u32 2147483648, %v2663_v20  ;;  %vm2668_vm9 = vcmp.eq.f32.partialorder %v2663_v20, 0.0 }
 0xb77   : > { %v3620_v21 = vpop.eup %3619 }
 0xb78   : > { %v2665_v22 = vmul.f32 %v3620_v21, %v2663_v20 }
 0xb7a   : > { %v2667_v26 = vsel %vm2666_vm8, %v2663_v20, %v2665_v22 }
 0xb7b   : > { %v2670_v27 = vsel %vm2668_vm9, %v2669_v23, %v2667_v26 }
 0xb7c   : > { %v2671_v29 = vadd.f32 %v2670_v27, %v4269_v47 }
 0xb7e   : > { %3403 = vmatmul.mubr.msk.f32.vlgmr.msra.gmra.mrb[8].mxu0 %vm2288_vm7, %v2671_v29 }
 0xb7f   : > { %3407 = vmatprep.mubr.msk.f32.mxu0 %vm3634_vm2, %v3633_v1  ;;  %3406 = vmatpush3.msk.msra.mxu0 %vm2754_vm10, %v2749_v30 }
 0xb80   : > { %3482 = vmatprep.subr.bf16.mxu0 %v4256_v39 }
 0xc51   : > { %v2744_v32 = vpop.f32.mrb[8].mxu0 }
 0xc52   : > { %v2745_v33 = vadd.f32 %v2744_v32, %v2674_v31  ;;  %v3404_v34 = vpop.f32.mrb[9].mxu0 }
 0xc54   : > { %v2748_v35 = vmax.f32 %v2745_v33, 0.0 }
 0xc56   : > { %3408 = vmatmul.mubr.msk.f32.vlgmr.msra.gmra.mrb[10].mxu0 %vm727_vm3, %v2748_v35 }
 0xc57   : > { %3484 = vmatpush1.bf16.msra.mxu0 %v4264_v42  ;;  %2901 = vmatprep.mubr.f32.mxu0 %v3633_v1 }
 0xd29   : > { %v2824_v37 = vpop.f32.mrb[10].mxu0 }
 0xd2a   : > { %v2825_v38 = vadd.f32 %v2824_v37, %v2750_v36  ;;  %v3409_v39 = vpop.f32.mrb[11].mxu0 }
 0xd2c   : > { %v2828_v40 = vsub.f32 0.0, %v2825_v38 }
 0xd2e   : > { %v2829_v41 = vmul.f32 1.442695, %v2828_v40 }
 0xd30   : > { %3621 = vpow2.f32 %v2829_v41 }
 0xd3a   : > { %v3622_v43 = vpop.eup %3621 }
 0xd3b   : > { %v2831_v44 = vadd.f32 1.0, %v3622_v43 }
 0xd3d   : > { %3623 = vrcp.f32 %v2831_v44 }
 0xd47   : > { %v3624_v46 = vpop.eup %3623 }
 0xd48   : > { %3085 = vmatmul.mubr.msk.f32.vlgmr.msra.gmra.mrb[12].mxu0 %vm2288_vm7, %v3624_v46 }
 0xe1b   : > { %v2903_v42 = vpop.f32.mrb[12].mxu0 }
 0xe1c   : > { %v2911_v1 = vrot.slane %v2903_v42, %v3915_v17  ;;  %v2905_v47 = vpop.f32.mrb[13].mxu0 }
 0xe1d   : > { %v2915_v45 = vrot.slane %v2905_v47, %v3915_v17 }
 0xe1e   : > { %v2916_v48 = vmul.f32 %v2911_v1, %v4237_v12  ;;  %v2918_v51 = vmul.f32 %v2911_v1, %v4239_v13 }
 0xe1f   : > { %v2917_v54 = vmul.f32 %v2915_v45, %v4241_v15  ;;  %v2919_v57 = vmul.f32 %v2915_v45, %v4243_v16 }
 0xe20   : > { %v2920_v60 = vmax.f32 %v2916_v48, 0.0  ;;  %v2922_v63 = vmax.f32 %v2918_v51, 0.0 }
 0xe21   : > { %v2921_v3 = vmax.f32 %v2917_v54, 0.0  ;;  %v2923_v6 = vmax.f32 %v2919_v57, 0.0 }
 0xe22   : > { %v2924_v10 = vmin.f32 %v2920_v60, 1.0  ;;  %v2926_v14 = vmin.f32 %v2922_v63, 1.0 }
 0xe23   : > { %v2925_v18 = vmin.f32 %v2921_v3, 1.0  ;;  %v2927_v17 = vmin.f32 %v2923_v6, 1.0 }
 0xe24   : > { %2928 = vst [vmem:[%s615_s30] sm:$0xff] %v2924_v10  ;;  %2930 = vst [vmem:[%s615_s30 + $0x10] sm:$0xff] %v2926_v14 }
 0xe25   : > { %2929 = vst [vmem:[%s615_s30 + $0x8] sm:$0xff] %v2925_v18  ;;  %2931 = vst [vmem:[%s615_s30 + $0x18] sm:$0xff] %v2927_v17 }
 0xe26 PF: > { %s28_s27 = sadd.s32 1, %s3631_s27  }
 0xe27   : > { %p25_p4 = scmp.ge.s32.totalorder %s28_s27, 4  }
 0xe29   :  { %27 = sbr.rel (!%p25_p4) target bundleno = 4 (0x4), region = 152 }

</bundles_post_ra>
